<compile_context>
chip_gen: v6e
topology: v6e:2x2x1
jax: 0.10.0
libtpu: 0.0.40
codegen_flags: <defaults>
</compile_context>

<pallas_src>
import numpy as np
import jax
import jax.numpy as jnp
from jax import lax
from jax.experimental import pallas as pl
from jax.experimental.pallas import tpu as pltpu


# --------------------------------------------------------------------------
# Fused batch-block kernel: conv1+pool -> conv2+pool -> fc1 -> fc2 -> fc3
# --------------------------------------------------------------------------
def net_kernel(x_ref,                 # (36*B, 32)  row-flattened, row-padded images
               k1_ref, b1r_ref,       # (6, 32, 90)  [c*3+dy],  (1, 90)
               k2_ref, b2r_ref,       # (6, 90, 96)  [c*3+dy],  (1, 96)
               gsel_ref,              # (6, B, 9B-3) 0/1 gather matrices for fc1
               w1p_ref, b1p_ref,      # (576, 128), (1, 128)
               w2p_ref, b2p_ref,      # (128, 128), (1, 128)
               w3p_ref, b3p_ref,      # (128, 128), (1, 128)
               o_ref,                 # (B, 128)    logits (first 10 lanes valid)
               act1_ref):             # VMEM scratch (18B-3, 90)
    f32 = jnp.float32
    M1 = act1_ref.shape[0]            # 18B - 3 : image b lives at rows [18b, 18b+14]
    M2 = gsel_ref.shape[2]            # 9B  - 3 : image b lives at rows [9b, 9b+5]

    def conv_pool(src_ref, k_ref, m_rows):
        # conv(3x3) + 2x2 max-pool as banded matmuls: r (row phase) x c (column
        # parity, folded into the weights) give the 4 pooling-window positions;
        # dy is accumulated.  Per-image padding rows stay row-local junk.
        pooled = None
        for r in range(2):
            acc0 = acc1 = None
            for dy in range(3):
                rows = src_ref[pl.ds(r + dy, m_rows, 2), :]
                p0 = jnp.dot(rows, k_ref[0 * 3 + dy], preferred_element_type=f32)
                p1 = jnp.dot(rows, k_ref[1 * 3 + dy], preferred_element_type=f32)
                acc0 = p0 if acc0 is None else acc0 + p0
                acc1 = p1 if acc1 is None else acc1 + p1
            ph = jnp.maximum(acc0, acc1)
            pooled = ph if pooled is None else jnp.maximum(pooled, ph)
        return pooled

    # ---- conv1 + pool (+bias, ReLU): (M1, 90), lanes = p*6 + c_out ---------
    act1_ref[...] = jnp.maximum(conv_pool(x_ref, k1_ref, M1) + b1r_ref[...], 0.0)

    # ---- conv2 + pool (+bias, ReLU): (M2, 96), lanes = wp*16 + c_out -------
    act2 = jnp.maximum(conv_pool(act1_ref, k2_ref, M2) + b2r_ref[...], 0.0)

    # ---- fc1 (576 -> 120, padded to 128): gather rows 9b+h2 via 0/1 matmuls,
    #      accumulate the six (96, 128) weight blocks -------------------------
    h1 = None
    for h2 in range(6):
        rows = jnp.dot(gsel_ref[h2], act2, preferred_element_type=f32)         # (B, 96)
        part = jnp.dot(rows, w1p_ref[pl.ds(h2 * 96, 96), :],
                       preferred_element_type=f32)                             # (B, 128)
        h1 = part if h1 is None else h1 + part
    h1 = jnp.maximum(h1 + b1p_ref[...], 0.0)

    # ---- fc2 (120 -> 84, padded) and fc3 (84 -> 10, padded to 128 lanes) ----
    h2v = jnp.maximum(
        jnp.dot(h1, w2p_ref[...], preferred_element_type=f32) + b2p_ref[...], 0.0)
    o_ref[...] = jnp.dot(h2v, w3p_ref[...], preferred_element_type=f32) + b3p_ref[...]


# --------------------------------------------------------------------------
# One-time host-side parameter re-layout (outside the kernel / jit).
# --------------------------------------------------------------------------
def prepare_params(params, block_b):
    w1 = np.asarray(params["conv1_w"], np.float32)   # (6, 1, 3, 3)
    b1 = np.asarray(params["conv1_b"], np.float32)   # (6,)
    w2 = np.asarray(params["conv2_w"], np.float32)   # (16, 6, 3, 3)
    b2 = np.asarray(params["conv2_b"], np.float32)   # (16,)
    fc1_w = np.asarray(params["fc1_w"], np.float32)  # (120, 576)
    fc1_b = np.asarray(params["fc1_b"], np.float32)
    fc2_w = np.asarray(params["fc2_w"], np.float32)  # (84, 120)
    fc2_b = np.asarray(params["fc2_b"], np.float32)
    fc3_w = np.asarray(params["fc3_w"], np.float32)  # (10, 84)
    fc3_b = np.asarray(params["fc3_b"], np.float32)

    # conv1 banded weights, column-parity split (pool folded into weights):
    #   k1[c, dy, 2p+c+dx, p*6+o] = w1[o, 0, dy, dx]
    k1 = np.zeros((2, 3, 32, 90), np.float32)
    p = np.arange(15)
    for c in range(2):
        for dy in range(3):
            for dx in range(3):
                for o in range(6):
                    k1[c, dy, 2 * p + c + dx, p * 6 + o] = w1[o, 0, dy, dx]
    k1 = k1.reshape(6, 32, 90)
    b1row = np.tile(b1, 15).reshape(1, 90).astype(np.float32)

    # conv2 banded weights, column-parity split:
    #   k2[c, dy, (2wp+c+dx)*6+cin, wp*16+o] = w2[o, cin, dy, dx]
    k2 = np.zeros((2, 3, 90, 96), np.float32)
    wp = np.arange(6)
    for c in range(2):
        for dy in range(3):
            for dx in range(3):
                for cin in range(6):
                    for o in range(16):
                        k2[c, dy, (2 * wp + c + dx) * 6 + cin, wp * 16 + o] = w2[o, cin, dy, dx]
    k2 = k2.reshape(6, 90, 96)
    b2row = np.tile(b2, 6).reshape(1, 96).astype(np.float32)

    # fc1 gather matrices: pick row 9b + h2 of the (9B-3, 96) conv2 slab.
    m2 = 9 * block_b - 3
    gsel = np.zeros((6, block_b, m2), np.float32)
    for h2 in range(6):
        for b in range(block_b):
            gsel[h2, b, 9 * b + h2] = 1.0

    # fc1: rows permuted from torch flatten (c2, h2, w2) to kernel order
    # (h2, w2, c2); outputs padded 120 -> 128 lanes.
    w1r = fc1_w.reshape(120, 16, 6, 6)                       # (m, c2, h2, w2)
    w1perm = np.transpose(w1r, (2, 3, 1, 0)).reshape(576, 120)
    w1p = np.zeros((576, 128), np.float32); w1p[:, :120] = w1perm
    b1p = np.zeros((1, 128), np.float32);   b1p[0, :120] = fc1_b

    w2p = np.zeros((128, 128), np.float32); w2p[:120, :84] = fc2_w.T
    b2p = np.zeros((1, 128), np.float32);   b2p[0, :84] = fc2_b

    w3p = np.zeros((128, 128), np.float32); w3p[:84, :10] = fc3_w.T
    b3p = np.zeros((1, 128), np.float32);   b3p[0, :10] = fc3_b

    prep = dict(k1=k1, b1row=b1row, k2=k2, b2row=b2row, gsel=gsel,
                w1p=w1p, b1p=b1p, w2p=w2p, b2p=b2p, w3p=w3p, b3p=b3p)
    return {k: jnp.asarray(v) for k, v in prep.items()}


# --------------------------------------------------------------------------
# Forward pass: one fused pallas_call, B images per grid step.
# --------------------------------------------------------------------------
def net_forward(x_nchw, prep, block_b=8):
    N = x_nchw.shape[0]
    B = block_b
    n_pad = ((N + B - 1) // B) * B

    x = x_nchw.reshape(N, 32, 32).astype(jnp.float32)
    if n_pad != N:
        x = jnp.concatenate([x, jnp.zeros((n_pad - N, 32, 32), jnp.float32)], axis=0)
    # Zero-pad each image to 36 rows and flatten rows: image b occupies rows
    # [36b, 36b+36), so one stride-2 sublane read covers all B images at once.
    x_flat = jnp.pad(x, ((0, 0), (0, 4), (0, 0))).reshape(n_pad * 36, 32)

    m1 = 18 * B - 3
    m2 = 9 * B - 3

    out = pl.pallas_call(
        net_kernel,
        out_shape=jax.ShapeDtypeStruct((n_pad, 128), jnp.float32),
        grid=(n_pad // B,),
        in_specs=[
            pl.BlockSpec((36 * B, 32), lambda n: (n, 0)),        # x rows
            pl.BlockSpec((6, 32, 90), lambda n: (0, 0, 0)),      # k1
            pl.BlockSpec((1, 90), lambda n: (0, 0)),             # b1row
            pl.BlockSpec((6, 90, 96), lambda n: (0, 0, 0)),      # k2
            pl.BlockSpec((1, 96), lambda n: (0, 0)),             # b2row
            pl.BlockSpec((6, B, m2), lambda n: (0, 0, 0)),       # gsel
            pl.BlockSpec((576, 128), lambda n: (0, 0)),          # w1p
            pl.BlockSpec((1, 128), lambda n: (0, 0)),            # b1p
            pl.BlockSpec((128, 128), lambda n: (0, 0)),          # w2p
            pl.BlockSpec((1, 128), lambda n: (0, 0)),            # b2p
            pl.BlockSpec((128, 128), lambda n: (0, 0)),          # w3p
            pl.BlockSpec((1, 128), lambda n: (0, 0)),            # b3p
        ],
        out_specs=pl.BlockSpec((B, 128), lambda n: (n, 0)),
        scratch_shapes=[pltpu.VMEM((m1, 90), jnp.float32)],      # pooled conv1 slab
        compiler_params=pltpu.CompilerParams(dimension_semantics=("parallel",)),
    )(x_flat, prep["k1"], prep["b1row"], prep["k2"], prep["b2row"], prep["gsel"],
      prep["w1p"], prep["b1p"], prep["w2p"], prep["b2p"], prep["w3p"], prep["b3p"])
    return out[:N, :10]


# --------------------------------------------------------------------------
# Pure-JAX reference with the original PyTorch layouts / semantics.
# --------------------------------------------------------------------------
def reference_forward(x_nchw, params):
    dn = ("NCHW", "OIHW", "NCHW")

    def conv_block(x, w, b):
        y = lax.conv_general_dilated(x, w, (1, 1), "VALID", dimension_numbers=dn)
        y = jnp.maximum(y + b.reshape(1, -1, 1, 1), 0.0)
        return lax.reduce_window(y, -jnp.inf, lax.max,
                                 (1, 1, 2, 2), (1, 1, 2, 2), "VALID")

    y = conv_block(x_nchw, params["conv1_w"], params["conv1_b"])
    y = conv_block(y, params["conv2_w"], params["conv2_b"])
    feat = y.reshape(y.shape[0], -1)                       # PyTorch NCHW flatten
    h = jnp.maximum(feat @ params["fc1_w"].T + params["fc1_b"], 0.0)
    h = jnp.maximum(h @ params["fc2_w"].T + params["fc2_b"], 0.0)
    return h @ params["fc3_w"].T + params["fc3_b"]


# --------------------------------------------------------------------------
# Deterministic synthetic parameters (PyTorch layouts / shapes).
# --------------------------------------------------------------------------
def init_params(key):
    ks = jax.random.split(key, 10)

    def normal(k, shape, scale):
        return (jax.random.normal(k, shape, jnp.float32) * scale).astype(jnp.float32)

    return {
        "conv1_w": normal(ks[0], (6, 1, 3, 3), 1.0 / np.sqrt(9.0)),
        "conv1_b": normal(ks[1], (6,), 0.1),
        "conv2_w": normal(ks[2], (16, 6, 3, 3), 1.0 / np.sqrt(54.0)),
        "conv2_b": normal(ks[3], (16,), 0.1),
        "fc1_w": normal(ks[4], (120, 576), 1.0 / np.sqrt(576.0)),
        "fc1_b": normal(ks[5], (120,), 0.05),
        "fc2_w": normal(ks[6], (84, 120), 1.0 / np.sqrt(120.0)),
        "fc2_b": normal(ks[7], (84,), 0.05),
        "fc3_w": normal(ks[8], (10, 84), 1.0 / np.sqrt(84.0)),
        "fc3_b": normal(ks[9], (10,), 0.05),
    }


if __name__ == "__main__":
    key = jax.random.PRNGKey(0)
    pkey, xkey = jax.random.split(key)
    params = init_params(pkey)

    BLOCK_B = 8                      # images per grid step (M ~128 for v5e; raise to 16 on v6e/v7x)
    prep = prepare_params(params, BLOCK_B)

    # N=16 images (2 grid steps of 8 -> both v7x TensorCores busy), 1x32x32 each.
    x = jax.random.normal(xkey, (16, 1, 32, 32), jnp.float32)

    fwd = jax.jit(lambda xb, pp: net_forward(xb, pp, block_b=BLOCK_B))
    out = jax.block_until_ready(fwd(x, prep))

    ref = reference_forward(x, params)
    assert out.shape == (16, 10), out.shape
    np.testing.assert_allclose(np.asarray(out), np.asarray(ref), rtol=2e-3, atol=2e-3)

    print("KERNEL_OK")
</pallas_src>

<mosaic_0001>
module attributes {stable_mosaic.version = 11 : i64} {
  func.func @net_kernel(%arg0: i32, %arg1: memref<288x32xf32, #tpu.memory_space<vmem>>, %arg2: memref<6x32x90xf32, #tpu.memory_space<vmem>>, %arg3: memref<1x90xf32, #tpu.memory_space<vmem>>, %arg4: memref<6x90x96xf32, #tpu.memory_space<vmem>>, %arg5: memref<1x96xf32, #tpu.memory_space<vmem>>, %arg6: memref<6x8x69xf32, #tpu.memory_space<vmem>>, %arg7: memref<576x128xf32, #tpu.memory_space<vmem>>, %arg8: memref<1x128xf32, #tpu.memory_space<vmem>>, %arg9: memref<128x128xf32, #tpu.memory_space<vmem>>, %arg10: memref<1x128xf32, #tpu.memory_space<vmem>>, %arg11: memref<128x128xf32, #tpu.memory_space<vmem>>, %arg12: memref<1x128xf32, #tpu.memory_space<vmem>>, %arg13: memref<8x128xf32, #tpu.memory_space<vmem>>, %arg14: memref<141x90xf32, #tpu.memory_space<vmem>>) attributes {dimension_semantics = [#tpu.dimension_semantics<parallel>], iteration_bounds = array<i64: 2>, scalar_prefetch = 0 : i64, scratch_operands = 1 : i64, tpu.core_type = #tpu.core_type<tc>, window_params = [{transform_indices = @transform_0, window_bounds = array<i64: 288, 32>}, {pipeline_mode = #tpu.pipeline_mode<synchronous>, transform_indices = @transform_1, window_bounds = array<i64: 6, 32, 90>}, {pipeline_mode = #tpu.pipeline_mode<synchronous>, transform_indices = @transform_2, window_bounds = array<i64: 1, 90>}, {pipeline_mode = #tpu.pipeline_mode<synchronous>, transform_indices = @transform_3, window_bounds = array<i64: 6, 90, 96>}, {pipeline_mode = #tpu.pipeline_mode<synchronous>, transform_indices = @transform_4, window_bounds = array<i64: 1, 96>}, {pipeline_mode = #tpu.pipeline_mode<synchronous>, transform_indices = @transform_5, window_bounds = array<i64: 6, 8, 69>}, {pipeline_mode = #tpu.pipeline_mode<synchronous>, transform_indices = @transform_6, window_bounds = array<i64: 576, 128>}, {pipeline_mode = #tpu.pipeline_mode<synchronous>, transform_indices = @transform_7, window_bounds = array<i64: 1, 128>}, {pipeline_mode = #tpu.pipeline_mode<synchronous>, transform_indices = @transform_8, window_bounds = array<i64: 128, 128>}, {pipeline_mode = #tpu.pipeline_mode<synchronous>, transform_indices = @transform_9, window_bounds = array<i64: 1, 128>}, {pipeline_mode = #tpu.pipeline_mode<synchronous>, transform_indices = @transform_10, window_bounds = array<i64: 128, 128>}, {pipeline_mode = #tpu.pipeline_mode<synchronous>, transform_indices = @transform_11, window_bounds = array<i64: 1, 128>}, {transform_indices = @transform_12, window_bounds = array<i64: 8, 128>}]} {
    %c0 = arith.constant 0 : index
    %c0_0 = arith.constant 0 : index
    %0 = tpu.strided_load %arg1[%c0, %c0_0] {strides = array<i32: 2, 1>} : memref<288x32xf32, #tpu.memory_space<vmem>>, vector<141x32xf32>
    %c0_1 = arith.constant 0 : index
    %c0_2 = arith.constant 0 : index
    %c0_3 = arith.constant 0 : index
    %1 = vector.load %arg2[%c0_1, %c0_2, %c0_3] : memref<6x32x90xf32, #tpu.memory_space<vmem>>, vector<1x32x90xf32>
    %2 = vector.shape_cast %1 : vector<1x32x90xf32> to vector<32x90xf32>
    %cst = arith.constant dense<0.000000e+00> : vector<141x90xf32>
    %3 = tpu.matmul %0, %2, %cst {dimension_numbers = #tpu.dot_dimension_numbers<[1], [0], [0], [1], [0, 0, 1, 1], [], []>} : vector<141x32xf32>, vector<32x90xf32>, vector<141x90xf32> -> vector<141x90xf32>
    %c3 = arith.constant 3 : index
    %c0_4 = arith.constant 0 : index
    %c0_5 = arith.constant 0 : index
    %4 = vector.load %arg2[%c3, %c0_4, %c0_5] : memref<6x32x90xf32, #tpu.memory_space<vmem>>, vector<1x32x90xf32>
    %5 = vector.shape_cast %4 : vector<1x32x90xf32> to vector<32x90xf32>
    %cst_6 = arith.constant dense<0.000000e+00> : vector<141x90xf32>
    %6 = tpu.matmul %0, %5, %cst_6 {dimension_numbers = #tpu.dot_dimension_numbers<[1], [0], [0], [1], [0, 0, 1, 1], [], []>} : vector<141x32xf32>, vector<32x90xf32>, vector<141x90xf32> -> vector<141x90xf32>
    %c1 = arith.constant 1 : index
    %c0_7 = arith.constant 0 : index
    %7 = tpu.strided_load %arg1[%c1, %c0_7] {strides = array<i32: 2, 1>} : memref<288x32xf32, #tpu.memory_space<vmem>>, vector<141x32xf32>
    %c1_8 = arith.constant 1 : index
    %c0_9 = arith.constant 0 : index
    %c0_10 = arith.constant 0 : index
    %8 = vector.load %arg2[%c1_8, %c0_9, %c0_10] : memref<6x32x90xf32, #tpu.memory_space<vmem>>, vector<1x32x90xf32>
    %9 = vector.shape_cast %8 : vector<1x32x90xf32> to vector<32x90xf32>
    %cst_11 = arith.constant dense<0.000000e+00> : vector<141x90xf32>
    %10 = tpu.matmul %7, %9, %cst_11 {dimension_numbers = #tpu.dot_dimension_numbers<[1], [0], [0], [1], [0, 0, 1, 1], [], []>} : vector<141x32xf32>, vector<32x90xf32>, vector<141x90xf32> -> vector<141x90xf32>
    %c4 = arith.constant 4 : index
    %c0_12 = arith.constant 0 : index
    %c0_13 = arith.constant 0 : index
    %11 = vector.load %arg2[%c4, %c0_12, %c0_13] : memref<6x32x90xf32, #tpu.memory_space<vmem>>, vector<1x32x90xf32>
    %12 = vector.shape_cast %11 : vector<1x32x90xf32> to vector<32x90xf32>
    %cst_14 = arith.constant dense<0.000000e+00> : vector<141x90xf32>
    %13 = tpu.matmul %7, %12, %cst_14 {dimension_numbers = #tpu.dot_dimension_numbers<[1], [0], [0], [1], [0, 0, 1, 1], [], []>} : vector<141x32xf32>, vector<32x90xf32>, vector<141x90xf32> -> vector<141x90xf32>
    %14 = arith.addf %3, %10 : vector<141x90xf32>
    %15 = arith.addf %6, %13 : vector<141x90xf32>
    %c2 = arith.constant 2 : index
    %c0_15 = arith.constant 0 : index
    %16 = tpu.strided_load %arg1[%c2, %c0_15] {strides = array<i32: 2, 1>} : memref<288x32xf32, #tpu.memory_space<vmem>>, vector<141x32xf32>
    %c2_16 = arith.constant 2 : index
    %c0_17 = arith.constant 0 : index
    %c0_18 = arith.constant 0 : index
    %17 = vector.load %arg2[%c2_16, %c0_17, %c0_18] : memref<6x32x90xf32, #tpu.memory_space<vmem>>, vector<1x32x90xf32>
    %18 = vector.shape_cast %17 : vector<1x32x90xf32> to vector<32x90xf32>
    %cst_19 = arith.constant dense<0.000000e+00> : vector<141x90xf32>
    %19 = tpu.matmul %16, %18, %cst_19 {dimension_numbers = #tpu.dot_dimension_numbers<[1], [0], [0], [1], [0, 0, 1, 1], [], []>} : vector<141x32xf32>, vector<32x90xf32>, vector<141x90xf32> -> vector<141x90xf32>
    %c5 = arith.constant 5 : index
    %c0_20 = arith.constant 0 : index
    %c0_21 = arith.constant 0 : index
    %20 = vector.load %arg2[%c5, %c0_20, %c0_21] : memref<6x32x90xf32, #tpu.memory_space<vmem>>, vector<1x32x90xf32>
    %21 = vector.shape_cast %20 : vector<1x32x90xf32> to vector<32x90xf32>
    %cst_22 = arith.constant dense<0.000000e+00> : vector<141x90xf32>
    %22 = tpu.matmul %16, %21, %cst_22 {dimension_numbers = #tpu.dot_dimension_numbers<[1], [0], [0], [1], [0, 0, 1, 1], [], []>} : vector<141x32xf32>, vector<32x90xf32>, vector<141x90xf32> -> vector<141x90xf32>
    %23 = arith.addf %14, %19 : vector<141x90xf32>
    %24 = arith.addf %15, %22 : vector<141x90xf32>
    %25 = arith.maximumf %23, %24 : vector<141x90xf32>
    %c1_23 = arith.constant 1 : index
    %c0_24 = arith.constant 0 : index
    %26 = tpu.strided_load %arg1[%c1_23, %c0_24] {strides = array<i32: 2, 1>} : memref<288x32xf32, #tpu.memory_space<vmem>>, vector<141x32xf32>
    %c0_25 = arith.constant 0 : index
    %c0_26 = arith.constant 0 : index
    %c0_27 = arith.constant 0 : index
    %27 = vector.load %arg2[%c0_25, %c0_26, %c0_27] : memref<6x32x90xf32, #tpu.memory_space<vmem>>, vector<1x32x90xf32>
    %28 = vector.shape_cast %27 : vector<1x32x90xf32> to vector<32x90xf32>
    %cst_28 = arith.constant dense<0.000000e+00> : vector<141x90xf32>
    %29 = tpu.matmul %26, %28, %cst_28 {dimension_numbers = #tpu.dot_dimension_numbers<[1], [0], [0], [1], [0, 0, 1, 1], [], []>} : vector<141x32xf32>, vector<32x90xf32>, vector<141x90xf32> -> vector<141x90xf32>
    %c3_29 = arith.constant 3 : index
    %c0_30 = arith.constant 0 : index
    %c0_31 = arith.constant 0 : index
    %30 = vector.load %arg2[%c3_29, %c0_30, %c0_31] : memref<6x32x90xf32, #tpu.memory_space<vmem>>, vector<1x32x90xf32>
    %31 = vector.shape_cast %30 : vector<1x32x90xf32> to vector<32x90xf32>
    %cst_32 = arith.constant dense<0.000000e+00> : vector<141x90xf32>
    %32 = tpu.matmul %26, %31, %cst_32 {dimension_numbers = #tpu.dot_dimension_numbers<[1], [0], [0], [1], [0, 0, 1, 1], [], []>} : vector<141x32xf32>, vector<32x90xf32>, vector<141x90xf32> -> vector<141x90xf32>
    %c2_33 = arith.constant 2 : index
    %c0_34 = arith.constant 0 : index
    %33 = tpu.strided_load %arg1[%c2_33, %c0_34] {strides = array<i32: 2, 1>} : memref<288x32xf32, #tpu.memory_space<vmem>>, vector<141x32xf32>
    %c1_35 = arith.constant 1 : index
    %c0_36 = arith.constant 0 : index
    %c0_37 = arith.constant 0 : index
    %34 = vector.load %arg2[%c1_35, %c0_36, %c0_37] : memref<6x32x90xf32, #tpu.memory_space<vmem>>, vector<1x32x90xf32>
    %35 = vector.shape_cast %34 : vector<1x32x90xf32> to vector<32x90xf32>
    %cst_38 = arith.constant dense<0.000000e+00> : vector<141x90xf32>
    %36 = tpu.matmul %33, %35, %cst_38 {dimension_numbers = #tpu.dot_dimension_numbers<[1], [0], [0], [1], [0, 0, 1, 1], [], []>} : vector<141x32xf32>, vector<32x90xf32>, vector<141x90xf32> -> vector<141x90xf32>
    %c4_39 = arith.constant 4 : index
    %c0_40 = arith.constant 0 : index
    %c0_41 = arith.constant 0 : index
    %37 = vector.load %arg2[%c4_39, %c0_40, %c0_41] : memref<6x32x90xf32, #tpu.memory_space<vmem>>, vector<1x32x90xf32>
    %38 = vector.shape_cast %37 : vector<1x32x90xf32> to vector<32x90xf32>
    %cst_42 = arith.constant dense<0.000000e+00> : vector<141x90xf32>
    %39 = tpu.matmul %33, %38, %cst_42 {dimension_numbers = #tpu.dot_dimension_numbers<[1], [0], [0], [1], [0, 0, 1, 1], [], []>} : vector<141x32xf32>, vector<32x90xf32>, vector<141x90xf32> -> vector<141x90xf32>
    %40 = arith.addf %29, %36 : vector<141x90xf32>
    %41 = arith.addf %32, %39 : vector<141x90xf32>
    %c3_43 = arith.constant 3 : index
    %c0_44 = arith.constant 0 : index
    %42 = tpu.strided_load %arg1[%c3_43, %c0_44] {strides = array<i32: 2, 1>} : memref<288x32xf32, #tpu.memory_space<vmem>>, vector<141x32xf32>
    %c2_45 = arith.constant 2 : index
    %c0_46 = arith.constant 0 : index
    %c0_47 = arith.constant 0 : index
    %43 = vector.load %arg2[%c2_45, %c0_46, %c0_47] : memref<6x32x90xf32, #tpu.memory_space<vmem>>, vector<1x32x90xf32>
    %44 = vector.shape_cast %43 : vector<1x32x90xf32> to vector<32x90xf32>
    %cst_48 = arith.constant dense<0.000000e+00> : vector<141x90xf32>
    %45 = tpu.matmul %42, %44, %cst_48 {dimension_numbers = #tpu.dot_dimension_numbers<[1], [0], [0], [1], [0, 0, 1, 1], [], []>} : vector<141x32xf32>, vector<32x90xf32>, vector<141x90xf32> -> vector<141x90xf32>
    %c5_49 = arith.constant 5 : index
    %c0_50 = arith.constant 0 : index
    %c0_51 = arith.constant 0 : index
    %46 = vector.load %arg2[%c5_49, %c0_50, %c0_51] : memref<6x32x90xf32, #tpu.memory_space<vmem>>, vector<1x32x90xf32>
    %47 = vector.shape_cast %46 : vector<1x32x90xf32> to vector<32x90xf32>
    %cst_52 = arith.constant dense<0.000000e+00> : vector<141x90xf32>
    %48 = tpu.matmul %42, %47, %cst_52 {dimension_numbers = #tpu.dot_dimension_numbers<[1], [0], [0], [1], [0, 0, 1, 1], [], []>} : vector<141x32xf32>, vector<32x90xf32>, vector<141x90xf32> -> vector<141x90xf32>
    %49 = arith.addf %40, %45 : vector<141x90xf32>
    %50 = arith.addf %41, %48 : vector<141x90xf32>
    %51 = arith.maximumf %49, %50 : vector<141x90xf32>
    %52 = arith.maximumf %25, %51 : vector<141x90xf32>
    %c0_53 = arith.constant 0 : index
    %c0_54 = arith.constant 0 : index
    %53 = vector.load %arg3[%c0_53, %c0_54] : memref<1x90xf32, #tpu.memory_space<vmem>>, vector<1x90xf32>
    %54 = vector.broadcast %53 : vector<1x90xf32> to vector<141x90xf32>
    %55 = arith.addf %52, %54 : vector<141x90xf32>
    %cst_55 = arith.constant 0.000000e+00 : f32
    %56 = vector.broadcast %cst_55 : f32 to vector<141x90xf32>
    %57 = arith.maximumf %55, %56 : vector<141x90xf32>
    %c0_56 = arith.constant 0 : index
    %c0_57 = arith.constant 0 : index
    %58 = vector.load %arg14[%c0_56, %c0_57] : memref<141x90xf32, #tpu.memory_space<vmem>>, vector<141x90xf32>
    tpu.vector_store %arg14[%c0_56, %c0_57], %57 {strides = array<i32>} : memref<141x90xf32, #tpu.memory_space<vmem>>, vector<141x90xf32>,
    %c0_58 = arith.constant 0 : index
    %c0_59 = arith.constant 0 : index
    %59 = tpu.strided_load %arg14[%c0_58, %c0_59] {strides = array<i32: 2, 1>} : memref<141x90xf32, #tpu.memory_space<vmem>>, vector<69x90xf32>
    %c0_60 = arith.constant 0 : index
    %c0_61 = arith.constant 0 : index
    %c0_62 = arith.constant 0 : index
    %60 = vector.load %arg4[%c0_60, %c0_61, %c0_62] : memref<6x90x96xf32, #tpu.memory_space<vmem>>, vector<1x90x96xf32>
    %61 = vector.shape_cast %60 : vector<1x90x96xf32> to vector<90x96xf32>
    %cst_63 = arith.constant dense<0.000000e+00> : vector<69x96xf32>
    %62 = tpu.matmul %59, %61, %cst_63 {dimension_numbers = #tpu.dot_dimension_numbers<[1], [0], [0], [1], [0, 0, 1, 1], [], []>} : vector<69x90xf32>, vector<90x96xf32>, vector<69x96xf32> -> vector<69x96xf32>
    %c3_64 = arith.constant 3 : index
    %c0_65 = arith.constant 0 : index
    %c0_66 = arith.constant 0 : index
    %63 = vector.load %arg4[%c3_64, %c0_65, %c0_66] : memref<6x90x96xf32, #tpu.memory_space<vmem>>, vector<1x90x96xf32>
    %64 = vector.shape_cast %63 : vector<1x90x96xf32> to vector<90x96xf32>
    %cst_67 = arith.constant dense<0.000000e+00> : vector<69x96xf32>
    %65 = tpu.matmul %59, %64, %cst_67 {dimension_numbers = #tpu.dot_dimension_numbers<[1], [0], [0], [1], [0, 0, 1, 1], [], []>} : vector<69x90xf32>, vector<90x96xf32>, vector<69x96xf32> -> vector<69x96xf32>
    %c1_68 = arith.constant 1 : index
    %c0_69 = arith.constant 0 : index
    %66 = tpu.strided_load %arg14[%c1_68, %c0_69] {strides = array<i32: 2, 1>} : memref<141x90xf32, #tpu.memory_space<vmem>>, vector<69x90xf32>
    %c1_70 = arith.constant 1 : index
    %c0_71 = arith.constant 0 : index
    %c0_72 = arith.constant 0 : index
    %67 = vector.load %arg4[%c1_70, %c0_71, %c0_72] : memref<6x90x96xf32, #tpu.memory_space<vmem>>, vector<1x90x96xf32>
    %68 = vector.shape_cast %67 : vector<1x90x96xf32> to vector<90x96xf32>
    %cst_73 = arith.constant dense<0.000000e+00> : vector<69x96xf32>
    %69 = tpu.matmul %66, %68, %cst_73 {dimension_numbers = #tpu.dot_dimension_numbers<[1], [0], [0], [1], [0, 0, 1, 1], [], []>} : vector<69x90xf32>, vector<90x96xf32>, vector<69x96xf32> -> vector<69x96xf32>
    %c4_74 = arith.constant 4 : index
    %c0_75 = arith.constant 0 : index
    %c0_76 = arith.constant 0 : index
    %70 = vector.load %arg4[%c4_74, %c0_75, %c0_76] : memref<6x90x96xf32, #tpu.memory_space<vmem>>, vector<1x90x96xf32>
    %71 = vector.shape_cast %70 : vector<1x90x96xf32> to vector<90x96xf32>
    %cst_77 = arith.constant dense<0.000000e+00> : vector<69x96xf32>
    %72 = tpu.matmul %66, %71, %cst_77 {dimension_numbers = #tpu.dot_dimension_numbers<[1], [0], [0], [1], [0, 0, 1, 1], [], []>} : vector<69x90xf32>, vector<90x96xf32>, vector<69x96xf32> -> vector<69x96xf32>
    %73 = arith.addf %62, %69 : vector<69x96xf32>
    %74 = arith.addf %65, %72 : vector<69x96xf32>
    %c2_78 = arith.constant 2 : index
    %c0_79 = arith.constant 0 : index
    %75 = tpu.strided_load %arg14[%c2_78, %c0_79] {strides = array<i32: 2, 1>} : memref<141x90xf32, #tpu.memory_space<vmem>>, vector<69x90xf32>
    %c2_80 = arith.constant 2 : index
    %c0_81 = arith.constant 0 : index
    %c0_82 = arith.constant 0 : index
    %76 = vector.load %arg4[%c2_80, %c0_81, %c0_82] : memref<6x90x96xf32, #tpu.memory_space<vmem>>, vector<1x90x96xf32>
    %77 = vector.shape_cast %76 : vector<1x90x96xf32> to vector<90x96xf32>
    %cst_83 = arith.constant dense<0.000000e+00> : vector<69x96xf32>
    %78 = tpu.matmul %75, %77, %cst_83 {dimension_numbers = #tpu.dot_dimension_numbers<[1], [0], [0], [1], [0, 0, 1, 1], [], []>} : vector<69x90xf32>, vector<90x96xf32>, vector<69x96xf32> -> vector<69x96xf32>
    %c5_84 = arith.constant 5 : index
    %c0_85 = arith.constant 0 : index
    %c0_86 = arith.constant 0 : index
    %79 = vector.load %arg4[%c5_84, %c0_85, %c0_86] : memref<6x90x96xf32, #tpu.memory_space<vmem>>, vector<1x90x96xf32>
    %80 = vector.shape_cast %79 : vector<1x90x96xf32> to vector<90x96xf32>
    %cst_87 = arith.constant dense<0.000000e+00> : vector<69x96xf32>
    %81 = tpu.matmul %75, %80, %cst_87 {dimension_numbers = #tpu.dot_dimension_numbers<[1], [0], [0], [1], [0, 0, 1, 1], [], []>} : vector<69x90xf32>, vector<90x96xf32>, vector<69x96xf32> -> vector<69x96xf32>
    %82 = arith.addf %73, %78 : vector<69x96xf32>
    %83 = arith.addf %74, %81 : vector<69x96xf32>
    %84 = arith.maximumf %82, %83 : vector<69x96xf32>
    %c1_88 = arith.constant 1 : index
    %c0_89 = arith.constant 0 : index
    %85 = tpu.strided_load %arg14[%c1_88, %c0_89] {strides = array<i32: 2, 1>} : memref<141x90xf32, #tpu.memory_space<vmem>>, vector<69x90xf32>
    %c0_90 = arith.constant 0 : index
    %c0_91 = arith.constant 0 : index
    %c0_92 = arith.constant 0 : index
    %86 = vector.load %arg4[%c0_90, %c0_91, %c0_92] : memref<6x90x96xf32, #tpu.memory_space<vmem>>, vector<1x90x96xf32>
    %87 = vector.shape_cast %86 : vector<1x90x96xf32> to vector<90x96xf32>
    %cst_93 = arith.constant dense<0.000000e+00> : vector<69x96xf32>
    %88 = tpu.matmul %85, %87, %cst_93 {dimension_numbers = #tpu.dot_dimension_numbers<[1], [0], [0], [1], [0, 0, 1, 1], [], []>} : vector<69x90xf32>, vector<90x96xf32>, vector<69x96xf32> -> vector<69x96xf32>
    %c3_94 = arith.constant 3 : index
    %c0_95 = arith.constant 0 : index
    %c0_96 = arith.constant 0 : index
    %89 = vector.load %arg4[%c3_94, %c0_95, %c0_96] : memref<6x90x96xf32, #tpu.memory_space<vmem>>, vector<1x90x96xf32>
    %90 = vector.shape_cast %89 : vector<1x90x96xf32> to vector<90x96xf32>
    %cst_97 = arith.constant dense<0.000000e+00> : vector<69x96xf32>
    %91 = tpu.matmul %85, %90, %cst_97 {dimension_numbers = #tpu.dot_dimension_numbers<[1], [0], [0], [1], [0, 0, 1, 1], [], []>} : vector<69x90xf32>, vector<90x96xf32>, vector<69x96xf32> -> vector<69x96xf32>
    %c2_98 = arith.constant 2 : index
    %c0_99 = arith.constant 0 : index
    %92 = tpu.strided_load %arg14[%c2_98, %c0_99] {strides = array<i32: 2, 1>} : memref<141x90xf32, #tpu.memory_space<vmem>>, vector<69x90xf32>
    %c1_100 = arith.constant 1 : index
    %c0_101 = arith.constant 0 : index
    %c0_102 = arith.constant 0 : index
    %93 = vector.load %arg4[%c1_100, %c0_101, %c0_102] : memref<6x90x96xf32, #tpu.memory_space<vmem>>, vector<1x90x96xf32>
    %94 = vector.shape_cast %93 : vector<1x90x96xf32> to vector<90x96xf32>
    %cst_103 = arith.constant dense<0.000000e+00> : vector<69x96xf32>
    %95 = tpu.matmul %92, %94, %cst_103 {dimension_numbers = #tpu.dot_dimension_numbers<[1], [0], [0], [1], [0, 0, 1, 1], [], []>} : vector<69x90xf32>, vector<90x96xf32>, vector<69x96xf32> -> vector<69x96xf32>
    %c4_104 = arith.constant 4 : index
    %c0_105 = arith.constant 0 : index
    %c0_106 = arith.constant 0 : index
    %96 = vector.load %arg4[%c4_104, %c0_105, %c0_106] : memref<6x90x96xf32, #tpu.memory_space<vmem>>, vector<1x90x96xf32>
    %97 = vector.shape_cast %96 : vector<1x90x96xf32> to vector<90x96xf32>
    %cst_107 = arith.constant dense<0.000000e+00> : vector<69x96xf32>
    %98 = tpu.matmul %92, %97, %cst_107 {dimension_numbers = #tpu.dot_dimension_numbers<[1], [0], [0], [1], [0, 0, 1, 1], [], []>} : vector<69x90xf32>, vector<90x96xf32>, vector<69x96xf32> -> vector<69x96xf32>
    %99 = arith.addf %88, %95 : vector<69x96xf32>
    %100 = arith.addf %91, %98 : vector<69x96xf32>
    %c3_108 = arith.constant 3 : index
    %c0_109 = arith.constant 0 : index
    %101 = tpu.strided_load %arg14[%c3_108, %c0_109] {strides = array<i32: 2, 1>} : memref<141x90xf32, #tpu.memory_space<vmem>>, vector<69x90xf32>
    %c2_110 = arith.constant 2 : index
    %c0_111 = arith.constant 0 : index
    %c0_112 = arith.constant 0 : index
    %102 = vector.load %arg4[%c2_110, %c0_111, %c0_112] : memref<6x90x96xf32, #tpu.memory_space<vmem>>, vector<1x90x96xf32>
    %103 = vector.shape_cast %102 : vector<1x90x96xf32> to vector<90x96xf32>
    %cst_113 = arith.constant dense<0.000000e+00> : vector<69x96xf32>
    %104 = tpu.matmul %101, %103, %cst_113 {dimension_numbers = #tpu.dot_dimension_numbers<[1], [0], [0], [1], [0, 0, 1, 1], [], []>} : vector<69x90xf32>, vector<90x96xf32>, vector<69x96xf32> -> vector<69x96xf32>
    %c5_114 = arith.constant 5 : index
    %c0_115 = arith.constant 0 : index
    %c0_116 = arith.constant 0 : index
    %105 = vector.load %arg4[%c5_114, %c0_115, %c0_116] : memref<6x90x96xf32, #tpu.memory_space<vmem>>, vector<1x90x96xf32>
    %106 = vector.shape_cast %105 : vector<1x90x96xf32> to vector<90x96xf32>
    %cst_117 = arith.constant dense<0.000000e+00> : vector<69x96xf32>
    %107 = tpu.matmul %101, %106, %cst_117 {dimension_numbers = #tpu.dot_dimension_numbers<[1], [0], [0], [1], [0, 0, 1, 1], [], []>} : vector<69x90xf32>, vector<90x96xf32>, vector<69x96xf32> -> vector<69x96xf32>
    %108 = arith.addf %99, %104 : vector<69x96xf32>
    %109 = arith.addf %100, %107 : vector<69x96xf32>
    %110 = arith.maximumf %108, %109 : vector<69x96xf32>
    %111 = arith.maximumf %84, %110 : vector<69x96xf32>
    %c0_118 = arith.constant 0 : index
    %c0_119 = arith.constant 0 : index
    %112 = vector.load %arg5[%c0_118, %c0_119] : memref<1x96xf32, #tpu.memory_space<vmem>>, vector<1x96xf32>
    %113 = vector.broadcast %112 : vector<1x96xf32> to vector<69x96xf32>
    %114 = arith.addf %111, %113 : vector<69x96xf32>
    %cst_120 = arith.constant 0.000000e+00 : f32
    %115 = vector.broadcast %cst_120 : f32 to vector<69x96xf32>
    %116 = arith.maximumf %114, %115 : vector<69x96xf32>
    %c0_121 = arith.constant 0 : index
    %c0_122 = arith.constant 0 : index
    %c0_123 = arith.constant 0 : index
    %117 = vector.load %arg6[%c0_121, %c0_122, %c0_123] : memref<6x8x69xf32, #tpu.memory_space<vmem>>, vector<1x8x69xf32>
    %118 = vector.shape_cast %117 : vector<1x8x69xf32> to vector<8x69xf32>
    %cst_124 = arith.constant dense<0.000000e+00> : vector<8x96xf32>
    %119 = tpu.matmul %118, %116, %cst_124 {dimension_numbers = #tpu.dot_dimension_numbers<[1], [0], [0], [1], [0, 0, 1, 1], [], []>} : vector<8x69xf32>, vector<69x96xf32>, vector<8x96xf32> -> vector<8x96xf32>
    %c0_125 = arith.constant 0 : index
    %c0_126 = arith.constant 0 : index
    %120 = vector.load %arg7[%c0_125, %c0_126] : memref<576x128xf32, #tpu.memory_space<vmem>>, vector<96x128xf32>
    %cst_127 = arith.constant dense<0.000000e+00> : vector<8x128xf32>
    %121 = tpu.matmul %119, %120, %cst_127 {dimension_numbers = #tpu.dot_dimension_numbers<[1], [0], [0], [1], [0, 0, 1, 1], [], []>} : vector<8x96xf32>, vector<96x128xf32>, vector<8x128xf32> -> vector<8x128xf32>
    %c1_128 = arith.constant 1 : index
    %c0_129 = arith.constant 0 : index
    %c0_130 = arith.constant 0 : index
    %122 = vector.load %arg6[%c1_128, %c0_129, %c0_130] : memref<6x8x69xf32, #tpu.memory_space<vmem>>, vector<1x8x69xf32>
    %123 = vector.shape_cast %122 : vector<1x8x69xf32> to vector<8x69xf32>
    %cst_131 = arith.constant dense<0.000000e+00> : vector<8x96xf32>
    %124 = tpu.matmul %123, %116, %cst_131 {dimension_numbers = #tpu.dot_dimension_numbers<[1], [0], [0], [1], [0, 0, 1, 1], [], []>} : vector<8x69xf32>, vector<69x96xf32>, vector<8x96xf32> -> vector<8x96xf32>
    %c96 = arith.constant 96 : index
    %c0_132 = arith.constant 0 : index
    %125 = vector.load %arg7[%c96, %c0_132] : memref<576x128xf32, #tpu.memory_space<vmem>>, vector<96x128xf32>
    %cst_133 = arith.constant dense<0.000000e+00> : vector<8x128xf32>
    %126 = tpu.matmul %124, %125, %cst_133 {dimension_numbers = #tpu.dot_dimension_numbers<[1], [0], [0], [1], [0, 0, 1, 1], [], []>} : vector<8x96xf32>, vector<96x128xf32>, vector<8x128xf32> -> vector<8x128xf32>
    %127 = arith.addf %121, %126 : vector<8x128xf32>
    %c2_134 = arith.constant 2 : index
    %c0_135 = arith.constant 0 : index
    %c0_136 = arith.constant 0 : index
    %128 = vector.load %arg6[%c2_134, %c0_135, %c0_136] : memref<6x8x69xf32, #tpu.memory_space<vmem>>, vector<1x8x69xf32>
    %129 = vector.shape_cast %128 : vector<1x8x69xf32> to vector<8x69xf32>
    %cst_137 = arith.constant dense<0.000000e+00> : vector<8x96xf32>
    %130 = tpu.matmul %129, %116, %cst_137 {dimension_numbers = #tpu.dot_dimension_numbers<[1], [0], [0], [1], [0, 0, 1, 1], [], []>} : vector<8x69xf32>, vector<69x96xf32>, vector<8x96xf32> -> vector<8x96xf32>
    %c192 = arith.constant 192 : index
    %c0_138 = arith.constant 0 : index
    %131 = vector.load %arg7[%c192, %c0_138] : memref<576x128xf32, #tpu.memory_space<vmem>>, vector<96x128xf32>
    %cst_139 = arith.constant dense<0.000000e+00> : vector<8x128xf32>
    %132 = tpu.matmul %130, %131, %cst_139 {dimension_numbers = #tpu.dot_dimension_numbers<[1], [0], [0], [1], [0, 0, 1, 1], [], []>} : vector<8x96xf32>, vector<96x128xf32>, vector<8x128xf32> -> vector<8x128xf32>
    %133 = arith.addf %127, %132 : vector<8x128xf32>
    %c3_140 = arith.constant 3 : index
    %c0_141 = arith.constant 0 : index
    %c0_142 = arith.constant 0 : index
    %134 = vector.load %arg6[%c3_140, %c0_141, %c0_142] : memref<6x8x69xf32, #tpu.memory_space<vmem>>, vector<1x8x69xf32>
    %135 = vector.shape_cast %134 : vector<1x8x69xf32> to vector<8x69xf32>
    %cst_143 = arith.constant dense<0.000000e+00> : vector<8x96xf32>
    %136 = tpu.matmul %135, %116, %cst_143 {dimension_numbers = #tpu.dot_dimension_numbers<[1], [0], [0], [1], [0, 0, 1, 1], [], []>} : vector<8x69xf32>, vector<69x96xf32>, vector<8x96xf32> -> vector<8x96xf32>
    %c288 = arith.constant 288 : index
    %c0_144 = arith.constant 0 : index
    %137 = vector.load %arg7[%c288, %c0_144] : memref<576x128xf32, #tpu.memory_space<vmem>>, vector<96x128xf32>
    %cst_145 = arith.constant dense<0.000000e+00> : vector<8x128xf32>
    %138 = tpu.matmul %136, %137, %cst_145 {dimension_numbers = #tpu.dot_dimension_numbers<[1], [0], [0], [1], [0, 0, 1, 1], [], []>} : vector<8x96xf32>, vector<96x128xf32>, vector<8x128xf32> -> vector<8x128xf32>
    %139 = arith.addf %133, %138 : vector<8x128xf32>
    %c4_146 = arith.constant 4 : index
    %c0_147 = arith.constant 0 : index
    %c0_148 = arith.constant 0 : index
    %140 = vector.load %arg6[%c4_146, %c0_147, %c0_148] : memref<6x8x69xf32, #tpu.memory_space<vmem>>, vector<1x8x69xf32>
    %141 = vector.shape_cast %140 : vector<1x8x69xf32> to vector<8x69xf32>
    %cst_149 = arith.constant dense<0.000000e+00> : vector<8x96xf32>
    %142 = tpu.matmul %141, %116, %cst_149 {dimension_numbers = #tpu.dot_dimension_numbers<[1], [0], [0], [1], [0, 0, 1, 1], [], []>} : vector<8x69xf32>, vector<69x96xf32>, vector<8x96xf32> -> vector<8x96xf32>
    %c384 = arith.constant 384 : index
    %c0_150 = arith.constant 0 : index
    %143 = vector.load %arg7[%c384, %c0_150] : memref<576x128xf32, #tpu.memory_space<vmem>>, vector<96x128xf32>
    %cst_151 = arith.constant dense<0.000000e+00> : vector<8x128xf32>
    %144 = tpu.matmul %142, %143, %cst_151 {dimension_numbers = #tpu.dot_dimension_numbers<[1], [0], [0], [1], [0, 0, 1, 1], [], []>} : vector<8x96xf32>, vector<96x128xf32>, vector<8x128xf32> -> vector<8x128xf32>
    %145 = arith.addf %139, %144 : vector<8x128xf32>
    %c5_152 = arith.constant 5 : index
    %c0_153 = arith.constant 0 : index
    %c0_154 = arith.constant 0 : index
    %146 = vector.load %arg6[%c5_152, %c0_153, %c0_154] : memref<6x8x69xf32, #tpu.memory_space<vmem>>, vector<1x8x69xf32>
    %147 = vector.shape_cast %146 : vector<1x8x69xf32> to vector<8x69xf32>
    %cst_155 = arith.constant dense<0.000000e+00> : vector<8x96xf32>
    %148 = tpu.matmul %147, %116, %cst_155 {dimension_numbers = #tpu.dot_dimension_numbers<[1], [0], [0], [1], [0, 0, 1, 1], [], []>} : vector<8x69xf32>, vector<69x96xf32>, vector<8x96xf32> -> vector<8x96xf32>
    %c480 = arith.constant 480 : index
    %c0_156 = arith.constant 0 : index
    %149 = vector.load %arg7[%c480, %c0_156] : memref<576x128xf32, #tpu.memory_space<vmem>>, vector<96x128xf32>
    %cst_157 = arith.constant dense<0.000000e+00> : vector<8x128xf32>
    %150 = tpu.matmul %148, %149, %cst_157 {dimension_numbers = #tpu.dot_dimension_numbers<[1], [0], [0], [1], [0, 0, 1, 1], [], []>} : vector<8x96xf32>, vector<96x128xf32>, vector<8x128xf32> -> vector<8x128xf32>
    %151 = arith.addf %145, %150 : vector<8x128xf32>
    %c0_158 = arith.constant 0 : index
    %c0_159 = arith.constant 0 : index
    %152 = vector.load %arg8[%c0_158, %c0_159] : memref<1x128xf32, #tpu.memory_space<vmem>>, vector<1x128xf32>
    %153 = vector.broadcast %152 : vector<1x128xf32> to vector<8x128xf32>
    %154 = arith.addf %151, %153 : vector<8x128xf32>
    %cst_160 = arith.constant 0.000000e+00 : f32
    %155 = vector.broadcast %cst_160 : f32 to vector<8x128xf32>
    %156 = arith.maximumf %154, %155 : vector<8x128xf32>
    %c0_161 = arith.constant 0 : index
    %c0_162 = arith.constant 0 : index
    %157 = vector.load %arg9[%c0_161, %c0_162] : memref<128x128xf32, #tpu.memory_space<vmem>>, vector<128x128xf32>
    %cst_163 = arith.constant dense<0.000000e+00> : vector<8x128xf32>
    %158 = tpu.matmul %156, %157, %cst_163 {dimension_numbers = #tpu.dot_dimension_numbers<[1], [0], [0], [1], [0, 0, 1, 1], [], []>} : vector<8x128xf32>, vector<128x128xf32>, vector<8x128xf32> -> vector<8x128xf32>
    %c0_164 = arith.constant 0 : index
    %c0_165 = arith.constant 0 : index
    %159 = vector.load %arg10[%c0_164, %c0_165] : memref<1x128xf32, #tpu.memory_space<vmem>>, vector<1x128xf32>
    %160 = vector.broadcast %159 : vector<1x128xf32> to vector<8x128xf32>
    %161 = arith.addf %158, %160 : vector<8x128xf32>
    %cst_166 = arith.constant 0.000000e+00 : f32
    %162 = vector.broadcast %cst_166 : f32 to vector<8x128xf32>
    %163 = arith.maximumf %161, %162 : vector<8x128xf32>
    %c0_167 = arith.constant 0 : index
    %c0_168 = arith.constant 0 : index
    %164 = vector.load %arg11[%c0_167, %c0_168] : memref<128x128xf32, #tpu.memory_space<vmem>>, vector<128x128xf32>
    %cst_169 = arith.constant dense<0.000000e+00> : vector<8x128xf32>
    %165 = tpu.matmul %163, %164, %cst_169 {dimension_numbers = #tpu.dot_dimension_numbers<[1], [0], [0], [1], [0, 0, 1, 1], [], []>} : vector<8x128xf32>, vector<128x128xf32>, vector<8x128xf32> -> vector<8x128xf32>
    %c0_170 = arith.constant 0 : index
    %c0_171 = arith.constant 0 : index
    %166 = vector.load %arg12[%c0_170, %c0_171] : memref<1x128xf32, #tpu.memory_space<vmem>>, vector<1x128xf32>
    %167 = vector.broadcast %166 : vector<1x128xf32> to vector<8x128xf32>
    %168 = arith.addf %165, %167 : vector<8x128xf32>
    %c0_172 = arith.constant 0 : index
    %c0_173 = arith.constant 0 : index
    %169 = vector.load %arg13[%c0_172, %c0_173] : memref<8x128xf32, #tpu.memory_space<vmem>>, vector<8x128xf32>
    tpu.vector_store %arg13[%c0_172, %c0_173], %168 {strides = array<i32>} : memref<8x128xf32, #tpu.memory_space<vmem>>, vector<8x128xf32>,
    return
  }
  func.func @transform_0(%arg0: i32) -> (i32, i32) {
    %c0_i32 = arith.constant 0 : i32
    %c0_i32_0 = arith.constant 0 : i32
    return %arg0, %c0_i32 : i32, i32
  }
  func.func @transform_1(%arg0: i32) -> (i32, i32, i32) {
    %c0_i32 = arith.constant 0 : i32
    %c0_i32_0 = arith.constant 0 : i32
    %c0_i32_1 = arith.constant 0 : i32
    %c0_i32_2 = arith.constant 0 : i32
    return %c0_i32, %c0_i32_0, %c0_i32_1 : i32, i32, i32
  }
  func.func @transform_2(%arg0: i32) -> (i32, i32) {
    %c0_i32 = arith.constant 0 : i32
    %c0_i32_0 = arith.constant 0 : i32
    %c0_i32_1 = arith.constant 0 : i32
    return %c0_i32, %c0_i32_0 : i32, i32
  }
  func.func @transform_3(%arg0: i32) -> (i32, i32, i32) {
    %c0_i32 = arith.constant 0 : i32
    %c0_i32_0 = arith.constant 0 : i32
    %c0_i32_1 = arith.constant 0 : i32
    %c0_i32_2 = arith.constant 0 : i32
    return %c0_i32, %c0_i32_0, %c0_i32_1 : i32, i32, i32
  }
  func.func @transform_4(%arg0: i32) -> (i32, i32) {
    %c0_i32 = arith.constant 0 : i32
    %c0_i32_0 = arith.constant 0 : i32
    %c0_i32_1 = arith.constant 0 : i32
    return %c0_i32, %c0_i32_0 : i32, i32
  }
  func.func @transform_5(%arg0: i32) -> (i32, i32, i32) {
    %c0_i32 = arith.constant 0 : i32
    %c0_i32_0 = arith.constant 0 : i32
    %c0_i32_1 = arith.constant 0 : i32
    %c0_i32_2 = arith.constant 0 : i32
    return %c0_i32, %c0_i32_0, %c0_i32_1 : i32, i32, i32
  }
  func.func @transform_6(%arg0: i32) -> (i32, i32) {
    %c0_i32 = arith.constant 0 : i32
    %c0_i32_0 = arith.constant 0 : i32
    %c0_i32_1 = arith.constant 0 : i32
    return %c0_i32, %c0_i32_0 : i32, i32
  }
  func.func @transform_7(%arg0: i32) -> (i32, i32) {
    %c0_i32 = arith.constant 0 : i32
    %c0_i32_0 = arith.constant 0 : i32
    %c0_i32_1 = arith.constant 0 : i32
    return %c0_i32, %c0_i32_0 : i32, i32
  }
  func.func @transform_8(%arg0: i32) -> (i32, i32) {
    %c0_i32 = arith.constant 0 : i32
    %c0_i32_0 = arith.constant 0 : i32
    %c0_i32_1 = arith.constant 0 : i32
    return %c0_i32, %c0_i32_0 : i32, i32
  }
  func.func @transform_9(%arg0: i32) -> (i32, i32) {
    %c0_i32 = arith.constant 0 : i32
    %c0_i32_0 = arith.constant 0 : i32
    %c0_i32_1 = arith.constant 0 : i32
    return %c0_i32, %c0_i32_0 : i32, i32
  }
  func.func @transform_10(%arg0: i32) -> (i32, i32) {
    %c0_i32 = arith.constant 0 : i32
    %c0_i32_0 = arith.constant 0 : i32
    %c0_i32_1 = arith.constant 0 : i32
    return %c0_i32, %c0_i32_0 : i32, i32
  }
  func.func @transform_11(%arg0: i32) -> (i32, i32) {
    %c0_i32 = arith.constant 0 : i32
    %c0_i32_0 = arith.constant 0 : i32
    %c0_i32_1 = arith.constant 0 : i32
    return %c0_i32, %c0_i32_0 : i32, i32
  }
  func.func @transform_12(%arg0: i32) -> (i32, i32) {
    %c0_i32 = arith.constant 0 : i32
    %c0_i32_0 = arith.constant 0 : i32
    return %arg0, %c0_i32 : i32, i32
  }
}

</mosaic_0001>

<bundles_post_ra>
// kernel: _lambda_.1
= control target key start
LH: loop header
LB: loop body
LE: loop exit
PB: predicated region body
PF: predicated region fallthrough
CT: control target
= control target key end

     0   :  { %s12002_s0 = inlined_call_operand.vmem [shape: f32[576,32], index: 0, kind: input, shape index: {}]   ;;  %s12003_s1 = inlined_call_operand.vmem [shape: f32[6,32,90], index: 1, kind: input, shape index: {}]   ;;  %s12004_s2 = inlined_call_operand.vmem [shape: f32[1,90], index: 2, kind: input, shape index: {}]   ;;  %s12005_s3 = inlined_call_operand.vmem [shape: f32[6,90,96], index: 3, kind: input, shape index: {}]   ;;  %s12006_s4 = inlined_call_operand.vmem [shape: f32[1,96], index: 4, kind: input, shape index: {}]   ;;  %s12007_s5 = inlined_call_operand.vmem [shape: f32[6,8,69], index: 5, kind: input, shape index: {}]   ;;  %s12008_s6 = inlined_call_operand.vmem [shape: f32[576,128], index: 6, kind: input, shape index: {}]   ;;  %s12009_s7 = inlined_call_operand.vmem [shape: f32[1,128], index: 7, kind: input, shape index: {}]   ;;  %s12010_s8 = inlined_call_operand.vmem [shape: f32[128,128], index: 8, kind: input, shape index: {}]   ;;  %s12011_s9 = inlined_call_operand.vmem [shape: f32[1,128], index: 9, kind: input, shape index: {}]   ;;  %s12012_s10 = inlined_call_operand.vmem [shape: f32[128,128], index: 10, kind: input, shape index: {}]   ;;  %s12013_s11 = inlined_call_operand.vmem [shape: f32[1,128], index: 11, kind: input, shape index: {}]   ;;  %s12014_s12 = inlined_call_operand.hbm [shape: f32[16,128], index: 12, kind: output, shape index: {}]  }
   0x1   :  { %12042 = sst [smem:[#allocation95_spill]] %s12002_s0 }
   0x2   :  { %12043 = sst [smem:[#allocation96_spill]] %s12003_s1 }
   0x3   :  { %12044 = sst [smem:[#allocation97_spill]] %s12004_s2 }
   0x4   :  { %17 = vsyncpa [#allocation4], 0 }
   0x5   :  { %19 = vsyncpa [#allocation4 + $0x1], 0  ;;  %s8580_s21 = smov 0   ;;  %s8582_s22 = smov 0  }
   0x6   :  { %s8584_s23 = smov 0   ;;  %s8586_s24 = smov 0  }
   0x7 LB: > { %s8601_s25 = sadd.s32 4294967295, %s8510_s24   ;;  %s5774_s26 = sadd.s32 4294967294, %s8510_s24   ;;  %s8510_s24 = sphi %s8586_s24, %s12267_s24   ;;  %s8506_s23 = sphi %s8584_s23, %s12266_s23   ;;  %s8502_s22 = sphi %s8582_s22, %s12265_s22   ;;  %s8498_s21 = sphi %s8580_s21, %s12264_s21  }
   0x8   : > { %s8605_s27 = sadd.s32 1, %s8510_s24   ;;  %s289_s28 = sadd.s32 1, %s8506_s23 }
   0x9   : > { %s286_s29 = ssub.s32 %s8510_s24, %s8605_s27  ;;  %p299_p0 = scmp.ne.s32.totalorder %s8506_s23, %s8502_s22 }
   0xa   : > { %p287_p1 = scmp.eq.s32.totalorder %s286_s29, 0  ;;  %p300_p2 = scmp.eq.s32.totalorder %s8601_s25, 1 }
   0xb   : > { %p305_p3 = scmp.ne.s32.totalorder %s8502_s22, %s8498_s21  ;;  %p306_p4 = scmp.eq.s32.totalorder %s5774_s26, 1 }
   0xc   : > { %s8616_s30 = scalar_select %p287_p1, %s8506_s23, %s289_s28  }
   0xd   : > { %p8618_p5 = por %p300_p2, %p299_p0  ;;  %p8622_p6 = por %p306_p4, %p305_p3 }
   0xe   : > { %p5777_p7 = scmp.ge.s32.totalorder %s8510_s24, 1  ;;  %p366_p8 = scmp.lt.s32.totalorder %s8510_s24, 3 }
  0x10   : > { %p367_p9 = pnand %p5777_p7, %p366_p8 }
  0x12   : > { %370 = sbr.rel (%p367_p9) target bundleno = 1972 (0x7b4), region = 68 }
  0x17   : > { %s12047_s1 = sld [smem:[#allocation96_spill]]  ;;  %s408_s19 = smul.u32 36, %s8601_s25  ;;  %vm499_vm0 = vcmask 261120   ;;  %vm2952_vm1 = vcmask 1041408   ;;  %vm8513_vm2 = vmmov 0   ;;  %vm2832_vm3 = vcmask 736256  }
  0x18   : > { %s12048_s0 = sld [smem:[#allocation95_spill]]  ;;  %vm2850_vm4 = vcmask 733184   ;;  %vm4540_vm5 = vcmask 1044480   ;;  %vm4536_vm6 = vcmask 564224   ;;  %vm4713_vm7 = vcmask 785408   ;;  %s6296_s20 = sshll.u32 %s8601_s25, 7 }
  0x19   : > { %p409_p10 = scmp.lt.s32.totalorder %s408_s19, 71  ;;  %s12161_s2 = sld [smem:[#allocation97_spill]] }
  0x1a   : > { %s11967_s29 = scalar_lea.hbm %s12014_s12, %s6296_s20  ;;  %s8514_s17 = smov [#allocation3]  }
  0x1b   : > { %s12269_s19 = smov (!%p409_p10, %s408_s19), 71  ;;  %s8454_s25 = sshll.u32 %s8514_s17, 4  ;;  %s8455_s25 = int_to_ptr.vmem [resolvable:$false] %s8454_s25 }
  0x1c   : > { %s5779_s15 = sshll.u32 %s12269_s19, 3 }
  0x1d   : > { %v8631_v0 = vld [vmem:[%s12047_s1 + $0x38] sm:$0xff]  ;;  %v8636_v1 = vld [vmem:[%s12047_s1 + $0x30] sm:$0xff]  ;;  %v8646_v2 = vld [vmem:[%s12047_s1 + $0x28] sm:$0xff] }
  0x1e   : > { %6987 = vmatprep.subr.mxu0 %v8631_v0  ;;  %8377 = vmatprep.subr.mxu1 %v8631_v0  ;;  %v8655_v3 = vld [vmem:[%s12047_s1 + $0x20] sm:$0xff]  ;;  %s8666_s18 = scalar_lea.vmem %s12048_s0, %s5779_s15  ;;  %v8671_v4 = vld [vmem:[%s12047_s1 + $0x98] sm:$0xff]  ;;  %v8720_v14 = vld [vmem:[%s12047_s1 + $0x90] sm:$0xff]  ;;  %s405_s15 = sand.u32 1, %s8502_s22  }
  0x1f   : > { %6988 = vmatpush3.msra.mxu0 %v8631_v0  ;;  %8381 = vmatpush3.msra.mxu1 %v8631_v0  ;;  %v8676_v5 = vld [vmem:[%s12047_s1 + $0x18] sm:$0xff]  ;;  %v8681_v6 = vld [vmem:[%s8666_s18 + $0x1] ss:$2 sm:$0xff]  ;;  %v8743_v18 = vld [vmem:[%s12047_s1 + $0x10] sm:$0xff]  ;;  %s5778_s16 = sshll.u32 %s405_s15, 3 }
  0x20   : > { %6989 = vmatprep.subr.mxu0 %v8636_v1  ;;  %8378 = vmatprep.subr.mxu1 %v8636_v1  ;;  %v8684_v7 = vld [vmem:[%s8666_s18 + $0xc1] ss:$2 sm:$0xff]  ;;  %v8687_v8 = vld [vmem:[%s8666_s18 + $0x11] ss:$2 sm:$0xff]  ;;  %v8836_v32 = vld [vmem:[%s8666_s18] ss:$2 sm:$0xff] }
  0x21   : > { %6990 = vmatpush3.msra.mxu0 %v8636_v1  ;;  %8382 = vmatpush3.msra.mxu1 %v8636_v1  ;;  %v8694_v9 = vld [vmem:[%s8666_s18 + $0xd1] ss:$2 sm:$0xff]  ;;  %v8697_v10 = vld [vmem:[%s8666_s18 + $0x21] ss:$2 sm:$0xff]  ;;  %v5780_v35 = vld [vmem:[%s8666_s18 + $0x10] ss:$2 sm:$0xff] }
  0x22   : > { %6991 = vmatprep.subr.mxu0 %v8646_v2  ;;  %8379 = vmatprep.subr.mxu1 %v8646_v2  ;;  %v8700_v11 = vld [vmem:[%s8666_s18 + $0xe1] ss:$2 sm:$0xff]  ;;  %v8711_v12 = vld [vmem:[%s8666_s18 + $0x31] ss:$2 sm:$0xff]  ;;  %v5781_v36 = vld [vmem:[%s8666_s18 + $0x20] ss:$2 sm:$0xff] }
  0x23   : > { %6992 = vmatpush3.msra.mxu0 %v8646_v2  ;;  %8383 = vmatpush3.msra.mxu1 %v8646_v2  ;;  %v8714_v13 = vld [vmem:[%s8666_s18 + $0xf1] ss:$2 sm:$0xff]  ;;  %v8723_v15 = vld [vmem:[%s8666_s18 + $0x41] ss:$2 sm:$0xff]  ;;  %v5782_v39 = vld [vmem:[%s8666_s18 + $0x30] ss:$2 sm:$0xff] }
  0x24   : > { %6993 = vmatprep.subr.mxu0 %v8655_v3  ;;  %8380 = vmatprep.subr.mxu1 %v8655_v3  ;;  %v8728_v16 = vld [vmem:[%s8666_s18 + $0x101] ss:$2 sm:$0xff]  ;;  %v8749_v19 = vld [vmem:[%s8666_s18 + $0x51] ss:$2 sm:$0xff]  ;;  %v5783_v40 = vld [vmem:[%s8666_s18 + $0x40] ss:$2 sm:$0xff] }
  0x25   : > { %6994 = vmatpush3.msra.mxu0 %v8655_v3  ;;  %8384 = vmatpush3.msra.mxu1 %v8655_v3  ;;  %v8738_v17 = vld [vmem:[%s12047_s1 + $0x88] sm:$0xff]  ;;  %v8752_v20 = vld [vmem:[%s8666_s18 + $0x111] ss:$2 sm:$0x1f]  ;;  %v8764_v22 = vld [vmem:[%s12047_s1 + $0x80] sm:$0xff]  ;;  %s407_s26 = scalar_lea.vmem [#allocation3], %s5778_s16 }
  0x26   : > { %6995 = vmatprep.mubr.msk.f32.mxu0 %vm499_vm0, %v8681_v6  ;;  %7013 = vmatprep.mubr.msk.f32.mxu1 %vm499_vm0, %v8684_v7  ;;  %v8758_v21 = vld [vmem:[%s8666_s18 + $0x61] ss:$2 sm:$0xff]  ;;  %v8775_v23 = vld [vmem:[%s8666_s18 + $0x71] ss:$2 sm:$0xff]  ;;  %v5784_v43 = vld [vmem:[%s8666_s18 + $0x50] ss:$2 sm:$0xff] }
  0x27   : > { %6996 = vmatmul.mubr.msk.f32.vlgmr.msra.gmra.mxu0 %vm499_vm0, %v8687_v8  ;;  %7014 = vmatmul.mubr.msk.f32.vlgmr.msra.gmra.mxu1 %vm499_vm0, %v8694_v9  ;;  %v8781_v24 = vld [vmem:[%s8666_s18 + $0x81] ss:$2 sm:$0xff]  ;;  %v8793_v26 = vld [vmem:[%s12047_s1 + $0x78] sm:$0xff]  ;;  %v8821_v30 = vld [vmem:[%s12047_s1 + $0x70] sm:$0xff]  ;;  %s5715_s19 = sshll.u32 %s407_s26, 4  ;;  %s8456_s16 = scalar_lea.vmem %s8455_s25, 256  ;;  %s5716_s19 = int_to_ptr.vmem [resolvable:$true] %s5715_s19 }
  0x28   : > { %6998 = vmatprep.mubr.msk.f32.mxu0 %vm499_vm0, %v8697_v10  ;;  %7016 = vmatprep.mubr.msk.f32.mxu1 %vm499_vm0, %v8700_v11  ;;  %v8788_v25 = vld [vmem:[%s12047_s1 + $0x8] sm:$0xff]  ;;  %v8804_v27 = vld [vmem:[%s8666_s18 + $0x91] ss:$2 sm:$0xff]  ;;  %v8815_v29 = vld [vmem:[%s12047_s1] sm:$0xff]  ;;  %p8457_p0 = scmp.lt.s32.totalorder %s5716_s19, %s8455_s25 }
  0x29   : > { %7022 = vmatprep.subr.mxu1 %v8671_v4  ;;  %7057 = vmatprep.subr.mxu0 %v8676_v5  ;;  %v8807_v28 = vld [vmem:[%s8666_s18 + $0xa1] ss:$2 sm:$0xff]  ;;  %v8832_v31 = vld [vmem:[%s8666_s18 + $0xb1] ss:$2 sm:$0xff]  ;;  %v5785_v44 = vld [vmem:[%s8666_s18 + $0x60] ss:$2 sm:$0xff] }
  0x2a   : > { %7023 = vmatpush3.msra.mxu1 %v8671_v4  ;;  %7058 = vmatpush3.msra.mxu0 %v8676_v5  ;;  %v8844_v33 = vld [vmem:[%s12047_s1 + $0x68] sm:$0xff]  ;;  %v8849_v34 = vld [vmem:[%s12047_s1 + $0x58] sm:$0xff]  ;;  %v8867_v37 = vld [vmem:[%s12047_s1 + $0x60] sm:$0xff] }
  0x2b   : > { %6999 = vmatmul.mubr.msk.f32.gmra.mxu0 %vm499_vm0, %v8711_v12  ;;  %7017 = vmatmul.mubr.msk.f32.gmra.mxu1 %vm499_vm0, %v8714_v13  ;;  %v8875_v38 = vld [vmem:[%s12047_s1 + $0x50] sm:$0xff]  ;;  %v8889_v41 = vld [vmem:[%s12047_s1 + $0xb8] sm:$0xff]  ;;  %v8897_v42 = vld [vmem:[%s12047_s1 + $0x48] sm:$0xff] }
  0x2c   : > { %7024 = vmatprep.subr.mxu1 %v8720_v14  ;;  %7001 = vmatprep.mubr.msk.f32.mxu0 %vm499_vm0, %v8723_v15  ;;  %v8913_v45 = vld [vmem:[%s12047_s1 + $0x40] sm:$0xff]  ;;  %v5786_v46 = vld [vmem:[%s8666_s18 + $0x70] ss:$2 sm:$0xff]  ;;  %v8966_v57 = vld [vmem:[%s12047_s1 + $0xa8] sm:$0xff] }
  0x2d   : > { %7019 = vmatprep.mubr.msk.f32.mxu1 %vm499_vm0, %v8728_v16  ;;  %7025 = vmatpush3.msra.mxu1 %v8720_v14  ;;  %v5787_v47 = vld [vmem:[%s8666_s18 + $0x80] ss:$2 sm:$0xff]  ;;  %v5788_v48 = vld [vmem:[%s8666_s18 + $0x90] ss:$2 sm:$0xff] }
  0x2e   : > { %7026 = vmatprep.subr.mxu1 %v8738_v17  ;;  %7059 = vmatprep.subr.mxu0 %v8743_v18  ;;  %v5789_v49 = vld [vmem:[%s8666_s18 + $0xa0] ss:$2 sm:$0xff]  ;;  %v5790_v50 = vld [vmem:[%s8666_s18 + $0xb0] ss:$2 sm:$0xff] }
  0x2f   : > { %7002 = vmatmul.mubr.msk.f32.gmra.mxu0 %vm499_vm0, %v8749_v19  ;;  %7020 = vmatmul.mubr.msk.f32.gmra.mxu1 %vm499_vm0, %v8752_v20  ;;  %v5791_v51 = vld [vmem:[%s8666_s18 + $0xc0] ss:$2 sm:$0xff]  ;;  %v5792_v52 = vld [vmem:[%s8666_s18 + $0xd0] ss:$2 sm:$0xff] }
  0x30   : > { %7027 = vmatpush3.msra.mxu1 %v8738_v17  ;;  %7004 = vmatprep.mubr.msk.f32.mxu0 %vm499_vm0, %v8758_v21  ;;  %v5793_v53 = vld [vmem:[%s8666_s18 + $0xe0] ss:$2 sm:$0xff]  ;;  %v8953_v54 = vld [vmem:[%s12047_s1 + $0xb0] sm:$0xff] }
  0x31   : > { %7028 = vmatprep.subr.mxu1 %v8764_v22  ;;  %7030 = vmatprep.mubr.msk.f32.mxu1 %vm499_vm0, %v8681_v6  ;;  %v5794_v55 = vld [vmem:[%s8666_s18 + $0xf0] ss:$2 sm:$0xff]  ;;  %v5795_v56 = vld [vmem:[%s8666_s18 + $0x100] ss:$2 sm:$0xff] }
  0x32   : > { %7029 = vmatpush3.msra.mxu1 %v8764_v22  ;;  %7060 = vmatpush3.msra.mxu0 %v8743_v18  ;;  %v5796_v58 = vld [vmem:[%s8666_s18 + $0x110] ss:$2 sm:$0x1f]  ;;  %v8981_v60 = vld [vmem:[%s12047_s1 + $0xa0] sm:$0xff]  ;;  %s5702_s1 = scalar_lea.sflag [#allocation4], %s405_s15 }
  0x33   : > { %7005 = vmatmul.mubr.msk.f32.gmra.mxu0 %vm499_vm0, %v8775_v23  ;;  %7031 = vmatmul.mubr.msk.f32.vlgmr.msra.gmra.mxu1 %vm499_vm0, %v8687_v8  ;;  %v8972_v59 = vld [vmem:[%s8666_s18 + $0x2] ss:$2 sm:$0xff]  ;;  %v8987_v61 = vld [vmem:[%s8666_s18 + $0x12] ss:$2 sm:$0xff] }
  0x34   : > { %7007 = vmatprep.mubr.msk.f32.mxu0 %vm499_vm0, %v8781_v24  ;;  %7033 = vmatprep.mubr.msk.f32.mxu1 %vm499_vm0, %v8697_v10  ;;  %v8990_v62 = vld [vmem:[%s8666_s18 + $0x22] ss:$2 sm:$0xff]  ;;  %v9001_v63 = vld [vmem:[%s8666_s18 + $0x32] ss:$2 sm:$0xff] }
  0x35   : > { %7061 = vmatprep.subr.mxu0 %v8788_v25  ;;  %7092 = vmatprep.subr.mxu1 %v8793_v26 }
  0x36   : > { %7062 = vmatpush3.msra.mxu0 %v8788_v25  ;;  %7093 = vmatpush3.msra.mxu1 %v8793_v26 }
  0x37   : > { %7008 = vmatmul.mubr.msk.f32.gmra.mxu0 %vm499_vm0, %v8804_v27  ;;  %7034 = vmatmul.mubr.msk.f32.gmra.mxu1 %vm499_vm0, %v8711_v12 }
  0x38   : > { %7010 = vmatprep.mubr.msk.f32.mxu0 %vm499_vm0, %v8807_v28  ;;  %7036 = vmatprep.mubr.msk.f32.mxu1 %vm499_vm0, %v8723_v15 }
  0x39   : > { %7063 = vmatprep.subr.mxu0 %v8815_v29  ;;  %7094 = vmatprep.subr.mxu1 %v8821_v30 }
  0x3a   : > { %7064 = vmatpush3.msra.mxu0 %v8815_v29  ;;  %7095 = vmatpush3.msra.mxu1 %v8821_v30 }
  0x3b   : > { %7011 = vmatmul.mubr.msk.f32.gmra.mxu0 %vm499_vm0, %v8832_v31  ;;  %7037 = vmatmul.mubr.msk.f32.gmra.mxu1 %vm499_vm0, %v8749_v19 }
  0x3c   : > { %7039 = vmatprep.mubr.msk.f32.mxu1 %vm499_vm0, %v8758_v21  ;;  %7065 = vmatprep.mubr.msk.f32.mxu0 %vm499_vm0, %v8836_v32 }
  0x3d   : > { %7096 = vmatprep.subr.mxu1 %v8844_v33  ;;  %7127 = vmatprep.subr.mxu0 %v8849_v34 }
  0x3e   : > { %7097 = vmatpush3.msra.mxu1 %v8844_v33 }
  0x3f   : > { %7040 = vmatmul.mubr.msk.f32.gmra.mxu1 %vm499_vm0, %v8775_v23  ;;  %7066 = vmatmul.mubr.msk.f32.vlgmr.msra.gmra.mxu0 %vm499_vm0, %v5780_v35 }
  0x40   : > { %7042 = vmatprep.mubr.msk.f32.mxu1 %vm499_vm0, %v8781_v24  ;;  %7068 = vmatprep.mubr.msk.f32.mxu0 %vm499_vm0, %v5781_v36 }
  0x41   : > { %7098 = vmatprep.subr.mxu1 %v8867_v37  ;;  %7128 = vmatpush3.msra.mxu0 %v8849_v34 }
  0x42   : > { %7099 = vmatpush3.msra.mxu1 %v8867_v37  ;;  %7129 = vmatprep.subr.mxu0 %v8875_v38 }
  0x43   : > { %7043 = vmatmul.mubr.msk.f32.gmra.mxu1 %vm499_vm0, %v8804_v27  ;;  %7069 = vmatmul.mubr.msk.f32.gmra.mxu0 %vm499_vm0, %v5782_v39 }
  0x44   : > { %7045 = vmatprep.mubr.msk.f32.mxu1 %vm499_vm0, %v8807_v28  ;;  %7071 = vmatprep.mubr.msk.f32.mxu0 %vm499_vm0, %v5783_v40 }
  0x45   : > { %7130 = vmatpush3.msra.mxu0 %v8875_v38  ;;  %7162 = vmatprep.subr.mxu1 %v8889_v41 }
  0x46   : > { %7131 = vmatprep.subr.mxu0 %v8897_v42 }
  0x47   : > { %7046 = vmatmul.mubr.msk.f32.gmra.mxu1 %vm499_vm0, %v8832_v31  ;;  %7072 = vmatmul.mubr.msk.f32.gmra.mxu0 %vm499_vm0, %v5784_v43 }
  0x48   : > { %7048 = vmatprep.mubr.msk.f32.mxu1 %vm499_vm0, %v8684_v7  ;;  %7074 = vmatprep.mubr.msk.f32.mxu0 %vm499_vm0, %v5785_v44 }
  0x49   : > { %7132 = vmatpush3.msra.mxu0 %v8897_v42 }
  0x4a   : > { %7133 = vmatprep.subr.mxu0 %v8913_v45 }
  0x4b   : > { %7049 = vmatmul.mubr.msk.f32.gmra.mxu1 %vm499_vm0, %v8694_v9  ;;  %7075 = vmatmul.mubr.msk.f32.gmra.mxu0 %vm499_vm0, %v5786_v46 }
  0x4c   : > { %7051 = vmatprep.mubr.msk.f32.mxu1 %vm499_vm0, %v8700_v11  ;;  %7077 = vmatprep.mubr.msk.f32.mxu0 %vm499_vm0, %v5787_v47 }
  0x4d   : > { %7134 = vmatpush3.msra.mxu0 %v8913_v45 }
  0x4e   : > { %7197 = vmatprep.subr.mxu0 %v8631_v0 }
  0x4f   : > { %7052 = vmatmul.mubr.msk.f32.gmra.mxu1 %vm499_vm0, %v8714_v13  ;;  %7078 = vmatmul.mubr.msk.f32.gmra.mxu0 %vm499_vm0, %v5788_v48 }
  0x50   : > { %7054 = vmatprep.mubr.msk.f32.mxu1 %vm499_vm0, %v8728_v16  ;;  %7080 = vmatprep.mubr.msk.f32.mxu0 %vm499_vm0, %v5789_v49 }
  0x53   : > { %7055 = vmatmul.mubr.msk.f32.gmra.mxu1 %vm499_vm0, %v8752_v20  ;;  %7081 = vmatmul.mubr.msk.f32.gmra.mxu0 %vm499_vm0, %v5790_v50 }
  0x54   : > { %7083 = vmatprep.mubr.msk.f32.mxu0 %vm499_vm0, %v5791_v51  ;;  %7100 = vmatprep.mubr.msk.f32.mxu1 %vm499_vm0, %v8836_v32  ;;  %v9004_v32 = vld [vmem:[%s8666_s18 + $0x42] ss:$2 sm:$0xff] }
  0x57   : > { %7084 = vmatmul.mubr.msk.f32.gmra.mxu0 %vm499_vm0, %v5792_v52  ;;  %7101 = vmatmul.mubr.msk.f32.vlgmr.msra.gmra.mxu1 %vm499_vm0, %v5780_v35  ;;  %v9017_v35 = vld [vmem:[%s8666_s18 + $0x52] ss:$2 sm:$0xff] }
  0x58   : > { %7086 = vmatprep.mubr.msk.f32.mxu0 %vm499_vm0, %v5793_v53  ;;  %7103 = vmatprep.mubr.msk.f32.mxu1 %vm499_vm0, %v5781_v36  ;;  %v9020_v36 = vld [vmem:[%s8666_s18 + $0x62] ss:$2 sm:$0xff] }
  0x59   : > { %7163 = vmatpush3.msra.mxu1 %v8889_v41 }
  0x5a   : > { %7164 = vmatprep.subr.mxu1 %v8953_v54 }
  0x5b   : > { %7087 = vmatmul.mubr.msk.f32.gmra.mxu0 %vm499_vm0, %v5794_v55  ;;  %7104 = vmatmul.mubr.msk.f32.gmra.mxu1 %vm499_vm0, %v5782_v39  ;;  %v9034_v39 = vld [vmem:[%s8666_s18 + $0x82] ss:$2 sm:$0xff] }
  0x5c   : > { %7089 = vmatprep.mubr.msk.f32.mxu0 %vm499_vm0, %v5795_v56  ;;  %7106 = vmatprep.mubr.msk.f32.mxu1 %vm499_vm0, %v5783_v40  ;;  %v9048_v40 = vld [vmem:[%s8666_s18 + $0xa2] ss:$2 sm:$0xff] }
  0x5d   : > { %7165 = vmatpush3.msra.mxu1 %v8953_v54 }
  0x5e   : > { %7166 = vmatprep.subr.mxu1 %v8966_v57 }
  0x5f   : > { %7090 = vmatmul.mubr.msk.f32.gmra.mxu0 %vm499_vm0, %v5796_v58  ;;  %7107 = vmatmul.mubr.msk.f32.gmra.mxu1 %vm499_vm0, %v5784_v43  ;;  %v9062_v43 = vld [vmem:[%s8666_s18 + $0xc2] ss:$2 sm:$0xff] }
  0x60   : > { %7109 = vmatprep.mubr.msk.f32.mxu1 %vm499_vm0, %v5785_v44  ;;  %7135 = vmatprep.mubr.msk.f32.mxu0 %vm499_vm0, %v8972_v59  ;;  %v9075_v44 = vld [vmem:[%s8666_s18 + $0xe2] ss:$2 sm:$0xff] }
  0x61   : > { %7167 = vmatpush3.msra.mxu1 %v8966_v57 }
  0x62   : > { %7168 = vmatprep.subr.mxu1 %v8981_v60 }
  0x63   : > { %7110 = vmatmul.mubr.msk.f32.gmra.mxu1 %vm499_vm0, %v5786_v46  ;;  %7136 = vmatmul.mubr.msk.f32.vlgmr.msra.gmra.mxu0 %vm499_vm0, %v8987_v61  ;;  %v9086_v46 = vld [vmem:[%s8666_s18 + $0xf2] ss:$2 sm:$0xff] }
  0x64   : > { %7112 = vmatprep.mubr.msk.f32.mxu1 %vm499_vm0, %v5787_v47  ;;  %7138 = vmatprep.mubr.msk.f32.mxu0 %vm499_vm0, %v8990_v62  ;;  %v9089_v47 = vld [vmem:[%s8666_s18 + $0x102] ss:$2 sm:$0xff] }
  0x65   : > { %7169 = vmatpush3.msra.mxu1 %v8981_v60  ;;  %7198 = vmatpush3.msra.mxu0 %v8631_v0  ;;  %v9031_v0 = vld [vmem:[%s8666_s18 + $0x72] ss:$2 sm:$0xff] }
  0x66   : > { %7199 = vmatprep.subr.mxu0 %v8636_v1  ;;  %7232 = vmatprep.subr.mxu1 %v8671_v4 }
  0x67   : > { %7113 = vmatmul.mubr.msk.f32.gmra.mxu1 %vm499_vm0, %v5788_v48  ;;  %7139 = vmatmul.mubr.msk.f32.gmra.mxu0 %vm499_vm0, %v9001_v63  ;;  %v9102_v48 = vld [vmem:[%s8666_s18 + $0x112] ss:$2 sm:$0x1f] }
  0x68   : > { %7115 = vmatprep.mubr.msk.f32.mxu1 %vm499_vm0, %v5789_v49  ;;  %7141 = vmatprep.mubr.msk.f32.mxu0 %vm499_vm0, %v9004_v32 }
  0x69   : > { %7200 = vmatpush3.msra.mxu0 %v8636_v1  ;;  %v9045_v1 = vld [vmem:[%s8666_s18 + $0x92] ss:$2 sm:$0xff] }
  0x6a   : > { %7201 = vmatprep.subr.mxu0 %v8646_v2 }
  0x6b   : > { %7116 = vmatmul.mubr.msk.f32.gmra.mxu1 %vm499_vm0, %v5790_v50  ;;  %7142 = vmatmul.mubr.msk.f32.gmra.mxu0 %vm499_vm0, %v9017_v35 }
  0x6c   : > { %7118 = vmatprep.mubr.msk.f32.mxu1 %vm499_vm0, %v5791_v51  ;;  %7144 = vmatprep.mubr.msk.f32.mxu0 %vm499_vm0, %v9020_v36 }
  0x6d   : > { %7202 = vmatpush3.msra.mxu0 %v8646_v2  ;;  %v9059_v2 = vld [vmem:[%s8666_s18 + $0xb2] ss:$2 sm:$0xff] }
  0x6e   : > { %7203 = vmatprep.subr.mxu0 %v8655_v3 }
  0x6f   : > { %7119 = vmatmul.mubr.msk.f32.gmra.mxu1 %vm499_vm0, %v5792_v52  ;;  %7145 = vmatmul.mubr.msk.f32.gmra.mxu0 %vm499_vm0, %v9031_v0 }
  0x70   : > { %7121 = vmatprep.mubr.msk.f32.mxu1 %vm499_vm0, %v5793_v53  ;;  %7147 = vmatprep.mubr.msk.f32.mxu0 %vm499_vm0, %v9034_v39 }
  0x71   : > { %7204 = vmatpush3.msra.mxu0 %v8655_v3  ;;  %v9072_v3 = vld [vmem:[%s8666_s18 + $0xd2] ss:$2 sm:$0xff] }
  0x72   : > { %7267 = vmatprep.subr.mxu0 %v8676_v5 }
  0x73   : > { %7122 = vmatmul.mubr.msk.f32.gmra.mxu1 %vm499_vm0, %v5794_v55  ;;  %7148 = vmatmul.mubr.msk.f32.gmra.mxu0 %vm499_vm0, %v9045_v1 }
  0x74   : > { %7124 = vmatprep.mubr.msk.f32.mxu1 %vm499_vm0, %v5795_v56  ;;  %7150 = vmatprep.mubr.msk.f32.mxu0 %vm499_vm0, %v9048_v40 }
  0x77   : > { %7125 = vmatmul.mubr.msk.f32.gmra.mxu1 %vm499_vm0, %v5796_v58  ;;  %7151 = vmatmul.mubr.msk.f32.gmra.mxu0 %vm499_vm0, %v9059_v2 }
  0x78   : > { %7153 = vmatprep.mubr.msk.f32.mxu0 %vm499_vm0, %v9062_v43  ;;  %7170 = vmatprep.mubr.msk.f32.mxu1 %vm499_vm0, %v8972_v59 }
  0x7b   : > { %7154 = vmatmul.mubr.msk.f32.gmra.mxu0 %vm499_vm0, %v9072_v3  ;;  %7171 = vmatmul.mubr.msk.f32.vlgmr.msra.gmra.mxu1 %vm499_vm0, %v8987_v61 }
  0x7c   : > { %7156 = vmatprep.mubr.msk.f32.mxu0 %vm499_vm0, %v9075_v44  ;;  %7173 = vmatprep.mubr.msk.f32.mxu1 %vm499_vm0, %v8990_v62 }
  0x7d   : > { %7233 = vmatpush3.msra.mxu1 %v8671_v4  ;;  %v6033_v4 = vld [vmem:[%s8666_s18 + $0x3] ss:$2 sm:$0xff] }
  0x7e   : > { %7234 = vmatprep.subr.mxu1 %v8720_v14 }
  0x7f   : > { %7157 = vmatmul.mubr.msk.f32.gmra.mxu0 %vm499_vm0, %v9086_v46  ;;  %7174 = vmatmul.mubr.msk.f32.gmra.mxu1 %vm499_vm0, %v9001_v63 }
  0x80   : > { %7159 = vmatprep.mubr.msk.f32.mxu0 %vm499_vm0, %v9089_v47  ;;  %7176 = vmatprep.mubr.msk.f32.mxu1 %vm499_vm0, %v9004_v32 }
  0x81   : > { %7235 = vmatpush3.msra.mxu1 %v8720_v14  ;;  %v6039_v14 = vld [vmem:[%s8666_s18 + $0x63] ss:$2 sm:$0xff] }
  0x82   : > { %7236 = vmatprep.subr.mxu1 %v8738_v17 }
  0x83   : > { %7160 = vmatmul.mubr.msk.f32.gmra.mxu0 %vm499_vm0, %v9102_v48  ;;  %7177 = vmatmul.mubr.msk.f32.gmra.mxu1 %vm499_vm0, %v9017_v35 }
  0x84   : > { %7179 = vmatprep.mubr.msk.f32.mxu1 %vm499_vm0, %v9020_v36  ;;  %7205 = vmatprep.mubr.msk.f32.mxu0 %vm499_vm0, %v8972_v59 }
  0x85   : > { %7237 = vmatpush3.msra.mxu1 %v8738_v17  ;;  %v6041_v17 = vld [vmem:[%s8666_s18 + $0x83] ss:$2 sm:$0xff] }
  0x86   : > { %7238 = vmatprep.subr.mxu1 %v8764_v22 }
  0x87   : > { %7180 = vmatmul.mubr.msk.f32.gmra.mxu1 %vm499_vm0, %v9031_v0  ;;  %7206 = vmatmul.mubr.msk.f32.vlgmr.msra.gmra.mxu0 %vm499_vm0, %v8987_v61 }
  0x88   : > { %7182 = vmatprep.mubr.msk.f32.mxu1 %vm499_vm0, %v9034_v39  ;;  %7208 = vmatprep.mubr.msk.f32.mxu0 %vm499_vm0, %v8990_v62 }
  0x89   : > { %7239 = vmatpush3.msra.mxu1 %v8764_v22  ;;  %7268 = vmatpush3.msra.mxu0 %v8676_v5  ;;  %v6034_v5 = vld [vmem:[%s8666_s18 + $0x13] ss:$2 sm:$0xff] }
  0x8a   : > { %7269 = vmatprep.subr.mxu0 %v8743_v18  ;;  %7302 = vmatprep.subr.mxu1 %v8793_v26 }
  0x8b   : > { %7183 = vmatmul.mubr.msk.f32.gmra.mxu1 %vm499_vm0, %v9045_v1  ;;  %7209 = vmatmul.mubr.msk.f32.gmra.mxu0 %vm499_vm0, %v9001_v63 }
  0x8c   : > { %7185 = vmatprep.mubr.msk.f32.mxu1 %vm499_vm0, %v9048_v40  ;;  %7211 = vmatprep.mubr.msk.f32.mxu0 %vm499_vm0, %v9004_v32 }
  0x8d   : > { %7270 = vmatpush3.msra.mxu0 %v8743_v18  ;;  %v6042_v18 = vld [vmem:[%s8666_s18 + $0x93] ss:$2 sm:$0xff] }
  0x8e   : > { %7271 = vmatprep.subr.mxu0 %v8788_v25 }
  0x8f   : > { %7186 = vmatmul.mubr.msk.f32.gmra.mxu1 %vm499_vm0, %v9059_v2  ;;  %7212 = vmatmul.mubr.msk.f32.gmra.mxu0 %vm499_vm0, %v9017_v35 }
  0x90   : > { %7188 = vmatprep.mubr.msk.f32.mxu1 %vm499_vm0, %v9062_v43  ;;  %7214 = vmatprep.mubr.msk.f32.mxu0 %vm499_vm0, %v9020_v36 }
  0x91   : > { %7272 = vmatpush3.msra.mxu0 %v8788_v25 }
  0x92   : > { %7273 = vmatprep.subr.mxu0 %v8815_v29 }
  0x93   : > { %7189 = vmatmul.mubr.msk.f32.gmra.mxu1 %vm499_vm0, %v9072_v3  ;;  %7215 = vmatmul.mubr.msk.f32.gmra.mxu0 %vm499_vm0, %v9031_v0 }
  0x94   : > { %7191 = vmatprep.mubr.msk.f32.mxu1 %vm499_vm0, %v9075_v44  ;;  %7217 = vmatprep.mubr.msk.f32.mxu0 %vm499_vm0, %v9034_v39 }
  0x95   : > { %7274 = vmatpush3.msra.mxu0 %v8815_v29 }
  0x96   : > { %7337 = vmatprep.subr.mxu0 %v8849_v34 }
  0x97   : > { %7192 = vmatmul.mubr.msk.f32.gmra.mxu1 %vm499_vm0, %v9086_v46  ;;  %7218 = vmatmul.mubr.msk.f32.gmra.mxu0 %vm499_vm0, %v9045_v1 }
  0x98   : > { %7194 = vmatprep.mubr.msk.f32.mxu1 %vm499_vm0, %v9089_v47  ;;  %7220 = vmatprep.mubr.msk.f32.mxu0 %vm499_vm0, %v9048_v40 }
  0x9b   : > { %7195 = vmatmul.mubr.msk.f32.gmra.mxu1 %vm499_vm0, %v9102_v48  ;;  %7221 = vmatmul.mubr.msk.f32.gmra.mxu0 %vm499_vm0, %v9059_v2 }
  0x9c   : > { %7223 = vmatprep.mubr.msk.f32.mxu0 %vm499_vm0, %v9062_v43  ;;  %7240 = vmatprep.mubr.msk.f32.mxu1 %vm499_vm0, %v8972_v59 }
  0x9f   : > { %7224 = vmatmul.mubr.msk.f32.gmra.mxu0 %vm499_vm0, %v9072_v3  ;;  %7241 = vmatmul.mubr.msk.f32.vlgmr.msra.gmra.mxu1 %vm499_vm0, %v8987_v61 }
  0xa0   : > { %7226 = vmatprep.mubr.msk.f32.mxu0 %vm499_vm0, %v9075_v44  ;;  %7243 = vmatprep.mubr.msk.f32.mxu1 %vm499_vm0, %v8990_v62 }
  0xa1   : > { %7303 = vmatpush3.msra.mxu1 %v8793_v26 }
  0xa2   : > { %7304 = vmatprep.subr.mxu1 %v8821_v30 }
  0xa3   : > { %7227 = vmatmul.mubr.msk.f32.gmra.mxu0 %vm499_vm0, %v9086_v46  ;;  %7244 = vmatmul.mubr.msk.f32.gmra.mxu1 %vm499_vm0, %v9001_v63 }
  0xa4   : > { %7229 = vmatprep.mubr.msk.f32.mxu0 %vm499_vm0, %v9089_v47  ;;  %7246 = vmatprep.mubr.msk.f32.mxu1 %vm499_vm0, %v9004_v32 }
  0xa5   : > { %7305 = vmatpush3.msra.mxu1 %v8821_v30 }
  0xa6   : > { %7306 = vmatprep.subr.mxu1 %v8844_v33 }
  0xa7   : > { %7230 = vmatmul.mubr.msk.f32.gmra.mxu0 %vm499_vm0, %v9102_v48  ;;  %7247 = vmatmul.mubr.msk.f32.gmra.mxu1 %vm499_vm0, %v9017_v35 }
  0xa8   : > { %7249 = vmatprep.mubr.msk.f32.mxu1 %vm499_vm0, %v9020_v36  ;;  %7275 = vmatprep.mubr.msk.f32.mxu0 %vm499_vm0, %v8681_v6 }
  0xa9   : > { %7307 = vmatpush3.msra.mxu1 %v8844_v33 }
  0xaa   : > { %7308 = vmatprep.subr.mxu1 %v8867_v37 }
  0xab   : > { %7250 = vmatmul.mubr.msk.f32.gmra.mxu1 %vm499_vm0, %v9031_v0  ;;  %7276 = vmatmul.mubr.msk.f32.vlgmr.msra.gmra.mxu0 %vm499_vm0, %v8687_v8 }
  0xac   : > { %7252 = vmatprep.mubr.msk.f32.mxu1 %vm499_vm0, %v9034_v39  ;;  %7278 = vmatprep.mubr.msk.f32.mxu0 %vm499_vm0, %v8697_v10 }
  0xad   : > { %7309 = vmatpush3.msra.mxu1 %v8867_v37  ;;  %7338 = vmatpush3.msra.mxu0 %v8849_v34 }
  0xae   : > { %7339 = vmatprep.subr.mxu0 %v8875_v38  ;;  %7372 = vmatprep.subr.mxu1 %v8889_v41 }
  0xaf   : > { %7253 = vmatmul.mubr.msk.f32.gmra.mxu1 %vm499_vm0, %v9045_v1  ;;  %7279 = vmatmul.mubr.msk.f32.gmra.mxu0 %vm499_vm0, %v8711_v12 }
  0xb0   : > { %7255 = vmatprep.mubr.msk.f32.mxu1 %vm499_vm0, %v9048_v40  ;;  %7281 = vmatprep.mubr.msk.f32.mxu0 %vm499_vm0, %v8723_v15 }
  0xb1   : > { %7340 = vmatpush3.msra.mxu0 %v8875_v38 }
  0xb2   : > { %7341 = vmatprep.subr.mxu0 %v8897_v42 }
  0xb3   : > { %7256 = vmatmul.mubr.msk.f32.gmra.mxu1 %vm499_vm0, %v9059_v2  ;;  %7282 = vmatmul.mubr.msk.f32.gmra.mxu0 %vm499_vm0, %v8749_v19 }
  0xb4   : > { %7258 = vmatprep.mubr.msk.f32.mxu1 %vm499_vm0, %v9062_v43  ;;  %7284 = vmatprep.mubr.msk.f32.mxu0 %vm499_vm0, %v8758_v21 }
  0xb5   : > { %7342 = vmatpush3.msra.mxu0 %v8897_v42 }
  0xb6   : > { %7343 = vmatprep.subr.mxu0 %v8913_v45 }
  0xb7   : > { %7259 = vmatmul.mubr.msk.f32.gmra.mxu1 %vm499_vm0, %v9072_v3  ;;  %7285 = vmatmul.mubr.msk.f32.gmra.mxu0 %vm499_vm0, %v8775_v23 }
  0xb8   : > { %7261 = vmatprep.mubr.msk.f32.mxu1 %vm499_vm0, %v9075_v44  ;;  %7287 = vmatprep.mubr.msk.f32.mxu0 %vm499_vm0, %v8781_v24 }
  0xb9   : > { %7344 = vmatpush3.msra.mxu0 %v8913_v45 }
  0xbb   : > { %7262 = vmatmul.mubr.msk.f32.gmra.mxu1 %vm499_vm0, %v9086_v46  ;;  %7288 = vmatmul.mubr.msk.f32.gmra.mxu0 %vm499_vm0, %v8804_v27 }
  0xbc   : > { %7264 = vmatprep.mubr.msk.f32.mxu1 %vm499_vm0, %v9089_v47  ;;  %7290 = vmatprep.mubr.msk.f32.mxu0 %vm499_vm0, %v8807_v28 }
  0xbf   : > { %7265 = vmatmul.mubr.msk.f32.gmra.mxu1 %vm499_vm0, %v9102_v48  ;;  %7291 = vmatmul.mubr.msk.f32.gmra.mxu0 %vm499_vm0, %v8832_v31 }
  0xc0   : > { %7293 = vmatprep.mubr.msk.f32.mxu0 %vm499_vm0, %v8684_v7  ;;  %7310 = vmatprep.mubr.msk.f32.mxu1 %vm499_vm0, %v8681_v6  ;;  %v6035_v6 = vld [vmem:[%s8666_s18 + $0x23] ss:$2 sm:$0xff] }
  0xc3   : > { %7294 = vmatmul.mubr.msk.f32.gmra.mxu0 %vm499_vm0, %v8694_v9  ;;  %7311 = vmatmul.mubr.msk.f32.vlgmr.msra.gmra.mxu1 %vm499_vm0, %v8687_v8  ;;  %v6036_v8 = vld [vmem:[%s8666_s18 + $0x33] ss:$2 sm:$0xff] }
  0xc4   : > { %7296 = vmatprep.mubr.msk.f32.mxu0 %vm499_vm0, %v8700_v11  ;;  %7313 = vmatprep.mubr.msk.f32.mxu1 %vm499_vm0, %v8697_v10  ;;  %v6037_v10 = vld [vmem:[%s8666_s18 + $0x43] ss:$2 sm:$0xff] }
  0xc5   : > { %7373 = vmatpush3.msra.mxu1 %v8889_v41 }
  0xc6   : > { %7374 = vmatprep.subr.mxu1 %v8953_v54 }
  0xc7   : > { %7297 = vmatmul.mubr.msk.f32.gmra.mxu0 %vm499_vm0, %v8714_v13  ;;  %7314 = vmatmul.mubr.msk.f32.gmra.mxu1 %vm499_vm0, %v8711_v12  ;;  %v6038_v12 = vld [vmem:[%s8666_s18 + $0x53] ss:$2 sm:$0xff] }
  0xc8   : > { %7299 = vmatprep.mubr.msk.f32.mxu0 %vm499_vm0, %v8728_v16  ;;  %7316 = vmatprep.mubr.msk.f32.mxu1 %vm499_vm0, %v8723_v15  ;;  %v6040_v15 = vld [vmem:[%s8666_s18 + $0x73] ss:$2 sm:$0xff] }
  0xc9   : > { %7375 = vmatpush3.msra.mxu1 %v8953_v54 }
  0xca   : > { %7376 = vmatprep.subr.mxu1 %v8966_v57 }
  0xcb   : > { %7300 = vmatmul.mubr.msk.f32.gmra.mxu0 %vm499_vm0, %v8752_v20  ;;  %7317 = vmatmul.mubr.msk.f32.gmra.mxu1 %vm499_vm0, %v8749_v19  ;;  %v6043_v19 = vld [vmem:[%s8666_s18 + $0xa3] ss:$2 sm:$0xff] }
  0xcc   : > { %7319 = vmatprep.mubr.msk.f32.mxu1 %vm499_vm0, %v8758_v21  ;;  %7345 = vmatprep.mubr.msk.f32.mxu0 %vm499_vm0, %v6033_v4 }
  0xcd   : > { %7377 = vmatpush3.msra.mxu1 %v8966_v57 }
  0xce   : > { %7378 = vmatprep.subr.mxu1 %v8981_v60 }
  0xcf   : > { %7320 = vmatmul.mubr.msk.f32.gmra.mxu1 %vm499_vm0, %v8775_v23  ;;  %7346 = vmatmul.mubr.msk.f32.vlgmr.msra.gmra.mxu0 %vm499_vm0, %v6034_v5 }
  0xd0   : > { %7322 = vmatprep.mubr.msk.f32.mxu1 %vm499_vm0, %v8781_v24  ;;  %7348 = vmatprep.mubr.msk.f32.mxu0 %vm499_vm0, %v6035_v6  ;;  %v6049_v24 = vld [vmem:[%s8666_s18 + $0x103] ss:$2 sm:$0xff] }
  0xd1   : > { %7379 = vmatpush3.msra.mxu1 %v8981_v60 }
  0xd3   : > { %7323 = vmatmul.mubr.msk.f32.gmra.mxu1 %vm499_vm0, %v8804_v27  ;;  %7349 = vmatmul.mubr.msk.f32.gmra.mxu0 %vm499_vm0, %v6036_v8  ;;  %v6050_v27 = vld [vmem:[%s8666_s18 + $0x113] ss:$2 sm:$0x1f] }
  0xd4   : > { %7325 = vmatprep.mubr.msk.f32.mxu1 %vm499_vm0, %v8807_v28  ;;  %7351 = vmatprep.mubr.msk.f32.mxu0 %vm499_vm0, %v6037_v10 }
  0xd7   : > { %7326 = vmatmul.mubr.msk.f32.gmra.mxu1 %vm499_vm0, %v8832_v31  ;;  %7352 = vmatmul.mubr.msk.f32.gmra.mxu0 %vm499_vm0, %v6038_v12 }
  0xd8   : > { %7328 = vmatprep.mubr.msk.f32.mxu1 %vm499_vm0, %v8684_v7  ;;  %7354 = vmatprep.mubr.msk.f32.mxu0 %vm499_vm0, %v6039_v14  ;;  %v6044_v7 = vld [vmem:[%s8666_s18 + $0xb3] ss:$2 sm:$0xff] }
  0xdb   : > { %7329 = vmatmul.mubr.msk.f32.gmra.mxu1 %vm499_vm0, %v8694_v9  ;;  %7355 = vmatmul.mubr.msk.f32.gmra.mxu0 %vm499_vm0, %v6040_v15  ;;  %v6045_v9 = vld [vmem:[%s8666_s18 + $0xc3] ss:$2 sm:$0xff] }
  0xdc   : > { %7331 = vmatprep.mubr.msk.f32.mxu1 %vm499_vm0, %v8700_v11  ;;  %7357 = vmatprep.mubr.msk.f32.mxu0 %vm499_vm0, %v6041_v17  ;;  %v6046_v11 = vld [vmem:[%s8666_s18 + $0xd3] ss:$2 sm:$0xff] }
  0xdf   : > { %7332 = vmatmul.mubr.msk.f32.gmra.mxu1 %vm499_vm0, %v8714_v13  ;;  %7358 = vmatmul.mubr.msk.f32.gmra.mxu0 %vm499_vm0, %v6042_v18  ;;  %v6047_v13 = vld [vmem:[%s8666_s18 + $0xe3] ss:$2 sm:$0xff] }
  0xe0   : > { %7334 = vmatprep.mubr.msk.f32.mxu1 %vm499_vm0, %v8728_v16  ;;  %7360 = vmatprep.mubr.msk.f32.mxu0 %vm499_vm0, %v6043_v19 }
  0xe3   : > { %7335 = vmatmul.mubr.msk.f32.gmra.mxu1 %vm499_vm0, %v8752_v20  ;;  %7361 = vmatmul.mubr.msk.f32.gmra.mxu0 %vm499_vm0, %v6044_v7  ;;  %v6048_v20 = vld [vmem:[%s8666_s18 + $0xf3] ss:$2 sm:$0xff] }
  0xe4   : > { %7363 = vmatprep.mubr.msk.f32.mxu0 %vm499_vm0, %v6045_v9  ;;  %7380 = vmatprep.mubr.msk.f32.mxu1 %vm499_vm0, %v6033_v4 }
  0xe7   : > { %v6997_v21 = vpop.f32.mrf.mxu0  ;;  %v9341_v16 = vpop.f32.mrf.mxu1  ;;  %7364 = vmatmul.mubr.msk.f32.gmra.mxu0 %vm499_vm0, %v6046_v11  ;;  %7381 = vmatmul.mubr.msk.f32.vlgmr.msra.gmra.mxu1 %vm499_vm0, %v6034_v5 }
  0xe8   : > { %7366 = vmatprep.mubr.msk.f32.mxu0 %vm499_vm0, %v6047_v13  ;;  %7383 = vmatprep.mubr.msk.f32.mxu1 %vm499_vm0, %v6035_v6 }
  0xe9   : > { %v9348_v22 = vpop.f32.mrf.mxu0  ;;  %v9350_v23 = vpop.f32.mrf.mxu1 }
  0xeb   : > { %v7000_v25 = vpop.f32.mrf.mxu0  ;;  %v9353_v26 = vpop.f32.mrf.mxu1  ;;  %7367 = vmatmul.mubr.msk.f32.gmra.mxu0 %vm499_vm0, %v6048_v20  ;;  %7384 = vmatmul.mubr.msk.f32.gmra.mxu1 %vm499_vm0, %v6036_v8 }
  0xec   : > { %7369 = vmatprep.mubr.msk.f32.mxu0 %vm499_vm0, %v6049_v24  ;;  %7386 = vmatprep.mubr.msk.f32.mxu1 %vm499_vm0, %v6037_v10 }
  0xed   : > { %v9360_v28 = vpop.f32.mrf.mxu0  ;;  %v9362_v29 = vpop.f32.mrf.mxu1 }
  0xef   : > { %v7003_v30 = vpop.f32.mrf.mxu0  ;;  %v9364_v31 = vpop.f32.mrf.mxu1  ;;  %7370 = vmatmul.mubr.msk.f32.gmra.mxu0 %vm499_vm0, %v6050_v27  ;;  %7387 = vmatmul.mubr.msk.f32.gmra.mxu1 %vm499_vm0, %v6038_v12 }
  0xf0   : > { %7389 = vmatprep.mubr.msk.f32.mxu1 %vm499_vm0, %v6039_v14 }
  0xf1   : > { %v9369_v33 = vpop.f32.mrf.mxu0  ;;  %v9371_v34 = vpop.f32.mrf.mxu1 }
  0xf3   : > { %v7006_v37 = vpop.f32.mrf.mxu0  ;;  %v7032_v38 = vpop.f32.mrf.mxu1  ;;  %7390 = vmatmul.mubr.msk.f32.gmra.mxu1 %vm499_vm0, %v6040_v15 }
  0xf4   : > { %7392 = vmatprep.mubr.msk.f32.mxu1 %vm499_vm0, %v6041_v17 }
  0xf5   : > { %v9375_v41 = vpop.f32.mrf.mxu0  ;;  %v9377_v42 = vpop.f32.mrf.mxu1 }
  0xf7   : > { %v7009_v45 = vpop.f32.mrf.mxu0  ;;  %v7035_v49 = vpop.f32.mrf.mxu1  ;;  %7393 = vmatmul.mubr.msk.f32.gmra.mxu1 %vm499_vm0, %v6042_v18 }
  0xf8   : > { %7395 = vmatprep.mubr.msk.f32.mxu1 %vm499_vm0, %v6043_v19 }
  0xf9   : > { %v9381_v50 = vpop.f32.mrf.mxu0  ;;  %v9383_v51 = vpop.f32.mrf.mxu1 }
  0xfb   : > { %v7012_v52 = vpop.f32.mrf.mxu0  ;;  %v7038_v53 = vpop.f32.mrf.mxu1  ;;  %7396 = vmatmul.mubr.msk.f32.gmra.mxu1 %vm499_vm0, %v6044_v7 }
  0xfc   : > { %7398 = vmatprep.mubr.msk.f32.mxu1 %vm499_vm0, %v6045_v9 }
  0xfd   : > { %v9387_v54 = vpop.f32.mrf.mxu0  ;;  %v9389_v55 = vpop.f32.mrf.mxu1 }
  0xff   : > { %v7041_v56 = vpop.f32.mrf.mxu1  ;;  %v7067_v57 = vpop.f32.mrf.mxu0  ;;  %7399 = vmatmul.mubr.msk.f32.gmra.mxu1 %vm499_vm0, %v6046_v11 }
 0x100   : > { %v995_v58 = vadd.f32 %v7067_v57, %v6997_v21  ;;  %7401 = vmatprep.mubr.msk.f32.mxu1 %vm499_vm0, %v6047_v13 }
 0x101   : > { %v9393_v59 = vpop.f32.mrf.mxu1  ;;  %v9395_v60 = vpop.f32.mrf.mxu0 }
 0x103   : > { %v9397_v61 = vpop.f32.mrf.mxu1  ;;  %v7070_v62 = vpop.f32.mrf.mxu0  ;;  %7402 = vmatmul.mubr.msk.f32.gmra.mxu1 %vm499_vm0, %v6048_v20 }
 0x104   : > { %v9400_v63 = vadd.f32 %v7070_v62, %v7000_v25  ;;  %7404 = vmatprep.mubr.msk.f32.mxu1 %vm499_vm0, %v6049_v24 }
 0x105   : > { %v9403_v32 = vpop.f32.mrf.mxu1  ;;  %v9405_v35 = vpop.f32.mrf.mxu0 }
 0x107   : > { %v9407_v36 = vpop.f32.mrf.mxu1  ;;  %v7073_v0 = vpop.f32.mrf.mxu0  ;;  %7405 = vmatmul.mubr.msk.f32.gmra.mxu1 %vm499_vm0, %v6050_v27 }
 0x108   : > { %v9410_v39 = vadd.f32 %v7073_v0, %v7003_v30  ;;  %v12017_v0 = vmov 0.0  }
 0x109   : > { %v9412_v1 = vpop.f32.mrf.mxu1  ;;  %v9414_v40 = vpop.f32.mrf.mxu0  ;;  %7407 = vmatprep.subr.mxu0 %v12017_v0  ;;  %7458 = vmatprep.subr.mxu1 %v12017_v0 }
 0x10a   : > { %7431 = vmatprep.mubr.msk.f32.mxu0 %vm8513_vm2, %v12017_v0  ;;  %7482 = vmatprep.mubr.msk.f32.mxu1 %vm8513_vm2, %v12017_v0 }
 0x10b   : > { %v9416_v2 = vpop.f32.mrf.mxu1  ;;  %v7076_v43 = vpop.f32.mrf.mxu0 }
 0x10c   : > { %v9418_v3 = vadd.f32 %v7076_v43, %v7006_v37 }
 0x10d   : > { %v9420_v44 = vpop.f32.mrf.mxu1  ;;  %v9422_v46 = vpop.f32.mrf.mxu0 }
 0x10f   : > { %v9424_v47 = vpop.f32.mrf.mxu1  ;;  %v7079_v48 = vpop.f32.mrf.mxu0 }
 0x110   : > { %v9426_v4 = vadd.f32 %v7079_v48, %v7009_v45  ;;  %v6132_v48 = vld [vmem:[%s12005_s3 + $0x1d0] sm:$0xff] }
 0x111   : > { %v9428_v5 = vpop.f32.mrf.mxu1  ;;  %v9430_v6 = vpop.f32.mrf.mxu0 }
 0x113   : > { %v9432_v8 = vpop.f32.mrf.mxu1  ;;  %v7082_v10 = vpop.f32.mrf.mxu0 }
 0x114   : > { %v9434_v12 = vadd.f32 %v7082_v10, %v7012_v52 }
 0x115   : > { %v9436_v14 = vpop.f32.mrf.mxu1  ;;  %v9438_v15 = vpop.f32.mrf.mxu0 }
 0x116   : > { %12049 = vst [vmem:[#allocation6_spill] sm:$0xff] %v9436_v14 }
 0x117   : > { %v7085_v17 = vpop.f32.mrf.mxu0  ;;  %v7102_v18 = vpop.f32.mrf.mxu1 }
 0x118   : > { %v9441_v19 = vadd.f32 %v7085_v17, %v9341_v16  ;;  %v9443_v7 = vadd.f32 %v7102_v18, %v7032_v38 }
 0x119   : > { %v9445_v9 = vpop.f32.mrf.mxu0  ;;  %v9447_v11 = vpop.f32.mrf.mxu1 }
 0x11b   : > { %v7088_v13 = vpop.f32.mrf.mxu0  ;;  %v7105_v21 = vpop.f32.mrf.mxu1 }
 0x11c   : > { %v9450_v20 = vadd.f32 %v7088_v13, %v9353_v26  ;;  %v9452_v24 = vadd.f32 %v7105_v21, %v7035_v49  ;;  %v6109_v21 = vld [vmem:[%s12005_s3 + $0xa8] sm:$0xff] }
 0x11d   : > { %v9454_v25 = vpop.f32.mrf.mxu0  ;;  %v9456_v27 = vpop.f32.mrf.mxu1 }
 0x11f   : > { %v7091_v30 = vpop.f32.mrf.mxu0  ;;  %v7108_v16 = vpop.f32.mrf.mxu1 }
 0x120   : > { %v9459_v37 = vadd.f32 %v7091_v30, %v9364_v31  ;;  %v9461_v38 = vadd.f32 %v7108_v16, %v7038_v53  ;;  %v6111_v31 = vld [vmem:[%s12005_s3 + $0xb8] sm:$0x3]  ;;  %v6131_v30 = vld [vmem:[%s12005_s3 + $0x1c8] sm:$0xff] }
 0x121   : > { %v9463_v45 = vpop.f32.mrf.mxu0  ;;  %v9465_v52 = vpop.f32.mrf.mxu1  ;;  %v6133_v53 = vld [vmem:[%s12005_s3 + $0x1d8] sm:$0x3]  ;;  %7408 = vmatpush3.msk.msra.mxu0 %vm2952_vm1, %v6111_v31 }
 0x122   : > { %7459 = vmatpush3.msk.msra.mxu1 %vm2952_vm1, %v6133_v53  ;;  %7409 = vmatprep.subr.mxu0 %v12017_v0 }
 0x123   : > { %v7111_v57 = vpop.f32.mrf.mxu1  ;;  %v7137_v26 = vpop.f32.mrf.mxu0  ;;  %7460 = vmatprep.subr.mxu1 %v12017_v0 }
 0x124   : > { %v9467_v62 = vadd.f32 %v7111_v57, %v7041_v56  ;;  %v9469_v49 = vadd.f32 %v7137_v26, %v995_v58  ;;  %v6110_v58 = vld [vmem:[%s12005_s3 + $0xb0] sm:$0xff]  ;;  %7461 = vmatpush3.msra.mxu1 %v6132_v48 }
 0x125   : > { %v9479_v43 = vpop.f32.mrf.mxu1  ;;  %v9481_v56 = vpop.f32.mrf.mxu0  ;;  %7410 = vmatpush3.msra.mxu0 %v6110_v58  ;;  %7462 = vmatprep.subr.mxu1 %v12017_v0 }
 0x126   : > { %12050 = vst [vmem:[#allocation7_spill] sm:$0xff] %v9469_v49  ;;  %7411 = vmatprep.subr.mxu0 %v12017_v0  ;;  %7463 = vmatpush3.msra.mxu1 %v6131_v30  ;;  %v6106_v30 = vld [vmem:[%s12005_s3 + $0x90] sm:$0xff] }
 0x127   : > { %v7114_v10 = vpop.f32.mrf.mxu1  ;;  %v7140_v17 = vpop.f32.mrf.mxu0  ;;  %7412 = vmatpush3.msra.mxu0 %v6109_v21  ;;  %7464 = vmatprep.subr.mxu1 %v12017_v0 }
 0x128   : > { %v9494_v18 = vadd.f32 %v7114_v10, %v9397_v61  ;;  %v9497_v13 = vadd.f32 %v7140_v17, %v9400_v63  ;;  %7413 = vmatprep.subr.mxu0 %v12017_v0  ;;  %v6108_v61 = vld [vmem:[%s12005_s3 + $0xa0] sm:$0xff]  ;;  %v6107_v17 = vld [vmem:[%s12005_s3 + $0x98] sm:$0xff] }
 0x129   : > { %v9507_v16 = vpop.f32.mrf.mxu1  ;;  %v9509_v57 = vpop.f32.mrf.mxu0  ;;  %v6130_v63 = vld [vmem:[%s12005_s3 + $0x1c0] sm:$0xff]  ;;  %7414 = vmatpush3.msra.mxu0 %v6108_v61  ;;  %v6128_v61 = vld [vmem:[%s12005_s3 + $0x1b0] sm:$0xff] }
 0x12a   : > { %12051 = vst [vmem:[#allocation8_spill] sm:$0xff] %v9497_v13  ;;  %7465 = vmatpush3.msra.mxu1 %v6130_v63  ;;  %7415 = vmatprep.subr.mxu0 %v12017_v0 }
 0x12b   : > { %v7117_v26 = vpop.f32.mrf.mxu1  ;;  %v7143_v31 = vpop.f32.mrf.mxu0  ;;  %7466 = vmatprep.subr.mxu1 %v12017_v0  ;;  %7416 = vmatpush3.msra.mxu0 %v6107_v17 }
 0x12c   : > { %v9520_v53 = vadd.f32 %v7117_v26, %v9407_v36  ;;  %v9523_v58 = vadd.f32 %v7143_v31, %v9410_v39  ;;  %v6129_v36 = vld [vmem:[%s12005_s3 + $0x1b8] sm:$0xff]  ;;  %7417 = vmatprep.subr.mxu0 %v12017_v0 }
 0x12d   : > { %v9527_v48 = vpop.f32.mrf.mxu1  ;;  %v9529_v10 = vpop.f32.mrf.mxu0  ;;  %7467 = vmatpush3.msra.mxu1 %v6129_v36  ;;  %7418 = vmatpush3.msra.mxu0 %v6106_v30  ;;  %v6105_v36 = vld [vmem:[%s12005_s3 + $0x88] sm:$0xff]  ;;  %v6126_v30 = vld [vmem:[%s12005_s3 + $0x1a0] sm:$0xff] }
 0x12e   : > { %12052 = vst [vmem:[#allocation9_spill] sm:$0xff] %v9523_v58  ;;  %7468 = vmatprep.subr.mxu1 %v12017_v0  ;;  %7419 = vmatprep.subr.mxu0 %v12017_v0 }
 0x12f   : > { %v7120_v39 = vpop.f32.mrf.mxu1  ;;  %v7146_v21 = vpop.f32.mrf.mxu0  ;;  %7469 = vmatpush3.msra.mxu1 %v6128_v61  ;;  %7420 = vmatpush3.msra.mxu0 %v6105_v36 }
 0x130   : > { %v9546_v63 = vadd.f32 %v7120_v39, %v9416_v2  ;;  %v9549_v26 = vadd.f32 %v7146_v21, %v9418_v3  ;;  %7470 = vmatprep.subr.mxu1 %v12017_v0  ;;  %v6127_v2 = vld [vmem:[%s12005_s3 + $0x1a8] sm:$0xff]  ;;  %7421 = vmatprep.subr.mxu0 %v12017_v0  ;;  %v6104_v21 = vld [vmem:[%s12005_s3 + $0x80] sm:$0xff] }
 0x131   : > { %v9551_v31 = vpop.f32.mrf.mxu1  ;;  %v9553_v17 = vpop.f32.mrf.mxu0  ;;  %7471 = vmatpush3.msra.mxu1 %v6127_v2  ;;  %7422 = vmatpush3.msra.mxu0 %v6104_v21  ;;  %v6124_v21 = vld [vmem:[%s12005_s3 + $0x190] sm:$0xff] }
 0x132   : > { %12053 = vst [vmem:[#allocation10_spill] sm:$0xff] %v9549_v26  ;;  %12054 = vst [vmem:[#allocation11_spill] sm:$0xff] %v9553_v17  ;;  %7472 = vmatprep.subr.mxu1 %v12017_v0  ;;  %7423 = vmatprep.subr.mxu0 %v12017_v0  ;;  %v6103_v17 = vld [vmem:[%s12005_s3 + $0x78] sm:$0xff] }
 0x133   : > { %v7123_v3 = vpop.f32.mrf.mxu1  ;;  %v7149_v39 = vpop.f32.mrf.mxu0  ;;  %7473 = vmatpush3.msra.mxu1 %v6126_v30  ;;  %7424 = vmatpush3.msra.mxu0 %v6103_v17 }
 0x134   : > { %v9572_v61 = vadd.f32 %v7123_v3, %v9424_v47  ;;  %v9575_v36 = vadd.f32 %v7149_v39, %v9426_v4  ;;  %7474 = vmatprep.subr.mxu1 %v12017_v0  ;;  %v6125_v47 = vld [vmem:[%s12005_s3 + $0x198] sm:$0xff]  ;;  %7425 = vmatprep.subr.mxu0 %v12017_v0  ;;  %v6102_v39 = vld [vmem:[%s12005_s3 + $0x70] sm:$0xff] }
 0x135   : > { %v9577_v2 = vpop.f32.mrf.mxu1  ;;  %v9579_v14 = vpop.f32.mrf.mxu0  ;;  %7475 = vmatpush3.msra.mxu1 %v6125_v47  ;;  %7426 = vmatpush3.msra.mxu0 %v6102_v39  ;;  %v6122_v39 = vld [vmem:[%s12005_s3 + $0x180] sm:$0xff] }
 0x136   : > { %12055 = vst [vmem:[#allocation12_spill] sm:$0xff] %v9575_v36  ;;  %12056 = vst [vmem:[#allocation13_spill] sm:$0xff] %v9577_v2  ;;  %7476 = vmatprep.subr.mxu1 %v12017_v0  ;;  %7427 = vmatprep.subr.mxu0 %v12017_v0  ;;  %v6101_v2 = vld [vmem:[%s12005_s3 + $0x68] sm:$0xff] }
 0x137   : > { %12057 = vst [vmem:[#allocation14_spill] sm:$0xff] %v9579_v14  ;;  %v7126_v4 = vpop.f32.mrf.mxu1  ;;  %v7152_v3 = vpop.f32.mrf.mxu0  ;;  %7477 = vmatpush3.msra.mxu1 %v6124_v21  ;;  %7428 = vmatpush3.msra.mxu0 %v6101_v2 }
 0x138   : > { %v9598_v30 = vadd.f32 %v7126_v4, %v9432_v8  ;;  %v9601_v17 = vadd.f32 %v7152_v3, %v9434_v12  ;;  %7478 = vmatprep.subr.mxu1 %v12017_v0  ;;  %v6123_v8 = vld [vmem:[%s12005_s3 + $0x188] sm:$0xff]  ;;  %7429 = vmatprep.subr.mxu0 %v12017_v0  ;;  %v6100_v3 = vld [vmem:[%s12005_s3 + $0x60] sm:$0xff] }
 0x139   : > { %v9603_v47 = vpop.f32.mrf.mxu1  ;;  %v9605_v14 = vpop.f32.mrf.mxu0  ;;  %7479 = vmatpush3.msra.mxu1 %v6123_v8  ;;  %7430 = vmatpush3.msra.mxu0 %v6100_v3 }
 0x13a   : > { %12058 = vst [vmem:[#allocation15_spill] sm:$0xff] %v9601_v17  ;;  %12059 = vst [vmem:[#allocation16_spill] sm:$0xff] %v9603_v47  ;;  %7480 = vmatprep.subr.mxu1 %v12017_v0  ;;  %7509 = vmatprep.subr.mxu0 %v12017_v0 }
 0x13b   : > { %12060 = vst [vmem:[#allocation17_spill] sm:$0xff] %v9605_v14  ;;  %v7155_v12 = vpop.f32.mrf.mxu0  ;;  %v7172_v4 = vpop.f32.mrf.mxu1  ;;  %7481 = vmatpush3.msra.mxu1 %v6122_v39 }
 0x13c   : > { %v9624_v21 = vadd.f32 %v7155_v12, %v9441_v19  ;;  %v9627_v2 = vadd.f32 %v7172_v4, %v9443_v7  ;;  %7560 = vmatprep.subr.mxu1 %v12017_v0 }
 0x13d   : > { %v9631_v8 = vpop.f32.mrf.mxu0  ;;  %v9633_v14 = vpop.f32.mrf.mxu1 }
 0x13e   : > { %12061 = vst [vmem:[#allocation18_spill] sm:$0xff] %v9624_v21  ;;  %12062 = vst [vmem:[#allocation19_spill] sm:$0xff] %v9627_v2 }
 0x13f   : > { %12063 = vst [vmem:[#allocation20_spill] sm:$0xff] %v9631_v8  ;;  %v7158_v7 = vpop.f32.mrf.mxu0  ;;  %v7175_v12 = vpop.f32.mrf.mxu1 }
 0x140   : > { %v9642_v4 = vadd.f32 %v7158_v7, %v9450_v20  ;;  %v9645_v3 = vadd.f32 %v7175_v12, %v9452_v24 }
 0x141   : > { %v9647_v8 = vpop.f32.mrf.mxu0  ;;  %v9649_v39 = vpop.f32.mrf.mxu1 }
 0x142   : > { %12064 = vst [vmem:[#allocation21_spill] sm:$0xff] %v9642_v4  ;;  %12065 = vst [vmem:[#allocation22_spill] sm:$0xff] %v9645_v3 }
 0x143   : > { %12066 = vst [vmem:[#allocation23_spill] sm:$0xff] %v9647_v8  ;;  %v7161_v19 = vpop.f32.mrf.mxu0  ;;  %v7178_v2 = vpop.f32.mrf.mxu1 }
 0x144   : > { %v9654_v49 = vadd.f32 %v7161_v19, %v9459_v37  ;;  %v9657_v0 = vadd.f32 %v7178_v2, %v9461_v38 }
 0x145   : > { %v9659_v20 = vpop.f32.mrf.mxu0  ;;  %v9661_v7 = vpop.f32.mrf.mxu1 }
 0x146   : > { %12067 = vst [vmem:[#allocation24_spill] sm:$0xff] %v9654_v49  ;;  %12068 = vst [vmem:[#allocation25_spill] sm:$0xff] %v9657_v0 }
 0x147   : > { %12069 = vst [vmem:[#allocation26_spill] sm:$0xff] %v9659_v20  ;;  %v7181_v12 = vpop.f32.mrf.mxu1  ;;  %v9665_v8 = vpop.f32.mrf.mxu0 }
 0x148   : > { %v9668_v47 = vadd.f32 %v7181_v12, %v9467_v62 }
 0x149   : > { %v9670_v3 = vpop.f32.mrf.mxu1  ;;  %v9672_v37 = vpop.f32.mrf.mxu0 }
 0x14a   : > { %12070 = vst [vmem:[#allocation27_spill] sm:$0xff] %v9668_v47 }
 0x14b   : > { %v7184_v2 = vpop.f32.mrf.mxu1  ;;  %v9676_v19 = vpop.f32.mrf.mxu0 }
 0x14c   : > { %12071 = vst [vmem:[#allocation28_spill] sm:$0xff] %v9676_v19  ;;  %v9679_v20 = vadd.f32 %v7184_v2, %v9494_v18 }
 0x14d   : > { %v9681_v24 = vpop.f32.mrf.mxu1  ;;  %v9683_v0 = vpop.f32.mrf.mxu0 }
 0x14e   : > { %12072 = vst [vmem:[#allocation29_spill] sm:$0xff] %v9679_v20  ;;  %12073 = vst [vmem:[#allocation30_spill] sm:$0xff] %v9683_v0 }
 0x14f   : > { %v7187_v12 = vpop.f32.mrf.mxu1  ;;  %v9687_v58 = vpop.f32.mrf.mxu0 }
 0x150   : > { %12074 = vst [vmem:[#allocation31_spill] sm:$0xff] %v9687_v58  ;;  %v9690_v13 = vadd.f32 %v7187_v12, %v9520_v53 }
 0x151   : > { %v9692_v38 = vpop.f32.mrf.mxu1  ;;  %v9694_v47 = vpop.f32.mrf.mxu0 }
 0x152   : > { %12075 = vst [vmem:[#allocation32_spill] sm:$0xff] %v9690_v13  ;;  %12076 = vst [vmem:[#allocation33_spill] sm:$0xff] %v9694_v47 }
 0x153   : > { %v7190_v2 = vpop.f32.mrf.mxu1  ;;  %v9698_v26 = vpop.f32.mrf.mxu0 }
 0x154   : > { %12077 = vst [vmem:[#allocation34_spill] sm:$0xff] %v9698_v26  ;;  %v9701_v0 = vadd.f32 %v7190_v2, %v9546_v63 }
 0x155   : > { %v9703_v62 = vpop.f32.mrf.mxu1  ;;  %v9705_v20 = vpop.f32.mrf.mxu0 }
 0x156   : > { %12078 = vst [vmem:[#allocation35_spill] sm:$0xff] %v9701_v0  ;;  %12079 = vst [vmem:[#allocation36_spill] sm:$0xff] %v9705_v20 }
 0x157   : > { %v7193_v12 = vpop.f32.mrf.mxu1  ;;  %v9709_v36 = vpop.f32.mrf.mxu0 }
 0x158   : > { %12080 = vst [vmem:[#allocation37_spill] sm:$0xff] %v9709_v36  ;;  %v9712_v47 = vadd.f32 %v7193_v12, %v9572_v61 }
 0x159   : > { %v9714_v18 = vpop.f32.mrf.mxu1  ;;  %v9716_v13 = vpop.f32.mrf.mxu0 }
 0x15a   : > { %12081 = vst [vmem:[#allocation38_spill] sm:$0xff] %v9712_v47  ;;  %12082 = vst [vmem:[#allocation39_spill] sm:$0xff] %v9716_v13 }
 0x15b   : > { %v7196_v2 = vpop.f32.mrf.mxu1  ;;  %v9720_v17 = vpop.f32.mrf.mxu0 }
 0x15c   : > { %12083 = vst [vmem:[#allocation40_spill] sm:$0xff] %v9720_v17  ;;  %v9723_v20 = vadd.f32 %v7196_v2, %v9598_v30 }
 0x15d   : > { %v9725_v53 = vpop.f32.mrf.mxu1  ;;  %v9727_v0 = vpop.f32.mrf.mxu0 }
 0x15e   : > { %12084 = vst [vmem:[#allocation41_spill] sm:$0xff] %v9723_v20  ;;  %12085 = vst [vmem:[#allocation42_spill] sm:$0xff] %v9725_v53 }
 0x15f   : > { %12086 = vst [vmem:[#allocation43_spill] sm:$0xff] %v9727_v0  ;;  %v9731_v12 = vpop.f32.mrf.mxu0  ;;  %v9733_v21 = vpop.f32.mrf.mxu1 }
 0x160   : > { %12087 = vst [vmem:[#allocation44_spill] sm:$0xff] %v9731_v12 }
 0x161   : > { %v9735_v13 = vpop.f32.mrf.mxu0  ;;  %v9737_v63 = vpop.f32.mrf.mxu1 }
 0x162   : > { %12088 = vst [vmem:[#allocation45_spill] sm:$0xff] %v9735_v13 }
 0x163   : > { %v9739_v47 = vpop.f32.mrf.mxu0  ;;  %v9741_v4 = vpop.f32.mrf.mxu1 }
 0x164   : > { %12089 = vst [vmem:[#allocation46_spill] sm:$0xff] %v9739_v47  ;;  %12090 = vst [vmem:[#allocation47_spill] sm:$0xff] %v9741_v4 }
 0x165   : > { %v9743_v30 = vpop.f32.mrf.mxu0  ;;  %v9745_v2 = vpop.f32.mrf.mxu1 }
 0x166   : > { %12091 = vst [vmem:[#allocation48_spill] sm:$0xff] %v9743_v30  ;;  %12092 = vst [vmem:[#allocation49_spill] sm:$0xff] %v9745_v2 }
 0x167   : > { %v9747_v0 = vpop.f32.mrf.mxu0  ;;  %v9749_v17 = vpop.f32.mrf.mxu1 }
 0x168   : > { %12093 = vst [vmem:[#allocation50_spill] sm:$0xff] %v9747_v0  ;;  %12094 = vst [vmem:[#allocation51_spill] sm:$0xff] %v9749_v17 }
 0x169   : > { %v9751_v61 = vpop.f32.mrf.mxu0  ;;  %v9753_v20 = vpop.f32.mrf.mxu1 }
 0x16a   : > { %12095 = vst [vmem:[#allocation52_spill] sm:$0xff] %v9751_v61  ;;  %12096 = vst [vmem:[#allocation53_spill] sm:$0xff] %v9753_v20 }
 0x16b   : > { %v9755_v49 = vpop.f32.mrf.mxu1  ;;  %v9757_v13 = vpop.f32.mrf.mxu0 }
 0x16c   : > { %12097 = vst [vmem:[#allocation54_spill] sm:$0xff] %v9755_v49 }
 0x16d   : > { %v9759_v12 = vpop.f32.mrf.mxu1  ;;  %v9761_v47 = vpop.f32.mrf.mxu0 }
 0x16e   : > { %12098 = vst [vmem:[#allocation55_spill] sm:$0xff] %v9759_v12 }
 0x16f   : > { %v9763_v36 = vpop.f32.mrf.mxu1  ;;  %v9765_v30 = vpop.f32.mrf.mxu0 }
 0x170   : > { %12099 = vst [vmem:[#allocation56_spill] sm:$0xff] %v9763_v36  ;;  %12100 = vst [vmem:[#allocation57_spill] sm:$0xff] %v9765_v30 }
 0x171   : > { %v9767_v2 = vpop.f32.mrf.mxu1  ;;  %v9769_v0 = vpop.f32.mrf.mxu0 }
 0x172   : > { %12101 = vst [vmem:[#allocation58_spill] sm:$0xff] %v9767_v2  ;;  %12102 = vst [vmem:[#allocation59_spill] sm:$0xff] %v9769_v0 }
 0x173   : > { %v9771_v17 = vpop.f32.mrf.mxu1  ;;  %v9773_v61 = vpop.f32.mrf.mxu0 }
 0x174   : > { %12103 = vst [vmem:[#allocation60_spill] sm:$0xff] %v9771_v17  ;;  %12104 = vst [vmem:[#allocation61_spill] sm:$0xff] %v9773_v61 }
 0x175   : > { %v9775_v20 = vpop.f32.mrf.mxu1  ;;  %v9777_v49 = vpop.f32.mrf.mxu0 }
 0x176   : > { %12105 = vst [vmem:[#allocation62_spill] sm:$0xff] %v9775_v20  ;;  %12106 = vst [vmem:[#allocation63_spill] sm:$0xff] %v9777_v49 }
 0x177   : > { %v9779_v26 = vpop.f32.mrf.mxu1  ;;  %v9781_v12 = vpop.f32.mrf.mxu0 }
 0x178   : > { %12107 = vst [vmem:[#allocation64_spill] sm:$0xff] %v9779_v26  ;;  %12108 = vst [vmem:[#allocation65_spill] sm:$0xff] %v9781_v12 }
 0x179   : > { %v9783_v58 = vpop.f32.mrf.mxu1  ;;  %v9785_v36 = vpop.f32.mrf.mxu0 }
 0x17a   : > { %12109 = vst [vmem:[#allocation66_spill] sm:$0xff] %v9783_v58  ;;  %12110 = vst [vmem:[#allocation67_spill] sm:$0xff] %v9785_v36 }
 0x17b   : > { %v9787_v4 = vpop.f32.mrf.mxu1  ;;  %v9789_v2 = vpop.f32.mrf.mxu0 }
 0x17c   : > { %12111 = vst [vmem:[#allocation68_spill] sm:$0xff] %v9787_v4  ;;  %12112 = vst [vmem:[#allocation69_spill] sm:$0xff] %v9789_v2 }
 0x17d   : > { %v9791_v0 = vpop.f32.mrf.mxu1  ;;  %v9793_v17 = vpop.f32.mrf.mxu0 }
 0x17e   : > { %12113 = vst [vmem:[#allocation70_spill] sm:$0xff] %v9791_v0  ;;  %12114 = vst [vmem:[#allocation71_spill] sm:$0xff] %v9793_v17 }
 0x17f   : > { %v9795_v61 = vpop.f32.mrf.mxu1  ;;  %v9797_v20 = vpop.f32.mrf.mxu0 }
 0x180   : > { %12115 = vst [vmem:[#allocation72_spill] sm:$0xff] %v9795_v61  ;;  %12116 = vst [vmem:[#allocation73_spill] sm:$0xff] %v9797_v20 }
 0x181   : > { %v9799_v49 = vpop.f32.mrf.mxu1  ;;  %v9801_v26 = vpop.f32.mrf.mxu0 }
 0x182   : > { %12117 = vst [vmem:[#allocation74_spill] sm:$0xff] %v9799_v49  ;;  %12118 = vst [vmem:[#allocation75_spill] sm:$0xff] %v9801_v26 }
 0x183   : > { %v9803_v12 = vpop.f32.mrf.mxu0  ;;  %v9805_v58 = vpop.f32.mrf.mxu1 }
 0x184   : > { %12119 = vst [vmem:[#allocation76_spill] sm:$0xff] %v9803_v12 }
 0x185   : > { %v9807_v36 = vpop.f32.mrf.mxu0  ;;  %v9809_v4 = vpop.f32.mrf.mxu1 }
 0x186   : > { %12120 = vst [vmem:[#allocation77_spill] sm:$0xff] %v9807_v36 }
 0x187   : > { %v9811_v2 = vpop.f32.mrf.mxu0  ;;  %v9813_v0 = vpop.f32.mrf.mxu1 }
 0x188   : > { %12121 = vst [vmem:[#allocation78_spill] sm:$0xff] %v9811_v2  ;;  %12122 = vst [vmem:[#allocation79_spill] sm:$0xff] %v9813_v0 }
 0x189   : > { %v9815_v17 = vpop.f32.mrf.mxu0  ;;  %v9817_v61 = vpop.f32.mrf.mxu1 }
 0x18a   : > { %12123 = vst [vmem:[#allocation80_spill] sm:$0xff] %v9815_v17  ;;  %12124 = vst [vmem:[#allocation81_spill] sm:$0xff] %v9817_v61 }
 0x18b   : > { %v9819_v20 = vpop.f32.mrf.mxu0  ;;  %v9821_v49 = vpop.f32.mrf.mxu1 }
 0x18c   : > { %12125 = vst [vmem:[#allocation82_spill] sm:$0xff] %v9819_v20  ;;  %12126 = vst [vmem:[#allocation83_spill] sm:$0xff] %v9821_v49 }
 0x18d   : > { %v9823_v26 = vpop.f32.mrf.mxu0  ;;  %v9825_v12 = vpop.f32.mrf.mxu1 }
 0x18e   : > { %12127 = vst [vmem:[#allocation84_spill] sm:$0xff] %v9823_v26  ;;  %12128 = vst [vmem:[#allocation85_spill] sm:$0xff] %v9825_v12 }
 0x18f   : > { %v9827_v30 = vpop.f32.mrf.mxu1  ;;  %v9829_v36 = vpop.f32.mrf.mxu0 }
 0x190   : > { %12129 = vst [vmem:[#allocation86_spill] sm:$0xff] %v9827_v30 }
 0x191   : > { %v9831_v19 = vpop.f32.mrf.mxu1  ;;  %v9833_v2 = vpop.f32.mrf.mxu0 }
 0x192   : > { %12130 = vst [vmem:[#allocation87_spill] sm:$0xff] %v9831_v19 }
 0x193   : > { %v9835_v0 = vpop.f32.mrf.mxu1  ;;  %v9837_v17 = vpop.f32.mrf.mxu0 }
 0x194   : > { %12131 = vst [vmem:[#allocation88_spill] sm:$0xff] %v9835_v0  ;;  %v990_v0 = vadd.f32 %v9395_v60, %v9348_v22  ;;  %v1050_v22 = vadd.f32 %v9445_v9, %v9350_v23  ;;  %v1165_v23 = vadd.f32 %v9465_v52, %v9389_v55  ;;  %v12140_v52 = vld [vmem:[#allocation14_spill] sm:$0xff] }
 0x195   : > { %v9839_v61 = vpop.f32.mrf.mxu1  ;;  %v9841_v20 = vpop.f32.mrf.mxu0 }
 0x196   : > { %12132 = vst [vmem:[#allocation89_spill] sm:$0xff] %v9839_v61  ;;  %12133 = vst [vmem:[#allocation90_spill] sm:$0xff] %v9841_v20  ;;  %v1000_v61 = vadd.f32 %v9405_v35, %v9360_v28  ;;  %v1010_v20 = vadd.f32 %v9414_v40, %v9369_v33  ;;  %v1145_v28 = vadd.f32 %v9447_v11, %v9377_v42 }
 0x197   : > { %v9843_v49 = vpop.f32.mrf.mxu1  ;;  %v9845_v26 = vpop.f32.mrf.mxu0  ;;  %v1060_v33 = vadd.f32 %v9454_v25, %v9362_v29  ;;  %v9890_v42 = vadd.f32 %v9481_v56, %v990_v0  ;;  %v1185_v29 = vadd.f32 %v9507_v16, %v9403_v32  ;;  %v1205_v40 = vadd.f32 %v9551_v31, %v9420_v44  ;;  %v12142_v56 = vld [vmem:[#allocation16_spill] sm:$0xff] }
 0x198   : > { %12134 = vst [vmem:[#allocation91_spill] sm:$0xff] %v9843_v49  ;;  %v9902_v55 = vadd.f32 %v9633_v14, %v1145_v28  ;;  %v9915_v9 = vadd.f32 %v9661_v7, %v1165_v23  ;;  %v12146_v23 = vld [vmem:[#allocation42_spill] sm:$0xff]  ;;  %v12172_v28 = vld [vmem:[#allocation81_spill] sm:$0xff] }
 0x199   : > { %v9847_v12 = vpop.f32.mrf.mxu1  ;;  %v9849_v30 = vpop.f32.mrf.mxu0  ;;  %v9923_v14 = vadd.f32 %v9681_v24, %v1185_v29  ;;  %v9929_v25 = vadd.f32 %v9703_v62, %v1205_v40  ;;  %v12148_v29 = vld [vmem:[#allocation57_spill] sm:$0xff]  ;;  %v12149_v40 = vld [vmem:[#allocation30_spill] sm:$0xff] }
 0x19a   : > { %12135 = vst [vmem:[#allocation92_spill] sm:$0xff] %v9847_v12  ;;  %12136 = vst [vmem:[#allocation93_spill] sm:$0xff] %v9849_v30  ;;  %v1020_v12 = vadd.f32 %v9422_v46, %v9375_v41  ;;  %v1030_v30 = vadd.f32 %v9430_v6, %v9381_v50  ;;  %v1155_v41 = vadd.f32 %v9456_v27, %v9383_v51  ;;  %v12138_v6 = vld [vmem:[#allocation13_spill] sm:$0xff]  ;;  %v12139_v27 = vld [vmem:[#allocation11_spill] sm:$0xff] }
 0x19b   : > { %v9851_v53 = vpop.f32.mrf.mxu1  ;;  %v9853_v19 = vpop.f32.mrf.mxu0  ;;  %v9881_v50 = vadd.f32 %v9463_v45, %v9371_v34  ;;  %v9895_v51 = vadd.f32 %v9509_v57, %v1000_v61  ;;  %v1195_v34 = vadd.f32 %v9527_v48, %v9412_v1  ;;  %v1215_v32 = vadd.f32 %v12138_v6, %v9428_v5  ;;  %v12143_v57 = vld [vmem:[#allocation17_spill] sm:$0xff] }
 0x19c   : > { %12137 = vst [vmem:[#allocation94_spill] sm:$0xff] %v9851_v53  ;;  %v1040_v53 = vadd.f32 %v9438_v15, %v9387_v54  ;;  %v1175_v54 = vadd.f32 %v9479_v43, %v9393_v59  ;;  %v9907_v59 = vadd.f32 %v9529_v10, %v1010_v20  ;;  %v9912_v15 = vadd.f32 %v9649_v39, %v1155_v41  ;;  %v12141_v43 = vld [vmem:[#allocation6_spill] sm:$0xff]  ;;  %v12144_v10 = vld [vmem:[#allocation20_spill] sm:$0xff]  ;;  %v12145_v39 = vld [vmem:[#allocation23_spill] sm:$0xff] }
 0x19d   : > { %v9861_v49 = vpop.f32.mrf.mxu1  ;;  %v9871_v60 = vpop.f32.mrf.mxu0  ;;  %v9926_v11 = vadd.f32 %v9692_v38, %v1195_v34  ;;  %v9934_v45 = vadd.f32 %v12139_v27, %v1020_v12  ;;  %v9937_v0 = vadd.f32 %v12140_v52, %v1030_v30  ;;  %v1225_v16 = vadd.f32 %v12142_v56, %v12141_v43  ;;  %v12153_v43 = vld [vmem:[#allocation31_spill] sm:$0xff]  ;;  %v12154_v56 = vld [vmem:[#allocation61_spill] sm:$0xff] }
 0x19e   : > { %v9920_v44 = vadd.f32 %v9670_v3, %v1175_v54  ;;  %v9942_v48 = vadd.f32 %v12143_v57, %v1040_v53  ;;  %v9945_v31 = vadd.f32 %v12144_v10, %v1050_v22  ;;  %v1679_v3 = vmax.f32 %v9890_v42, %v9902_v55  ;;  %v12147_v42 = vld [vmem:[#allocation28_spill] sm:$0xff]  ;;  %v12150_v55 = vld [vmem:[#allocation59_spill] sm:$0xff]  ;;  %v12155_v57 = vld [vmem:[#allocation33_spill] sm:$0xff] }
 0x19f   : > { %v9883_v35 = vpop.f32.mrf.mxu1  ;;  %v9917_v1 = vpop.f32.mrf.mxu0  ;;  %v9950_v20 = vadd.f32 %v12145_v39, %v1060_v33  ;;  %v9953_v7 = vadd.f32 %v9714_v18, %v1215_v32  ;;  %v2079_v53 = vadd.f32 %v9757_v13, %v9665_v8  ;;  %v2234_v61 = vadd.f32 %v9805_v58, %v9733_v21  ;;  %v12156_v10 = vld [vmem:[#allocation63_spill] sm:$0xff]  ;;  %v12171_v41 = vld [vmem:[#allocation49_spill] sm:$0xff] }
 0x1a0   : > { %v2074_v13 = vadd.f32 %v9761_v47, %v9672_v37  ;;  %v2229_v58 = vadd.f32 %v9809_v4, %v9737_v63  ;;  %v9983_v54 = vadd.f32 %v12146_v23, %v1225_v16  ;;  %v2089_v34 = vadd.f32 %v12148_v29, %v12147_v42  ;;  %v12151_v47 = vld [vmem:[#allocation47_spill] sm:$0xff]  ;;  %v12159_v23 = vld [vmem:[#allocation36_spill] sm:$0xff]  ;;  %v12180_v30 = vld [vmem:[#allocation53_spill] sm:$0xff] }
 0x1a1   : > { %v9904_v46 = vpop.f32.mrf.mxu1  ;;  %v9965_v12 = vpop.f32.mrf.mxu0  ;;  %v2718_v21 = vadd.f32 %v9829_v36, %v2079_v53  ;;  %v2084_v6 = vadd.f32 %v12150_v55, %v12149_v40  ;;  %v12152_v37 = vld [vmem:[#allocation79_spill] sm:$0xff]  ;;  %v2099_v16 = vadd.f32 %v12154_v56, %v12153_v43  ;;  %v2094_v39 = vadd.f32 %v12156_v10, %v12155_v57  ;;  %v12157_v53 = vld [vmem:[#allocation34_spill] sm:$0xff]  ;;  %v12166_v43 = vld [vmem:[#allocation69_spill] sm:$0xff] }
 0x1a2   : > { %v2244_v27 = vadd.f32 %v12152_v37, %v12151_v47  ;;  %v2717_v4 = vadd.f32 %v9833_v2, %v2074_v13  ;;  %v12160_v42 = vld [vmem:[#allocation67_spill] sm:$0xff]  ;;  %v10005_v2 = vld [vmem:[%s12161_s2] ss:$0 sm:$0xff]  ;;  %v12165_v37 = vld [vmem:[#allocation37_spill] sm:$0xff]  ;;  %s8450_s2 = scalar_lea.vmem %s5716_s19, 128 }
 0x1a3   : > { %v9931_v5 = vpop.f32.mrf.mxu1  ;;  %v9992_v36 = vpop.f32.mrf.mxu0  ;;  %v2104_v29 = vadd.f32 %v12160_v42, %v12159_v23  ;;  %v2119_v56 = vadd.f32 %v12166_v43, %v12165_v37  ;;  %v12167_v57 = vld [vmem:[#allocation39_spill] sm:$0xff]  ;;  %v12170_v23 = vld [vmem:[#allocation73_spill] sm:$0xff]  ;;  %v2722_v38 = vadd.f32 %v9845_v26, %v2099_v16  ;;  %v12192_v16 = vmax.f32 %v9895_v51, %v9912_v15  ;;  %p8451_p11 = scmp.ne.s32.totalorder %s5716_s19, %s8450_s2  ;;  %p8458_p1 = scmp.lt.s32.totalorder %s8456_s16, %s8450_s2 }
 0x1a4   : > { %v12168_v10 = vld [vmem:[#allocation71_spill] sm:$0xff]  ;;  %v12197_v51 = vld [vmem:[#allocation9_spill] sm:$0xff] }
 0x1a5   : > { %v9955_v24 = vpop.f32.mrf.mxu1  ;;  %v12173_v22 = vld [vmem:[#allocation43_spill] sm:$0xff]  ;;  %v12198_v15 = vld [vmem:[#allocation25_spill] sm:$0xff]  ;;  %p8452_p12 = pnand %p8451_p11, %p8618_p5  ;;  %p8459_p2 = por %p8458_p1, %p8457_p0 }
 0x1a6   : > { %v12177_v43 = vld [vmem:[#allocation51_spill] sm:$0xff] }
 0x1a7   : > { %v7382_v33 = vpop.f32.mrf.mxu1  ;;  %p8453_p13 = pneg %p8452_p12 }
 0x1a8   : > { %v2736_v8 = vadd.f32 %v7382_v33, %v2234_v61  ;;  %v12158_v61 = vld [vmem:[#allocation65_spill] sm:$0xff] }
 0x1a9   : > { %v2628_v32 = vpop.f32.mrf.mxu1  ;;  %v2109_v33 = vadd.f32 %v12158_v61, %v12157_v53  ;;  %v10015_v53 = vadd.f32 %v12168_v10, %v12167_v57  ;;  %v12169_v61 = vld [vmem:[#allocation40_spill] sm:$0xff]  ;;  %v12178_v57 = vld [vmem:[#allocation83_spill] sm:$0xff]  ;;  %p8460_p3 = pnand %p8459_p2, %p8453_p13 }
 0x1aa   : > { %v2754_v63 = vmax.f32 %v2718_v21, %v2736_v8  ;;  %v2735_v52 = vadd.f32 %v2628_v32, %v2229_v58  ;;  %v2720_v58 = vadd.f32 %v9837_v17, %v2089_v34  ;;  %v12162_v21 = vld [vmem:[#allocation7_spill] sm:$0xff]  ;;  %v10019_v42 = vadd.f32 %v12170_v23, %v12169_v61  ;;  %v12179_v61 = vld [vmem:[#allocation90_spill] sm:$0xff] }
 0x1ab   : > { %v7385_v13 = vpop.f32.mrf.mxu1  ;;  %v12163_v8 = vld [vmem:[#allocation19_spill] sm:$0xff]  ;;  %v2239_v17 = vadd.f32 %v12172_v28, %v12171_v41  ;;  %v2254_v10 = vadd.f32 %v12178_v57, %v12177_v43  ;;  %v2719_v28 = vadd.f32 %v12179_v61, %v2084_v6 }
 0x1ac   : > { %v12164_v40 = vmax.f32 %v12162_v21, %v12163_v8  ;;  %v2753_v32 = vmax.f32 %v2717_v4, %v2735_v52  ;;  %v2738_v47 = vadd.f32 %v7385_v13, %v2244_v27  ;;  %v12174_v21 = vld [vmem:[#allocation75_spill] sm:$0xff]  ;;  %v10027_v27 = vpop.f32.mrf.mxu0  ;;  %v12175_v8 = vld [vmem:[#allocation44_spill] sm:$0xff] }
 0x1ad   : > { %v2638_v34 = vpop.f32.mrf.mxu1 }
 0x1ae   : > { %v2772_v55 = vmax.f32 %v12164_v40, %v2754_v63  ;;  %v10025_v63 = vadd.f32 %v12174_v21, %v12173_v22  ;;  %v2771_v52 = vmax.f32 %v1679_v3, %v2753_v32  ;;  %v2756_v13 = vmax.f32 %v2720_v58, %v2738_v47  ;;  %v12176_v40 = vld [vmem:[#allocation76_spill] sm:$0xff]  ;;  %v12181_v22 = vld [vmem:[#allocation85_spill] sm:$0xff]  ;;  %v12183_v3 = vld [vmem:[#allocation22_spill] sm:$0xff]  ;;  %v10047_v61 = vpop.f32.mrf.mxu0 }
 0x1af   : > { %v10032_v37 = vadd.f32 %v12176_v40, %v12175_v8  ;;  %v2737_v41 = vadd.f32 %v2638_v34, %v2239_v17  ;;  %v7388_v23 = vpop.f32.mrf.mxu1  ;;  %v2249_v21 = vadd.f32 %v12181_v22, %v12180_v30  ;;  %v12185_v47 = vld [vmem:[#allocation54_spill] sm:$0xff]  ;;  %v12187_v17 = vld [vmem:[#allocation93_spill] sm:$0xff] }
 0x1b0   : > { %v2797_v4 = vadd.f32 %v10005_v2, %v2772_v55  ;;  %v2796_v62 = vadd.f32 %v10005_v2, %v2771_v52  ;;  %v12182_v55 = vld [vmem:[#allocation8_spill] sm:$0xff]  ;;  %v12186_v8 = vld [vmem:[#allocation86_spill] sm:$0xff]  ;;  %v2740_v57 = vadd.f32 %v7388_v23, %v2254_v10  ;;  %v2721_v34 = vadd.f32 %v12187_v17, %v2094_v39  ;;  %v12188_v22 = vld [vmem:[#allocation45_spill] sm:$0xff] }
 0x1b1   : > { %v12184_v58 = vmax.f32 %v12182_v55, %v12183_v3  ;;  %v2264_v40 = vadd.f32 %v12186_v8, %v12185_v47  ;;  %v2755_v43 = vmax.f32 %v2719_v28, %v2737_v41  ;;  %v2648_v6 = vpop.f32.mrf.mxu1  ;;  %v12190_v3 = vld [vmem:[#allocation55_spill] sm:$0xff]  ;;  %v2724_v41 = vadd.f32 %v9853_v19, %v2109_v33  ;;  %v12195_v8 = vld [vmem:[#allocation56_spill] sm:$0xff]  ;;  %v10073_v33 = vpop.f32.mrf.mxu0 }
 0x1b2   : > { %v2815_v18 = vmax.f32 %v2797_v4, 0.0  ;;  %v2814_v30 = vmax.f32 %v2796_v62, 0.0  ;;  %v2739_v52 = vadd.f32 %v2648_v6, %v2249_v21  ;;  %v2758_v39 = vmax.f32 %v2722_v38, %v2740_v57  ;;  %v12193_v21 = vld [vmem:[#allocation46_spill] sm:$0xff]  ;;  %v12196_v6 = vld [vmem:[#allocation88_spill] sm:$0xff] }
 0x1b3   : > { %v2774_v32 = vmax.f32 %v12184_v58, %v2756_v13  ;;  %v12189_v13 = vld [vmem:[#allocation77_spill] sm:$0xff]  ;;  %v12191_v58 = vld [vmem:[#allocation87_spill] sm:$0xff]  ;;  %v2773_v10 = vmax.f32 %v12192_v16, %v2755_v43  ;;  %v7391_v28 = vpop.f32.mrf.mxu1  ;;  %v2274_v17 = vadd.f32 %v12196_v6, %v12195_v8  ;;  %v12199_v38 = vmax.f32 %v12197_v51, %v12198_v15  ;;  %v10098_v15 = vpop.f32.mrf.mxu0 }
 0x1b4   : > { %2834 = vst.msk [vmem:[#allocation2 + $0x8] sm:$0xff] %vm2832_vm3, %v2815_v18  ;;  %v10053_v55 = vadd.f32 %v12189_v13, %v12188_v22  ;;  %v2259_v26 = vadd.f32 %v12191_v58, %v12190_v3  ;;  %2833 = vst.msk [vmem:[#allocation2] sm:$0xff] %vm2832_vm3, %v2814_v30  ;;  %v2757_v18 = vmax.f32 %v2721_v34, %v2739_v52  ;;  %v12201_v52 = vld [vmem:[#allocation48_spill] sm:$0xff] }
 0x1b5   : > { %v2799_v4 = vadd.f32 %v10005_v2, %v2774_v32  ;;  %v2742_v23 = vadd.f32 %v7391_v28, %v2264_v40  ;;  %v12194_v32 = vld [vmem:[#allocation78_spill] sm:$0xff]  ;;  %v2798_v22 = vadd.f32 %v10005_v2, %v2773_v10  ;;  %v2776_v43 = vmax.f32 %v12199_v38, %v2758_v39  ;;  %v2658_v57 = vpop.f32.mrf.mxu1  ;;  %v12202_v13 = vld [vmem:[#allocation80_spill] sm:$0xff]  ;;  %v12204_v28 = vld [vmem:[#allocation27_spill] sm:$0xff] }
 0x1b6   : > { %v10064_v47 = vadd.f32 %v12194_v32, %v12193_v21  ;;  %v2723_v19 = vadd.f32 %v9871_v60, %v2104_v29  ;;  %v12200_v40 = vmax.f32 %v9907_v59, %v9915_v9  ;;  %v10081_v3 = vadd.f32 %v12202_v13, %v12201_v52  ;;  %v12203_v39 = vld [vmem:[#allocation10_spill] sm:$0xff]  ;;  %v12209_v32 = vld [vmem:[#allocation89_spill] sm:$0xff] }
 0x1b7   : > { %v2817_v62 = vmax.f32 %v2799_v4, 0.0  ;;  %v2760_v30 = vmax.f32 %v2724_v41, %v2742_v23  ;;  %v2741_v4 = vadd.f32 %v2658_v57, %v2259_v26  ;;  %v2726_v58 = vadd.f32 %v9917_v1, %v2119_v56  ;;  %v7394_v60 = vpop.f32.mrf.mxu1  ;;  %v12206_v41 = vld [vmem:[#allocation50_spill] sm:$0xff]  ;;  %v12210_v1 = vld [vmem:[#allocation60_spill] sm:$0xff]  ;;  %v12211_v56 = vld [vmem:[#allocation91_spill] sm:$0xff] }
 0x1b8   : > { %v2775_v34 = vmax.f32 %v12200_v40, %v2757_v18  ;;  %v2816_v16 = vmax.f32 %v2798_v22, 0.0  ;;  %v2801_v10 = vadd.f32 %v10005_v2, %v2776_v43  ;;  %v2744_v9 = vadd.f32 %v7394_v60, %v2274_v17  ;;  %v12207_v26 = vld [vmem:[#allocation82_spill] sm:$0xff] }
 0x1b9   : > { %2836 = vst.msk [vmem:[#allocation2 + $0x18] sm:$0xff] %vm2832_vm3, %v2817_v62  ;;  %v12205_v62 = vmax.f32 %v12203_v39, %v12204_v28  ;;  %v2759_v59 = vmax.f32 %v2723_v19, %v2741_v4  ;;  %v10091_v18 = vadd.f32 %v12207_v26, %v12206_v41  ;;  %v12208_v23 = vld [vmem:[#allocation58_spill] sm:$0xff]  ;;  %v2284_v6 = vadd.f32 %v12211_v56, %v12210_v1  ;;  %v2668_v51 = vpop.f32.mrf.mxu1  ;;  %v12218_v39 = vld [vmem:[#allocation64_spill] sm:$0xff] }
 0x1ba   : > { %v2800_v29 = vadd.f32 %v10005_v2, %v2775_v34  ;;  %v2269_v8 = vadd.f32 %v12209_v32, %v12208_v23  ;;  %2835 = vst.msk [vmem:[#allocation2 + $0x10] sm:$0xff] %vm2832_vm3, %v2816_v16  ;;  %v2819_v22 = vmax.f32 %v2801_v10, 0.0  ;;  %v12212_v17 = vmax.f32 %v9934_v45, %v9920_v44  ;;  %v12213_v40 = vld [vmem:[#allocation62_spill] sm:$0xff]  ;;  %v12214_v34 = vld [vmem:[#allocation92_spill] sm:$0xff]  ;;  %v10116_v44 = vld [vmem:[%s12005_s3 + $0x58] sm:$0x3]  ;;  %v2543_v32 = vpop.f32.mrf.mxu0 }
 0x1bb   : > { %v2778_v21 = vmax.f32 %v12205_v62, %v2760_v30  ;;  %v2762_v19 = vmax.f32 %v2726_v58, %v2744_v9  ;;  %v2279_v30 = vadd.f32 %v12214_v34, %v12213_v40  ;;  %v2725_v4 = vadd.f32 %v9965_v12, %v10015_v53  ;;  %v7397_v16 = vpop.f32.mrf.mxu1  ;;  %v10111_v10 = vld [vmem:[#allocation2 + $0x1] ss:$2 sm:$0xff]  ;;  %v10121_v45 = vld [vmem:[%s12005_s3 + $0x178] sm:$0x3]  ;;  %v12215_v53 = vld [vmem:[#allocation12_spill] sm:$0xff] }
 0x1bc   : > { %v2818_v38 = vmax.f32 %v2800_v29, 0.0  ;;  %v2777_v57 = vmax.f32 %v12212_v17, %v2759_v59  ;;  %v2728_v52 = vadd.f32 %v9992_v36, %v10019_v42  ;;  %2838 = vst.msk [vmem:[#allocation2 + $0x28] sm:$0xff] %vm2832_vm3, %v2819_v22  ;;  %v2743_v13 = vadd.f32 %v2668_v51, %v2269_v8  ;;  %v12216_v42 = vld [vmem:[#allocation29_spill] sm:$0xff]  ;;  %7432 = vmatmul.mubr.msk.f32.vlgmr.msra.gmra.mxu0 %vm2832_vm3, %v10111_v10  ;;  %v12219_v28 = vld [vmem:[#allocation94_spill] sm:$0xff]  ;;  %v10143_v26 = vld [vmem:[%s12005_s3 + $0x50] sm:$0xff] }
 0x1bd   : > { %v2803_v43 = vadd.f32 %v10005_v2, %v2778_v21  ;;  %v12217_v58 = vmax.f32 %v12215_v53, %v12216_v42  ;;  %v2746_v29 = vadd.f32 %v7397_v16, %v2284_v6  ;;  %7483 = vmatmul.mubr.msk.f32.vlgmr.msra.gmra.mxu1 %vm2832_vm3, %v10111_v10  ;;  %v2294_v62 = vadd.f32 %v12219_v28, %v12218_v39  ;;  %v2678_v9 = vpop.f32.mrf.mxu1  ;;  %v10148_v23 = vld [vmem:[%s12005_s3 + $0x170] sm:$0xff]  ;;  %v12221_v56 = vld [vmem:[#allocation66_spill] sm:$0xff]  ;;  %v10185_v16 = vld [vmem:[%s12005_s3 + $0x48] sm:$0xff] }
 0x1be   : > { %2837 = vst.msk [vmem:[#allocation2 + $0x20] sm:$0xff] %vm2832_vm3, %v2818_v38  ;;  %v2802_v36 = vadd.f32 %v10005_v2, %v2777_v57  ;;  %v2727_v21 = vadd.f32 %v10027_v27, %v10025_v63  ;;  %v2761_v59 = vmax.f32 %v2725_v4, %v2743_v13  ;;  %v12220_v41 = vmov 0.0   ;;  %7510 = vmatpush3.msk.msra.mxu0 %vm2952_vm1, %v10116_v44  ;;  %v12223_v57 = vld [vmem:[#allocation15_spill] sm:$0xff]  ;;  %v12231_v28 = vld [vmem:[#allocation72_spill] sm:$0xff] }
 0x1bf   : > { %v2821_v12 = vmax.f32 %v2803_v43, 0.0  ;;  %v2780_v60 = vmax.f32 %v12217_v58, %v2762_v19  ;;  %7434 = vmatprep.mubr.msk.f32.mxu0 %vm8513_vm2, %v12220_v41  ;;  %7485 = vmatprep.mubr.msk.f32.mxu1 %vm8513_vm2, %v12220_v41  ;;  %v2764_v8 = vmax.f32 %v2728_v52, %v2746_v29  ;;  %v2745_v1 = vadd.f32 %v2678_v9, %v2279_v30  ;;  %v7400_v43 = vpop.f32.mrf.mxu1  ;;  %v12224_v19 = vld [vmem:[#allocation32_spill] sm:$0xff]  ;;  %v12230_v29 = vld [vmem:[#allocation70_spill] sm:$0xff] }
 0x1c0   : > { %v2820_v63 = vmax.f32 %v2802_v36, 0.0  ;;  %7561 = vmatpush3.msk.msra.mxu1 %vm2952_vm1, %v10121_v45  ;;  %v2289_v6 = vadd.f32 %v9861_v49, %v12221_v56  ;;  %v2730_v22 = vadd.f32 %v10047_v61, %v10032_v37  ;;  %v12222_v51 = vmax.f32 %v9937_v0, %v9923_v14  ;;  %7511 = vmatprep.subr.mxu0 %v12220_v41  ;;  %v12226_v14 = vld [vmem:[#allocation52_spill] sm:$0xff] }
 0x1c1   : > { %2840 = vst.msk [vmem:[#allocation2 + $0x38] sm:$0xff] %vm2832_vm3, %v2821_v12  ;;  %v2805_v27 = vadd.f32 %v10005_v2, %v2780_v60  ;;  %7562 = vmatprep.subr.mxu1 %v12220_v41  ;;  %v12225_v40 = vmax.f32 %v12223_v57, %v12224_v19  ;;  %v2763_v49 = vmax.f32 %v2727_v21, %v2745_v1  ;;  %v10169_v4 = vld [vmem:[#allocation2 + $0x11] ss:$2 sm:$0xff]  ;;  %v2688_v13 = vpop.f32.mrf.mxu1  ;;  %v7371_v12 = vpop.f32.mrf.mxu0 }
 0x1c2   : > { %v2779_v38 = vmax.f32 %v12222_v51, %v2761_v59  ;;  %2839 = vst.msk [vmem:[#allocation2 + $0x30] sm:$0xff] %vm2832_vm3, %v2820_v63  ;;  %v2748_v30 = vadd.f32 %v7400_v43, %v2294_v62  ;;  %7512 = vmatpush3.msra.mxu0 %v10143_v26  ;;  %7563 = vmatpush3.msra.mxu1 %v10148_v23  ;;  %v12227_v0 = vld [vmem:[#allocation84_spill] sm:$0xff]  ;;  %v12232_v63 = vld [vmem:[#allocation18_spill] sm:$0xff] }
 0x1c3   : > { %v2823_v17 = vmax.f32 %v2805_v27, 0.0  ;;  %v2782_v34 = vmax.f32 %v12225_v40, %v2764_v8  ;;  %v2154_v37 = vadd.f32 %v12227_v0, %v12226_v14  ;;  %v2729_v61 = vadd.f32 %v10073_v33, %v10053_v55  ;;  %7435 = vmatmul.mubr.msk.f32.gmra.mxu0 %vm2832_vm3, %v10169_v4  ;;  %7486 = vmatmul.mubr.msk.f32.gmra.mxu1 %vm2832_vm3, %v10169_v4  ;;  %v12229_v58 = vld [vmem:[#allocation68_spill] sm:$0xff]  ;;  %v7403_v59 = vpop.f32.mrf.mxu1  ;;  %v10227_v51 = vld [vmem:[%s12005_s3 + $0x40] sm:$0xff] }
 0x1c4   : > { %v2804_v52 = vadd.f32 %v10005_v2, %v2779_v38  ;;  %v12228_v55 = vmax.f32 %v9942_v48, %v9926_v11  ;;  %v2766_v53 = vmax.f32 %v2730_v22, %v2748_v30  ;;  %v2747_v42 = vadd.f32 %v2688_v13, %v2289_v6  ;;  %7437 = vmatprep.mubr.msk.f32.mxu0 %vm8513_vm2, %v12220_v41  ;;  %v2553_v38 = vpop.f32.mrf.mxu0  ;;  %v12239_v13 = vld [vmem:[#allocation38_spill] sm:$0xff] }
 0x1c5   : > { %2842 = vst.msk [vmem:[#allocation2 + $0x48] sm:$0xff] %vm2832_vm3, %v2823_v17  ;;  %v2807_v36 = vadd.f32 %v10005_v2, %v2782_v34  ;;  %v2304_v60 = vadd.f32 %v9883_v35, %v12229_v58  ;;  %v2299_v39 = vadd.f32 %v9904_v46, %v12230_v29  ;;  %v2314_v62 = vadd.f32 %v9931_v5, %v12231_v28  ;;  %v10202_v11 = vld [vmem:[#allocation2 + $0x21] ss:$2 sm:$0xff]  ;;  %v2698_v22 = vpop.f32.mrf.mxu1 }
 0x1c6   : > { %v2781_v33 = vmax.f32 %v12228_v55, %v2763_v49  ;;  %v2822_v21 = vmax.f32 %v2804_v52, 0.0  ;;  %7488 = vmatprep.mubr.msk.f32.mxu1 %vm8513_vm2, %v12220_v41  ;;  %7513 = vmatprep.subr.mxu0 %v12220_v41  ;;  %v12233_v35 = vld [vmem:[#allocation35_spill] sm:$0xff]  ;;  %v2765_v46 = vmax.f32 %v2729_v61, %v2747_v42  ;;  %v2732_v1 = vadd.f32 %v10098_v15, %v10064_v47  ;;  %v12236_v17 = vld [vmem:[#allocation74_spill] sm:$0xff]  ;;  %v12238_v52 = vld [vmem:[#allocation21_spill] sm:$0xff] }
 0x1c7   : > { %v2825_v48 = vmax.f32 %v2807_v36, 0.0  ;;  %v12234_v27 = vmax.f32 %v12232_v63, %v12233_v35  ;;  %7564 = vmatprep.subr.mxu1 %v12220_v41  ;;  %7514 = vmatpush3.msra.mxu0 %v10185_v16  ;;  %v10214_v5 = vld [vmem:[%s12005_s3 + $0x168] sm:$0xff]  ;;  %v2731_v56 = vadd.f32 %v2543_v32, %v10081_v3  ;;  %v2750_v6 = vadd.f32 %v7403_v59, %v2304_v60  ;;  %v7406_v34 = vpop.f32.mrf.mxu1 }
 0x1c8   : > { %v2806_v9 = vadd.f32 %v10005_v2, %v2781_v33  ;;  %2841 = vst.msk [vmem:[#allocation2 + $0x40] sm:$0xff] %vm2832_vm3, %v2822_v21  ;;  %7438 = vmatmul.mubr.msk.f32.gmra.mxu0 %vm2832_vm3, %v10202_v11  ;;  %7489 = vmatmul.mubr.msk.f32.gmra.mxu1 %vm2832_vm3, %v10202_v11  ;;  %v12235_v15 = vmax.f32 %v9945_v31, %v9929_v25  ;;  %v10266_v33 = vld [vmem:[%s12005_s3 + $0x38] sm:$0xff] }
 0x1c9   : > { %v2784_v8 = vmax.f32 %v12234_v27, %v2766_v53  ;;  %2844 = vst.msk [vmem:[#allocation2 + $0x58] sm:$0xff] %vm2832_vm3, %v2825_v48  ;;  %v2749_v43 = vadd.f32 %v2698_v22, %v2299_v39  ;;  %7440 = vmatprep.mubr.msk.f32.mxu0 %vm8513_vm2, %v12220_v41  ;;  %7491 = vmatprep.mubr.msk.f32.mxu1 %vm8513_vm2, %v12220_v41  ;;  %v10241_v49 = vld [vmem:[#allocation2 + $0x31] ss:$2 sm:$0xff]  ;;  %v2708_v55 = vpop.f32.mrf.mxu1 }
 0x1ca   : > { %v2824_v47 = vmax.f32 %v2806_v9, 0.0  ;;  %v2783_v32 = vmax.f32 %v12235_v15, %v2765_v46  ;;  %v2309_v57 = vadd.f32 %v9955_v24, %v12236_v17  ;;  %v2734_v19 = vadd.f32 %v7371_v12, %v10091_v18  ;;  %7565 = vmatpush3.msra.mxu1 %v10214_v5  ;;  %7515 = vmatprep.subr.mxu0 %v12220_v41  ;;  %v10252_v24 = vld [vmem:[%s12005_s3 + $0x160] sm:$0xff]  ;;  %v12243_v39 = vld [vmem:[#allocation41_spill] sm:$0xff]  ;;  %v10301_v9 = vld [vmem:[%s12005_s3 + $0x30] sm:$0xff] }
 0x1cb   : > { %v2809_v3 = vadd.f32 %v10005_v2, %v2784_v8  ;;  %v2768_v40 = vmax.f32 %v2732_v1, %v2750_v6  ;;  %v2767_v30 = vmax.f32 %v2731_v56, %v2749_v43  ;;  %v2752_v14 = vadd.f32 %v7406_v34, %v2314_v62  ;;  %7566 = vmatprep.subr.mxu1 %v12220_v41  ;;  %v12237_v18 = vld [vmem:[#allocation26_spill] sm:$0xff]  ;;  %v10320_v56 = vld [vmem:[%s12005_s3 + $0x150] sm:$0xff]  ;;  %v10329_v6 = vld [vmem:[%s12005_s3 + $0x28] sm:$0xff] }
 0x1cc   : > { %2843 = vst.msk [vmem:[#allocation2 + $0x50] sm:$0xff] %vm2832_vm3, %v2824_v47  ;;  %v2808_v31 = vadd.f32 %v10005_v2, %v2783_v32  ;;  %7516 = vmatpush3.msra.mxu0 %v10227_v51  ;;  %v1659_v0 = vadd.f32 %v12237_v18, %v9881_v50  ;;  %v2733_v61 = vadd.f32 %v2553_v38, %v2154_v37  ;;  %v10342_v38 = vld [vmem:[%s12005_s3 + $0x148] sm:$0xff]  ;;  %v10354_v47 = vld [vmem:[%s12005_s3 + $0x20] sm:$0xff]  ;;  %v10374_v32 = vld [vmem:[%s12005_s3 + $0x18] sm:$0xff] }
 0x1cd   : > { %v2827_v25 = vmax.f32 %v2809_v3, 0.0  ;;  %v12240_v12 = vmax.f32 %v12238_v52, %v12239_v13  ;;  %7441 = vmatmul.mubr.msk.f32.gmra.mxu0 %vm2832_vm3, %v10241_v49  ;;  %7492 = vmatmul.mubr.msk.f32.gmra.mxu1 %vm2832_vm3, %v10241_v49  ;;  %v12241_v37 = vmax.f32 %v9950_v20, %v9953_v7  ;;  %v2770_v42 = vmax.f32 %v2734_v19, %v2752_v14  ;;  %v12242_v7 = vld [vmem:[#allocation24_spill] sm:$0xff]  ;;  %v10361_v3 = vld [vmem:[%s12005_s3 + $0x140] sm:$0xff]  ;;  %v10382_v43 = vld [vmem:[%s12005_s3 + $0x138] sm:$0xff] }
 0x1ce   : > { %v2826_v50 = vmax.f32 %v2808_v31, 0.0  ;;  %v2751_v58 = vadd.f32 %v2708_v55, %v2309_v57  ;;  %7443 = vmatprep.mubr.msk.f32.mxu0 %vm8513_vm2, %v12220_v41  ;;  %7494 = vmatprep.mubr.msk.f32.mxu1 %vm8513_vm2, %v12220_v41  ;;  %v1695_v60 = vmax.f32 %v1659_v0, %v9983_v54  ;;  %v12244_v28 = vmax.f32 %v12242_v7, %v12243_v39  ;;  %v10292_v54 = vld [vmem:[%s12005_s3 + $0x158] sm:$0xff]  ;;  %v10392_v17 = vld [vmem:[%s12005_s3 + $0x10] sm:$0xff]  ;;  %v10420_v34 = vld [vmem:[%s12005_s3 + $0x128] sm:$0xff] }
 0x1cf   : > { %v2786_v36 = vmax.f32 %v12240_v12, %v2768_v40  ;;  %2846 = vst.msk [vmem:[#allocation2 + $0x68] sm:$0xff] %vm2832_vm3, %v2827_v25  ;;  %v2785_v53 = vmax.f32 %v12241_v37, %v2767_v30  ;;  %7567 = vmatpush3.msra.mxu1 %v10252_v24  ;;  %7517 = vmatprep.subr.mxu0 %v12220_v41  ;;  %v10285_v59 = vld [vmem:[#allocation2 + $0x41] ss:$2 sm:$0xff]  ;;  %v10399_v57 = vld [vmem:[%s12005_s3 + $0x130] sm:$0xff]  ;;  %v2852_v30 = vld [vmem:[#allocation2] ss:$2 sm:$0xff] }
 0x1d0   : > { %2845 = vst.msk [vmem:[#allocation2 + $0x60] sm:$0xff] %vm2832_vm3, %v2826_v50  ;;  %v2788_v62 = vmax.f32 %v12244_v28, %v2770_v42  ;;  %v2769_v21 = vmax.f32 %v2733_v61, %v2751_v58  ;;  %7568 = vmatprep.subr.mxu1 %v12220_v41  ;;  %7518 = vmatpush3.msra.mxu0 %v10266_v33  ;;  %v10412_v40 = vld [vmem:[%s12005_s3 + $0x8] sm:$0xff]  ;;  %v10428_v25 = vld [vmem:[%s12005_s3] sm:$0xff]  ;;  %v10450_v14 = vld [vmem:[%s12005_s3 + $0x118] sm:$0x3] }
 0x1d1   : > { %v2811_v29 = vadd.f32 %v10005_v2, %v2786_v36  ;;  %v2810_v20 = vadd.f32 %v10005_v2, %v2785_v53  ;;  %7444 = vmatmul.mubr.msk.f32.gmra.mxu0 %vm2832_vm3, %v10285_v59  ;;  %7495 = vmatmul.mubr.msk.f32.gmra.mxu1 %vm2832_vm3, %v10285_v59  ;;  %v10435_v31 = vld [vmem:[%s12005_s3 + $0x120] sm:$0xff]  ;;  %v10458_v18 = vld [vmem:[%s12005_s3 + $0x238] sm:$0x3]  ;;  %v10472_v61 = vld [vmem:[%s12005_s3 + $0x110] sm:$0xff] }
 0x1d2   : > { %v2813_v35 = vadd.f32 %v10005_v2, %v2788_v62  ;;  %v2787_v27 = vmax.f32 %v1695_v60, %v2769_v21  ;;  %7446 = vmatprep.mubr.msk.f32.mxu0 %vm8513_vm2, %v12220_v41  ;;  %7497 = vmatprep.mubr.msk.f32.mxu1 %vm8513_vm2, %v12220_v41  ;;  %v2854_v0 = vld [vmem:[#allocation2 + $0x10] ss:$2 sm:$0xff]  ;;  %v2856_v13 = vld [vmem:[#allocation2 + $0x20] ss:$2 sm:$0xff] }
 0x1d3   : > { %v2829_v48 = vmax.f32 %v2811_v29, 0.0  ;;  %v2828_v63 = vmax.f32 %v2810_v20, 0.0  ;;  %v10309_v8 = vld [vmem:[#allocation2 + $0x51] ss:$2 sm:$0xff]  ;;  %7569 = vmatpush3.msra.mxu1 %v10292_v54  ;;  %7519 = vmatprep.subr.mxu0 %v12220_v41  ;;  %v10492_v12 = vld [vmem:[%s12005_s3 + $0x108] sm:$0xff]  ;;  %v10512_v50 = vld [vmem:[%s12005_s3 + $0x100] sm:$0xff] }
 0x1d4   : > { %v2831_v46 = vmax.f32 %v2813_v35, 0.0  ;;  %v2812_v1 = vadd.f32 %v10005_v2, %v2787_v27  ;;  %7570 = vmatprep.subr.mxu1 %v12220_v41  ;;  %7520 = vmatpush3.msra.mxu0 %v10301_v9  ;;  %v10480_v52 = vld [vmem:[%s12005_s3 + $0x230] sm:$0xff]  ;;  %v10500_v36 = vld [vmem:[%s12005_s3 + $0x228] sm:$0xff]  ;;  %v10520_v37 = vld [vmem:[%s12005_s3 + $0x220] sm:$0xff] }
 0x1d5   : > { %2848 = vst.msk [vmem:[#allocation2 + $0x78] sm:$0xff] %vm2832_vm3, %v2829_v48  ;;  %2847 = vst.msk [vmem:[#allocation2 + $0x70] sm:$0xff] %vm2832_vm3, %v2828_v63  ;;  %7447 = vmatmul.mubr.msk.f32.gmra.mxu0 %vm2832_vm3, %v10309_v8  ;;  %7498 = vmatmul.mubr.msk.f32.gmra.mxu1 %vm2832_vm3, %v10309_v8  ;;  %v2858_v55 = vld [vmem:[#allocation2 + $0x30] ss:$2 sm:$0xff]  ;;  %v2860_v53 = vld [vmem:[#allocation2 + $0x40] ss:$2 sm:$0xff] }
 0x1d6   : > { %2851 = vst.msk [vmem:[#allocation2 + $0x88] sm:$0x1f] %vm2850_vm4, %v2831_v46  ;;  %v2830_v2 = vmax.f32 %v2812_v1, 0.0  ;;  %7449 = vmatprep.mubr.msk.f32.mxu0 %vm8513_vm2, %v12220_v41  ;;  %7500 = vmatprep.mubr.msk.f32.mxu1 %vm8513_vm2, %v12220_v41  ;;  %v10532_v42 = vld [vmem:[%s12005_s3 + $0xf8] sm:$0xff]  ;;  %v10552_v29 = vld [vmem:[%s12005_s3 + $0xf0] sm:$0xff]  ;;  %v10570_v39 = vld [vmem:[%s12005_s3 + $0xe8] sm:$0xff] }
 0x1d7   : > { %7571 = vmatpush3.msra.mxu1 %v10320_v56  ;;  %v10336_v22 = vld [vmem:[#allocation2 + $0x61] ss:$2 sm:$0xff]  ;;  %7521 = vmatprep.subr.mxu0 %v12220_v41  ;;  %v10540_v58 = vld [vmem:[%s12005_s3 + $0x218] sm:$0xff]  ;;  %v10559_v20 = vld [vmem:[%s12005_s3 + $0x210] sm:$0xff] }
 0x1d8   : > { %2849 = vst.msk [vmem:[#allocation2 + $0x80] sm:$0xff] %vm2832_vm3, %v2830_v2  ;;  %7572 = vmatprep.subr.mxu1 %v12220_v41  ;;  %7522 = vmatpush3.msra.mxu0 %v10329_v6  ;;  %v2862_v60 = vld [vmem:[#allocation2 + $0x50] ss:$2 sm:$0xff]  ;;  %v2864_v7 = vld [vmem:[#allocation2 + $0x60] ss:$2 sm:$0xff] }
 0x1d9   : > { %7450 = vmatmul.mubr.msk.f32.gmra.mxu0 %vm2832_vm3, %v10336_v22  ;;  %7501 = vmatmul.mubr.msk.f32.gmra.mxu1 %vm2832_vm3, %v10336_v22  ;;  %v10577_v28 = vld [vmem:[%s12005_s3 + $0x208] sm:$0xff]  ;;  %v10586_v62 = vld [vmem:[%s12005_s3 + $0xe0] sm:$0xff]  ;;  %v10604_v63 = vld [vmem:[%s12005_s3 + $0xd8] sm:$0xff] }
 0x1da   : > { %7573 = vmatpush3.msra.mxu1 %v10342_v38  ;;  %7523 = vmatprep.subr.mxu0 %v12220_v41  ;;  %v10593_v21 = vld [vmem:[%s12005_s3 + $0x200] sm:$0xff]  ;;  %v10611_v35 = vld [vmem:[%s12005_s3 + $0x1f8] sm:$0xff]  ;;  %v10620_v27 = vld [vmem:[%s12005_s3 + $0xd0] sm:$0xff] }
 0x1db   : > { %7574 = vmatprep.subr.mxu1 %v12220_v41  ;;  %7452 = vmatprep.mubr.msk.f32.mxu0 %vm8513_vm2, %v12220_v41  ;;  %v10627_v46 = vld [vmem:[%s12005_s3 + $0x1f0] sm:$0xff]  ;;  %v10638_v2 = vld [vmem:[%s12005_s3 + $0xc8] sm:$0xff] }
 0x1dc   : > { %v10366_v15 = vld [vmem:[#allocation2 + $0x71] ss:$2 sm:$0xff]  ;;  %7503 = vmatprep.mubr.msk.f32.mxu1 %vm8513_vm2, %v12220_v41  ;;  %7524 = vmatpush3.msra.mxu0 %v10354_v47  ;;  %v2866_v48 = vld [vmem:[#allocation2 + $0x70] ss:$2 sm:$0xff]  ;;  %12246 = vst [vmem:[#allocation11_spill] sm:$0xff] %v10627_v46  ;;  %12247 = vst [vmem:[#allocation14_spill] sm:$0xff] %v10638_v2 }
 0x1dd   : > { %7575 = vmatpush3.msra.mxu1 %v10361_v3  ;;  %7453 = vmatmul.mubr.msk.f32.gmra.mxu0 %vm2832_vm3, %v10366_v15 }
 0x1de   : > { %7504 = vmatmul.mubr.msk.f32.gmra.mxu1 %vm2832_vm3, %v10366_v15  ;;  %7525 = vmatprep.subr.mxu0 %v12220_v41 }
 0x1df   : > { %7576 = vmatprep.subr.mxu1 %v12220_v41  ;;  %7526 = vmatpush3.msra.mxu0 %v10374_v32  ;;  %v10401_v19 = vld [vmem:[#allocation2 + $0x81] ss:$2 sm:$0x1f]  ;;  %v2868_v1 = vld [vmem:[#allocation2 + $0x80] ss:$2 sm:$0x1f] }
 0x1e0   : > { %7577 = vmatpush3.msra.mxu1 %v10382_v43  ;;  %7527 = vmatprep.subr.mxu0 %v12220_v41  ;;  %12245 = vst [vmem:[#allocation13_spill] sm:$0xff] %v10401_v19 }
 0x1e1   : > { %7578 = vmatprep.subr.mxu1 %v12220_v41  ;;  %7455 = vmatprep.mubr.msk.f32.mxu0 %vm8513_vm2, %v12220_v41 }
 0x1e2   : > { %7506 = vmatprep.mubr.msk.f32.mxu1 %vm8513_vm2, %v12220_v41  ;;  %7528 = vmatpush3.msra.mxu0 %v10392_v17 }
 0x1e3   : > { %7579 = vmatpush3.msra.mxu1 %v10399_v57  ;;  %7456 = vmatmul.mubr.msk.f32.gmra.mxu0 %vm2832_vm3, %v10401_v19 }
 0x1e4   : > { %7507 = vmatmul.mubr.msk.f32.gmra.mxu1 %vm2832_vm3, %v10401_v19  ;;  %7529 = vmatprep.subr.mxu0 %v12220_v41  ;;  %v8443_v19 = vld [vmem:[%s12005_s3 + $0x198] sm:$0xff] }
 0x1e5   : > { %7580 = vmatprep.subr.mxu1 %v12220_v41  ;;  %7530 = vmatpush3.msra.mxu0 %v10412_v40 }
 0x1e6   : > { %7581 = vmatpush3.msra.mxu1 %v10420_v34  ;;  %7531 = vmatprep.subr.mxu0 %v12220_v41 }
 0x1e7   : > { %7582 = vmatprep.subr.mxu1 %v12220_v41  ;;  %7532 = vmatpush3.msra.mxu0 %v10428_v25 }
 0x1e8   : > { %7533 = vmatprep.mubr.msk.f32.mxu0 %vm8513_vm2, %v12220_v41  ;;  %7583 = vmatpush3.msra.mxu1 %v10435_v31 }
 0x1e9   : > { %7584 = vmatprep.mubr.msk.f32.mxu1 %vm8513_vm2, %v12220_v41  ;;  %7534 = vmatmul.mubr.msk.f32.vlgmr.msra.gmra.mxu0 %vm2832_vm3, %v2852_v30 }
 0x1ea   : > { %7585 = vmatmul.mubr.msk.f32.vlgmr.msra.gmra.mxu1 %vm2832_vm3, %v2852_v30  ;;  %7536 = vmatprep.mubr.msk.f32.mxu0 %vm8513_vm2, %v12220_v41  ;;  %v10645_v30 = vld [vmem:[%s12005_s3 + $0x1e8] sm:$0xff] }
 0x1eb   : > { %7587 = vmatprep.mubr.msk.f32.mxu1 %vm8513_vm2, %v12220_v41  ;;  %7611 = vmatprep.subr.mxu0 %v12220_v41  ;;  %12248 = vst [vmem:[#allocation6_spill] sm:$0xff] %v10645_v30 }
 0x1ec   : > { %7662 = vmatprep.subr.mxu1 %v12220_v41  ;;  %7612 = vmatpush3.msk.msra.mxu0 %vm2952_vm1, %v10450_v14 }
 0x1ed   : > { %7537 = vmatmul.mubr.msk.f32.gmra.mxu0 %vm2832_vm3, %v2854_v0  ;;  %7663 = vmatpush3.msk.msra.mxu1 %vm2952_vm1, %v10458_v18 }
 0x1ee   : > { %7588 = vmatmul.mubr.msk.f32.gmra.mxu1 %vm2832_vm3, %v2854_v0  ;;  %7539 = vmatprep.mubr.msk.f32.mxu0 %vm8513_vm2, %v12220_v41  ;;  %v10652_v0 = vld [vmem:[%s12005_s3 + $0xc0] sm:$0xff] }
 0x1ef   : > { %7590 = vmatprep.mubr.msk.f32.mxu1 %vm8513_vm2, %v12220_v41  ;;  %7613 = vmatprep.subr.mxu0 %v12220_v41  ;;  %12249 = vst [vmem:[#allocation16_spill] sm:$0xff] %v10652_v0 }
 0x1f0   : > { %7664 = vmatprep.subr.mxu1 %v12220_v41  ;;  %7614 = vmatpush3.msra.mxu0 %v10472_v61 }
 0x1f1   : > { %7540 = vmatmul.mubr.msk.f32.gmra.mxu0 %vm2832_vm3, %v2856_v13  ;;  %7665 = vmatpush3.msra.mxu1 %v10480_v52 }
 0x1f2   : > { %7591 = vmatmul.mubr.msk.f32.gmra.mxu1 %vm2832_vm3, %v2856_v13  ;;  %7542 = vmatprep.mubr.msk.f32.mxu0 %vm8513_vm2, %v12220_v41  ;;  %v10659_v13 = vld [vmem:[%s12005_s3 + $0x1e0] sm:$0xff] }
 0x1f3   : > { %7593 = vmatprep.mubr.msk.f32.mxu1 %vm8513_vm2, %v12220_v41  ;;  %7615 = vmatprep.subr.mxu0 %v12220_v41  ;;  %12250 = vst [vmem:[#allocation17_spill] sm:$0xff] %v10659_v13 }
 0x1f4   : > { %7666 = vmatprep.subr.mxu1 %v12220_v41  ;;  %7616 = vmatpush3.msra.mxu0 %v10492_v12 }
 0x1f5   : > { %7543 = vmatmul.mubr.msk.f32.gmra.mxu0 %vm2832_vm3, %v2858_v55  ;;  %7667 = vmatpush3.msra.mxu1 %v10500_v36 }
 0x1f6   : > { %7594 = vmatmul.mubr.msk.f32.gmra.mxu1 %vm2832_vm3, %v2858_v55  ;;  %7545 = vmatprep.mubr.msk.f32.mxu0 %vm8513_vm2, %v12220_v41  ;;  %v10668_v55 = vld [vmem:[#allocation2 + $0x2] ss:$2 sm:$0xff] }
 0x1f7   : > { %7596 = vmatprep.mubr.msk.f32.mxu1 %vm8513_vm2, %v12220_v41  ;;  %7617 = vmatprep.subr.mxu0 %v12220_v41 }
 0x1f8   : > { %7668 = vmatprep.subr.mxu1 %v12220_v41  ;;  %7618 = vmatpush3.msra.mxu0 %v10512_v50 }
 0x1f9   : > { %7546 = vmatmul.mubr.msk.f32.gmra.mxu0 %vm2832_vm3, %v2860_v53  ;;  %7669 = vmatpush3.msra.mxu1 %v10520_v37 }
 0x1fa   : > { %7597 = vmatmul.mubr.msk.f32.gmra.mxu1 %vm2832_vm3, %v2860_v53  ;;  %7548 = vmatprep.mubr.msk.f32.mxu0 %vm8513_vm2, %v12220_v41  ;;  %v10681_v53 = vld [vmem:[#allocation2 + $0x12] ss:$2 sm:$0xff] }
 0x1fb   : > { %7599 = vmatprep.mubr.msk.f32.mxu1 %vm8513_vm2, %v12220_v41  ;;  %7619 = vmatprep.subr.mxu0 %v12220_v41 }
 0x1fc   : > { %7670 = vmatprep.subr.mxu1 %v12220_v41  ;;  %7620 = vmatpush3.msra.mxu0 %v10532_v42 }
 0x1fd   : > { %7549 = vmatmul.mubr.msk.f32.gmra.mxu0 %vm2832_vm3, %v2862_v60  ;;  %7671 = vmatpush3.msra.mxu1 %v10540_v58 }
 0x1fe   : > { %7600 = vmatmul.mubr.msk.f32.gmra.mxu1 %vm2832_vm3, %v2862_v60  ;;  %7621 = vmatprep.subr.mxu0 %v12220_v41  ;;  %v8426_v60 = vld [vmem:[%s12005_s3 + $0xb8] sm:$0x3] }
 0x1ff   : > { %7672 = vmatprep.subr.mxu1 %v12220_v41  ;;  %7551 = vmatprep.mubr.msk.f32.mxu0 %vm8513_vm2, %v12220_v41 }
 0x200   : > { %7602 = vmatprep.mubr.msk.f32.mxu1 %vm8513_vm2, %v12220_v41  ;;  %7622 = vmatpush3.msra.mxu0 %v10552_v29 }
 0x201   : > { %7673 = vmatpush3.msra.mxu1 %v10559_v20  ;;  %7552 = vmatmul.mubr.msk.f32.gmra.mxu0 %vm2832_vm3, %v2864_v7 }
 0x202   : > { %7603 = vmatmul.mubr.msk.f32.gmra.mxu1 %vm2832_vm3, %v2864_v7  ;;  %7623 = vmatprep.subr.mxu0 %v12220_v41  ;;  %v8427_v7 = vld [vmem:[%s12005_s3 + $0x1d8] sm:$0x3] }
 0x203   : > { %7674 = vmatprep.subr.mxu1 %v12220_v41  ;;  %7624 = vmatpush3.msra.mxu0 %v10570_v39 }
 0x204   : > { %7675 = vmatpush3.msra.mxu1 %v10577_v28  ;;  %7625 = vmatprep.subr.mxu0 %v12220_v41 }
 0x205   : > { %7676 = vmatprep.subr.mxu1 %v12220_v41  ;;  %7554 = vmatprep.mubr.msk.f32.mxu0 %vm8513_vm2, %v12220_v41 }
 0x206   : > { %7605 = vmatprep.mubr.msk.f32.mxu1 %vm8513_vm2, %v12220_v41  ;;  %7626 = vmatpush3.msra.mxu0 %v10586_v62 }
 0x207   : > { %7677 = vmatpush3.msra.mxu1 %v10593_v21  ;;  %7555 = vmatmul.mubr.msk.f32.gmra.mxu0 %vm2832_vm3, %v2866_v48 }
 0x208   : > { %7606 = vmatmul.mubr.msk.f32.gmra.mxu1 %vm2832_vm3, %v2866_v48  ;;  %7627 = vmatprep.subr.mxu0 %v12220_v41  ;;  %v10701_v48 = vld [vmem:[#allocation2 + $0x22] ss:$2 sm:$0xff] }
 0x209   : > { %7678 = vmatprep.subr.mxu1 %v12220_v41  ;;  %7628 = vmatpush3.msra.mxu0 %v10604_v63 }
 0x20a   : > { %7679 = vmatpush3.msra.mxu1 %v10611_v35  ;;  %7629 = vmatprep.subr.mxu0 %v12220_v41 }
 0x20b   : > { %7680 = vmatprep.subr.mxu1 %v12220_v41  ;;  %7557 = vmatprep.mubr.msk.f32.mxu0 %vm8513_vm2, %v12220_v41 }
 0x20c   : > { %7608 = vmatprep.mubr.msk.f32.mxu1 %vm8513_vm2, %v12220_v41  ;;  %7630 = vmatpush3.msra.mxu0 %v10620_v27 }
 0x20d   : > { %7681 = vmatpush3.msra.mxu1 %v10627_v46  ;;  %7558 = vmatmul.mubr.msk.f32.gmra.mxu0 %vm2832_vm3, %v2868_v1  ;;  %v8447_v46 = vld [vmem:[%s12005_s3 + $0x188] sm:$0xff] }
 0x20e   : > { %7609 = vmatmul.mubr.msk.f32.gmra.mxu1 %vm2832_vm3, %v2868_v1  ;;  %7631 = vmatprep.subr.mxu0 %v12220_v41  ;;  %v8428_v1 = vld [vmem:[%s12005_s3 + $0xb0] sm:$0xff] }
 0x20f   : > { %7682 = vmatprep.subr.mxu1 %v12220_v41  ;;  %7632 = vmatpush3.msra.mxu0 %v10638_v2  ;;  %v8439_v2 = vld [vmem:[%s12005_s3 + $0x1a8] sm:$0xff] }
 0x210   : > { %7683 = vmatpush3.msra.mxu1 %v10645_v30  ;;  %7633 = vmatprep.subr.mxu0 %v12220_v41  ;;  %v10777_v30 = vld [vmem:[#allocation2 + $0x62] ss:$2 sm:$0xff] }
 0x211   : > { %7684 = vmatprep.subr.mxu1 %v12220_v41  ;;  %7634 = vmatpush3.msra.mxu0 %v10652_v0  ;;  %v8434_v0 = vld [vmem:[%s12005_s3 + $0x98] sm:$0xff] }
 0x212   : > { %7635 = vmatprep.mubr.msk.f32.mxu0 %vm8513_vm2, %v12220_v41  ;;  %7685 = vmatpush3.msra.mxu1 %v10659_v13  ;;  %v8432_v13 = vld [vmem:[%s12005_s3 + $0xa0] sm:$0xff] }
 0x213   : > { %7686 = vmatprep.mubr.msk.f32.mxu1 %vm8513_vm2, %v12220_v41  ;;  %7636 = vmatmul.mubr.msk.f32.vlgmr.msra.gmra.mxu0 %vm2832_vm3, %v10668_v55 }
 0x214   : > { %7687 = vmatmul.mubr.msk.f32.vlgmr.msra.gmra.mxu1 %vm2832_vm3, %v10668_v55  ;;  %7638 = vmatprep.mubr.msk.f32.mxu0 %vm8513_vm2, %v12220_v41 }
 0x215   : > { %7689 = vmatprep.mubr.msk.f32.mxu1 %vm8513_vm2, %v12220_v41  ;;  %7713 = vmatprep.subr.mxu0 %v12220_v41 }
 0x216   : > { %7764 = vmatprep.subr.mxu1 %v12220_v41  ;;  %7714 = vmatpush3.msk.msra.mxu0 %vm2952_vm1, %v8426_v60  ;;  %v8429_v60 = vld [vmem:[%s12005_s3 + $0x1d0] sm:$0xff] }
 0x217   : > { %7639 = vmatmul.mubr.msk.f32.gmra.mxu0 %vm2832_vm3, %v10681_v53  ;;  %7765 = vmatpush3.msk.msra.mxu1 %vm2952_vm1, %v8427_v7  ;;  %v10719_v7 = vld [vmem:[#allocation2 + $0x32] ss:$2 sm:$0xff] }
 0x218   : > { %7690 = vmatmul.mubr.msk.f32.gmra.mxu1 %vm2832_vm3, %v10681_v53  ;;  %7641 = vmatprep.mubr.msk.f32.mxu0 %vm8513_vm2, %v12220_v41 }
 0x219   : > { %7692 = vmatprep.mubr.msk.f32.mxu1 %vm8513_vm2, %v12220_v41  ;;  %7715 = vmatprep.subr.mxu0 %v12220_v41 }
 0x21a   : > { %7766 = vmatprep.subr.mxu1 %v12220_v41  ;;  %7716 = vmatpush3.msra.mxu0 %v8428_v1  ;;  %v8430_v1 = vld [vmem:[%s12005_s3 + $0xa8] sm:$0xff] }
 0x21b   : > { %7642 = vmatmul.mubr.msk.f32.gmra.mxu0 %vm2832_vm3, %v10701_v48  ;;  %7767 = vmatpush3.msra.mxu1 %v8429_v60  ;;  %v8431_v60 = vld [vmem:[%s12005_s3 + $0x1c8] sm:$0xff] }
 0x21c   : > { %7693 = vmatmul.mubr.msk.f32.gmra.mxu1 %vm2832_vm3, %v10701_v48  ;;  %7644 = vmatprep.mubr.msk.f32.mxu0 %vm8513_vm2, %v12220_v41 }
 0x21d   : > { %7695 = vmatprep.mubr.msk.f32.mxu1 %vm8513_vm2, %v12220_v41  ;;  %7717 = vmatprep.subr.mxu0 %v12220_v41 }
 0x21e   : > { %7768 = vmatprep.subr.mxu1 %v12220_v41  ;;  %7718 = vmatpush3.msra.mxu0 %v8430_v1  ;;  %v10737_v1 = vld [vmem:[#allocation2 + $0x42] ss:$2 sm:$0xff] }
 0x21f   : > { %7645 = vmatmul.mubr.msk.f32.gmra.mxu0 %vm2832_vm3, %v10719_v7  ;;  %7769 = vmatpush3.msra.mxu1 %v8431_v60  ;;  %v8433_v60 = vld [vmem:[%s12005_s3 + $0x1c0] sm:$0xff] }
 0x220   : > { %7696 = vmatmul.mubr.msk.f32.gmra.mxu1 %vm2832_vm3, %v10719_v7  ;;  %7647 = vmatprep.mubr.msk.f32.mxu0 %vm8513_vm2, %v12220_v41 }
 0x221   : > { %7698 = vmatprep.mubr.msk.f32.mxu1 %vm8513_vm2, %v12220_v41  ;;  %7719 = vmatprep.subr.mxu0 %v12220_v41 }
 0x222   : > { %7770 = vmatprep.subr.mxu1 %v12220_v41  ;;  %7720 = vmatpush3.msra.mxu0 %v8432_v13  ;;  %v10755_v13 = vld [vmem:[#allocation2 + $0x52] ss:$2 sm:$0xff] }
 0x223   : > { %7648 = vmatmul.mubr.msk.f32.gmra.mxu0 %vm2832_vm3, %v10737_v1  ;;  %7771 = vmatpush3.msra.mxu1 %v8433_v60  ;;  %v8435_v60 = vld [vmem:[%s12005_s3 + $0x1b8] sm:$0xff] }
 0x224   : > { %7699 = vmatmul.mubr.msk.f32.gmra.mxu1 %vm2832_vm3, %v10737_v1  ;;  %7650 = vmatprep.mubr.msk.f32.mxu0 %vm8513_vm2, %v12220_v41 }
 0x225   : > { %7701 = vmatprep.mubr.msk.f32.mxu1 %vm8513_vm2, %v12220_v41  ;;  %7721 = vmatprep.subr.mxu0 %v12220_v41 }
 0x226   : > { %7772 = vmatprep.subr.mxu1 %v12220_v41  ;;  %7722 = vmatpush3.msra.mxu0 %v8434_v0  ;;  %v8436_v0 = vld [vmem:[%s12005_s3 + $0x90] sm:$0xff] }
 0x227   : > { %7651 = vmatmul.mubr.msk.f32.gmra.mxu0 %vm2832_vm3, %v10755_v13  ;;  %7773 = vmatpush3.msra.mxu1 %v8435_v60  ;;  %v8437_v60 = vld [vmem:[%s12005_s3 + $0x1b0] sm:$0xff] }
 0x228   : > { %7702 = vmatmul.mubr.msk.f32.gmra.mxu1 %vm2832_vm3, %v10755_v13  ;;  %7723 = vmatprep.subr.mxu0 %v12220_v41 }
 0x229   : > { %7774 = vmatprep.subr.mxu1 %v12220_v41  ;;  %7653 = vmatprep.mubr.msk.f32.mxu0 %vm8513_vm2, %v12220_v41 }
 0x22a   : > { %7704 = vmatprep.mubr.msk.f32.mxu1 %vm8513_vm2, %v12220_v41  ;;  %7724 = vmatpush3.msra.mxu0 %v8436_v0  ;;  %v8438_v0 = vld [vmem:[%s12005_s3 + $0x88] sm:$0xff] }
 0x22b   : > { %7775 = vmatpush3.msra.mxu1 %v8437_v60  ;;  %7654 = vmatmul.mubr.msk.f32.gmra.mxu0 %vm2832_vm3, %v10777_v30  ;;  %v8440_v60 = vld [vmem:[%s12005_s3 + $0x80] sm:$0xff] }
 0x22c   : > { %7705 = vmatmul.mubr.msk.f32.gmra.mxu1 %vm2832_vm3, %v10777_v30  ;;  %7725 = vmatprep.subr.mxu0 %v12220_v41 }
 0x22d   : > { %7776 = vmatprep.subr.mxu1 %v12220_v41  ;;  %7726 = vmatpush3.msra.mxu0 %v8438_v0  ;;  %v10803_v0 = vld [vmem:[#allocation2 + $0x72] ss:$2 sm:$0xff] }
 0x22e   : > { %7777 = vmatpush3.msra.mxu1 %v8439_v2  ;;  %7727 = vmatprep.subr.mxu0 %v12220_v41  ;;  %v8441_v2 = vld [vmem:[%s12005_s3 + $0x1a0] sm:$0xff] }
 0x22f   : > { %7778 = vmatprep.subr.mxu1 %v12220_v41  ;;  %7656 = vmatprep.mubr.msk.f32.mxu0 %vm8513_vm2, %v12220_v41 }
 0x230   : > { %7707 = vmatprep.mubr.msk.f32.mxu1 %vm8513_vm2, %v12220_v41  ;;  %7728 = vmatpush3.msra.mxu0 %v8440_v60  ;;  %v8442_v60 = vld [vmem:[%s12005_s3 + $0x78] sm:$0xff] }
 0x231   : > { %7779 = vmatpush3.msra.mxu1 %v8441_v2  ;;  %7657 = vmatmul.mubr.msk.f32.gmra.mxu0 %vm2832_vm3, %v10803_v0  ;;  %v8444_v2 = vld [vmem:[%s12005_s3 + $0x70] sm:$0xff] }
 0x232   : > { %7708 = vmatmul.mubr.msk.f32.gmra.mxu1 %vm2832_vm3, %v10803_v0  ;;  %7729 = vmatprep.subr.mxu0 %v12220_v41 }
 0x233   : > { %7780 = vmatprep.subr.mxu1 %v12220_v41  ;;  %7730 = vmatpush3.msra.mxu0 %v8442_v60  ;;  %v10829_v60 = vld [vmem:[#allocation2 + $0x82] ss:$2 sm:$0x1f] }
 0x234   : > { %7781 = vmatpush3.msra.mxu1 %v8443_v19  ;;  %7731 = vmatprep.subr.mxu0 %v12220_v41  ;;  %v8445_v19 = vld [vmem:[%s12005_s3 + $0x190] sm:$0xff] }
 0x235   : > { %7782 = vmatprep.subr.mxu1 %v12220_v41  ;;  %7659 = vmatprep.mubr.msk.f32.mxu0 %vm8513_vm2, %v12220_v41 }
 0x236   : > { %7710 = vmatprep.mubr.msk.f32.mxu1 %vm8513_vm2, %v12220_v41  ;;  %7732 = vmatpush3.msra.mxu0 %v8444_v2  ;;  %v8446_v2 = vld [vmem:[%s12005_s3 + $0x68] sm:$0xff] }
 0x237   : > { %7783 = vmatpush3.msra.mxu1 %v8445_v19  ;;  %7660 = vmatmul.mubr.msk.f32.gmra.mxu0 %vm2832_vm3, %v10829_v60  ;;  %v8448_v19 = vld [vmem:[%s12005_s3 + $0x60] sm:$0xff] }
 0x238   : > { %7711 = vmatmul.mubr.msk.f32.gmra.mxu1 %vm2832_vm3, %v10829_v60  ;;  %7733 = vmatprep.subr.mxu0 %v12220_v41 }
 0x239   : > { %7784 = vmatprep.subr.mxu1 %v12220_v41  ;;  %7734 = vmatpush3.msra.mxu0 %v8446_v2  ;;  %v8449_v2 = vld [vmem:[%s12005_s3 + $0x180] sm:$0xff] }
 0x23a   : > { %7785 = vmatpush3.msra.mxu1 %v8447_v46  ;;  %7735 = vmatprep.subr.mxu0 %v12220_v41 }
 0x23b   : > { %7786 = vmatprep.subr.mxu1 %v12220_v41  ;;  %7736 = vmatpush3.msra.mxu0 %v8448_v19  ;;  %v4226_v19 = vld [vmem:[#allocation2 + $0x83] ss:$2 sm:$0x1f] }
 0x23c   : > { %7737 = vmatprep.mubr.msk.f32.mxu0 %vm8513_vm2, %v12220_v41  ;;  %7787 = vmatpush3.msra.mxu1 %v8449_v2 }
 0x23d   : > { %7788 = vmatprep.mubr.msk.f32.mxu1 %vm8513_vm2, %v12220_v41  ;;  %7738 = vmatmul.mubr.msk.f32.vlgmr.msra.gmra.mxu0 %vm2832_vm3, %v10668_v55 }
 0x23e   : > { %7789 = vmatmul.mubr.msk.f32.vlgmr.msra.gmra.mxu1 %vm2832_vm3, %v10668_v55  ;;  %7740 = vmatprep.mubr.msk.f32.mxu0 %vm8513_vm2, %v12220_v41 }
 0x23f   : > { %7791 = vmatprep.mubr.msk.f32.mxu1 %vm8513_vm2, %v12220_v41  ;;  %7815 = vmatprep.subr.mxu0 %v12220_v41 }
 0x240   : > { %7866 = vmatprep.subr.mxu1 %v12220_v41  ;;  %7816 = vmatpush3.msk.msra.mxu0 %vm2952_vm1, %v10116_v44 }
 0x241   : > { %7741 = vmatmul.mubr.msk.f32.gmra.mxu0 %vm2832_vm3, %v10681_v53  ;;  %7867 = vmatpush3.msk.msra.mxu1 %vm2952_vm1, %v10121_v45 }
 0x242   : > { %7792 = vmatmul.mubr.msk.f32.gmra.mxu1 %vm2832_vm3, %v10681_v53  ;;  %7743 = vmatprep.mubr.msk.f32.mxu0 %vm8513_vm2, %v12220_v41  ;;  %v4224_v53 = vld [vmem:[#allocation2 + $0x73] ss:$2 sm:$0xff] }
 0x243   : > { %7794 = vmatprep.mubr.msk.f32.mxu1 %vm8513_vm2, %v12220_v41  ;;  %7817 = vmatprep.subr.mxu0 %v12220_v41 }
 0x244   : > { %7868 = vmatprep.subr.mxu1 %v12220_v41  ;;  %7818 = vmatpush3.msra.mxu0 %v10143_v26 }
 0x245   : > { %7744 = vmatmul.mubr.msk.f32.gmra.mxu0 %vm2832_vm3, %v10701_v48  ;;  %7869 = vmatpush3.msra.mxu1 %v10148_v23 }
 0x246   : > { %7795 = vmatmul.mubr.msk.f32.gmra.mxu1 %vm2832_vm3, %v10701_v48  ;;  %7746 = vmatprep.mubr.msk.f32.mxu0 %vm8513_vm2, %v12220_v41 }
 0x247   : > { %7797 = vmatprep.mubr.msk.f32.mxu1 %vm8513_vm2, %v12220_v41  ;;  %7819 = vmatprep.subr.mxu0 %v12220_v41 }
 0x248   : > { %7870 = vmatprep.subr.mxu1 %v12220_v41  ;;  %7820 = vmatpush3.msra.mxu0 %v10185_v16 }
 0x249   : > { %7747 = vmatmul.mubr.msk.f32.gmra.mxu0 %vm2832_vm3, %v10719_v7  ;;  %7871 = vmatpush3.msra.mxu1 %v10214_v5 }
 0x24a   : > { %7798 = vmatmul.mubr.msk.f32.gmra.mxu1 %vm2832_vm3, %v10719_v7  ;;  %7749 = vmatprep.mubr.msk.f32.mxu0 %vm8513_vm2, %v12220_v41 }
 0x24b   : > { %7800 = vmatprep.mubr.msk.f32.mxu1 %vm8513_vm2, %v12220_v41  ;;  %7821 = vmatprep.subr.mxu0 %v12220_v41 }
 0x24c   : > { %7872 = vmatprep.subr.mxu1 %v12220_v41  ;;  %7822 = vmatpush3.msra.mxu0 %v10227_v51 }
 0x24d   : > { %7750 = vmatmul.mubr.msk.f32.gmra.mxu0 %vm2832_vm3, %v10737_v1  ;;  %7873 = vmatpush3.msra.mxu1 %v10252_v24  ;;  %v12252_v24 = vld [vmem:[#allocation13_spill] sm:$0xff] }
 0x24e   : > { %7801 = vmatmul.mubr.msk.f32.gmra.mxu1 %vm2832_vm3, %v10737_v1  ;;  %7752 = vmatprep.mubr.msk.f32.mxu0 %vm8513_vm2, %v12220_v41 }
 0x24f   : > { %7803 = vmatprep.mubr.msk.f32.mxu1 %vm8513_vm2, %v12220_v41  ;;  %7823 = vmatprep.subr.mxu0 %v12220_v41 }
 0x250   : > { %7874 = vmatprep.subr.mxu1 %v12220_v41  ;;  %7824 = vmatpush3.msra.mxu0 %v10266_v33 }
 0x251   : > { %7753 = vmatmul.mubr.msk.f32.gmra.mxu0 %vm2832_vm3, %v10755_v13  ;;  %7875 = vmatpush3.msra.mxu1 %v10292_v54  ;;  %v12253_v54 = vld [vmem:[#allocation14_spill] sm:$0xff] }
 0x252   : > { %7804 = vmatmul.mubr.msk.f32.gmra.mxu1 %vm2832_vm3, %v10755_v13  ;;  %7825 = vmatprep.subr.mxu0 %v12220_v41 }
 0x253   : > { %7876 = vmatprep.subr.mxu1 %v12220_v41  ;;  %7755 = vmatprep.mubr.msk.f32.mxu0 %vm8513_vm2, %v12220_v41 }
 0x254   : > { %7806 = vmatprep.mubr.msk.f32.mxu1 %vm8513_vm2, %v12220_v41  ;;  %7826 = vmatpush3.msra.mxu0 %v10301_v9 }
 0x255   : > { %7877 = vmatpush3.msra.mxu1 %v10320_v56  ;;  %7756 = vmatmul.mubr.msk.f32.gmra.mxu0 %vm2832_vm3, %v10777_v30  ;;  %v12254_v56 = vld [vmem:[#allocation6_spill] sm:$0xff] }
 0x256   : > { %7807 = vmatmul.mubr.msk.f32.gmra.mxu1 %vm2832_vm3, %v10777_v30  ;;  %7827 = vmatprep.subr.mxu0 %v12220_v41 }
 0x257   : > { %7878 = vmatprep.subr.mxu1 %v12220_v41  ;;  %7828 = vmatpush3.msra.mxu0 %v10329_v6  ;;  %v12255_v6 = vld [vmem:[#allocation16_spill] sm:$0xff] }
 0x258   : > { %7879 = vmatpush3.msra.mxu1 %v10342_v38  ;;  %7829 = vmatprep.subr.mxu0 %v12220_v41 }
 0x259   : > { %7880 = vmatprep.subr.mxu1 %v12220_v41  ;;  %7758 = vmatprep.mubr.msk.f32.mxu0 %vm8513_vm2, %v12220_v41 }
 0x25a   : > { %7809 = vmatprep.mubr.msk.f32.mxu1 %vm8513_vm2, %v12220_v41  ;;  %7830 = vmatpush3.msra.mxu0 %v10354_v47  ;;  %v12256_v47 = vld [vmem:[#allocation17_spill] sm:$0xff] }
 0x25b   : > { %7881 = vmatpush3.msra.mxu1 %v10361_v3  ;;  %7759 = vmatmul.mubr.msk.f32.gmra.mxu0 %vm2832_vm3, %v10803_v0  ;;  %v4210_v3 = vld [vmem:[#allocation2 + $0x3] ss:$2 sm:$0xff] }
 0x25c   : > { %7810 = vmatmul.mubr.msk.f32.gmra.mxu1 %vm2832_vm3, %v10803_v0  ;;  %7831 = vmatprep.subr.mxu0 %v12220_v41 }
 0x25d   : > { %7882 = vmatprep.subr.mxu1 %v12220_v41  ;;  %7832 = vmatpush3.msra.mxu0 %v10374_v32 }
 0x25e   : > { %7883 = vmatpush3.msra.mxu1 %v10382_v43  ;;  %7833 = vmatprep.subr.mxu0 %v12220_v41 }
 0x25f   : > { %7884 = vmatprep.subr.mxu1 %v12220_v41  ;;  %7761 = vmatprep.mubr.msk.f32.mxu0 %vm8513_vm2, %v12220_v41 }
 0x260   : > { %7812 = vmatprep.mubr.msk.f32.mxu1 %vm8513_vm2, %v12220_v41  ;;  %7834 = vmatpush3.msra.mxu0 %v10392_v17 }
 0x261   : > { %7885 = vmatpush3.msra.mxu1 %v10399_v57  ;;  %7762 = vmatmul.mubr.msk.f32.gmra.mxu0 %vm2832_vm3, %v10829_v60  ;;  %v4212_v57 = vld [vmem:[#allocation2 + $0x13] ss:$2 sm:$0xff] }
 0x262   : > { %7813 = vmatmul.mubr.msk.f32.gmra.mxu1 %vm2832_vm3, %v10829_v60  ;;  %7835 = vmatprep.subr.mxu0 %v12220_v41 }
 0x263   : > { %7886 = vmatprep.subr.mxu1 %v12220_v41  ;;  %7836 = vmatpush3.msra.mxu0 %v10412_v40 }
 0x264   : > { %7887 = vmatpush3.msra.mxu1 %v10420_v34  ;;  %7837 = vmatprep.subr.mxu0 %v12220_v41 }
 0x265   : > { %7888 = vmatprep.subr.mxu1 %v12220_v41  ;;  %7838 = vmatpush3.msra.mxu0 %v10428_v25 }
 0x266   : > { %7839 = vmatprep.mubr.msk.f32.mxu0 %vm8513_vm2, %v12220_v41  ;;  %7889 = vmatpush3.msra.mxu1 %v10435_v31 }
 0x267   : > { %7890 = vmatprep.mubr.msk.f32.mxu1 %vm8513_vm2, %v12220_v41  ;;  %7840 = vmatmul.mubr.msk.f32.vlgmr.msra.gmra.mxu0 %vm2832_vm3, %v10111_v10 }
 0x268   : > { %7891 = vmatmul.mubr.msk.f32.vlgmr.msra.gmra.mxu1 %vm2832_vm3, %v10111_v10  ;;  %7842 = vmatprep.mubr.msk.f32.mxu0 %vm8513_vm2, %v12220_v41 }
 0x269   : > { %7893 = vmatprep.mubr.msk.f32.mxu1 %vm8513_vm2, %v12220_v41  ;;  %7917 = vmatprep.subr.mxu0 %v12220_v41 }
 0x26a   : > { %7968 = vmatprep.subr.mxu1 %v12220_v41  ;;  %7918 = vmatpush3.msk.msra.mxu0 %vm2952_vm1, %v10450_v14  ;;  %v4214_v14 = vld [vmem:[#allocation2 + $0x23] ss:$2 sm:$0xff] }
 0x26b   : > { %7843 = vmatmul.mubr.msk.f32.gmra.mxu0 %vm2832_vm3, %v10169_v4  ;;  %7969 = vmatpush3.msk.msra.mxu1 %vm2952_vm1, %v10458_v18 }
 0x26c   : > { %7894 = vmatmul.mubr.msk.f32.gmra.mxu1 %vm2832_vm3, %v10169_v4  ;;  %7845 = vmatprep.mubr.msk.f32.mxu0 %vm8513_vm2, %v12220_v41 }
 0x26d   : > { %7896 = vmatprep.mubr.msk.f32.mxu1 %vm8513_vm2, %v12220_v41  ;;  %7919 = vmatprep.subr.mxu0 %v12220_v41 }
 0x26e   : > { %7970 = vmatprep.subr.mxu1 %v12220_v41  ;;  %7920 = vmatpush3.msra.mxu0 %v10472_v61 }
 0x26f   : > { %7846 = vmatmul.mubr.msk.f32.gmra.mxu0 %vm2832_vm3, %v10202_v11  ;;  %7971 = vmatpush3.msra.mxu1 %v10480_v52 }
 0x270   : > { %7897 = vmatmul.mubr.msk.f32.gmra.mxu1 %vm2832_vm3, %v10202_v11  ;;  %7848 = vmatprep.mubr.msk.f32.mxu0 %vm8513_vm2, %v12220_v41 }
 0x271   : > { %7899 = vmatprep.mubr.msk.f32.mxu1 %vm8513_vm2, %v12220_v41  ;;  %7921 = vmatprep.subr.mxu0 %v12220_v41 }
 0x272   : > { %7972 = vmatprep.subr.mxu1 %v12220_v41  ;;  %7922 = vmatpush3.msra.mxu0 %v10492_v12 }
 0x273   : > { %7849 = vmatmul.mubr.msk.f32.gmra.mxu0 %vm2832_vm3, %v10241_v49  ;;  %7973 = vmatpush3.msra.mxu1 %v10500_v36  ;;  %v4216_v36 = vld [vmem:[#allocation2 + $0x33] ss:$2 sm:$0xff] }
 0x274   : > { %7900 = vmatmul.mubr.msk.f32.gmra.mxu1 %vm2832_vm3, %v10241_v49  ;;  %7851 = vmatprep.mubr.msk.f32.mxu0 %vm8513_vm2, %v12220_v41  ;;  %v12251_v49 = vld [vmem:[#allocation11_spill] sm:$0xff] }
 0x275   : > { %7902 = vmatprep.mubr.msk.f32.mxu1 %vm8513_vm2, %v12220_v41  ;;  %7923 = vmatprep.subr.mxu0 %v12220_v41 }
 0x276   : > { %7974 = vmatprep.subr.mxu1 %v12220_v41  ;;  %7924 = vmatpush3.msra.mxu0 %v10512_v50 }
 0x277   : > { %7852 = vmatmul.mubr.msk.f32.gmra.mxu0 %vm2832_vm3, %v10285_v59  ;;  %7975 = vmatpush3.msra.mxu1 %v10520_v37 }
 0x278   : > { %7903 = vmatmul.mubr.msk.f32.gmra.mxu1 %vm2832_vm3, %v10285_v59  ;;  %7854 = vmatprep.mubr.msk.f32.mxu0 %vm8513_vm2, %v12220_v41 }
 0x279   : > { %7905 = vmatprep.mubr.msk.f32.mxu1 %vm8513_vm2, %v12220_v41  ;;  %7925 = vmatprep.subr.mxu0 %v12220_v41 }
 0x27a   : > { %7976 = vmatprep.subr.mxu1 %v12220_v41  ;;  %7926 = vmatpush3.msra.mxu0 %v10532_v42 }
 0x27b   : > { %7855 = vmatmul.mubr.msk.f32.gmra.mxu0 %vm2832_vm3, %v10309_v8  ;;  %7977 = vmatpush3.msra.mxu1 %v10540_v58  ;;  %v4218_v58 = vld [vmem:[#allocation2 + $0x43] ss:$2 sm:$0xff] }
 0x27c   : > { %7906 = vmatmul.mubr.msk.f32.gmra.mxu1 %vm2832_vm3, %v10309_v8  ;;  %7927 = vmatprep.subr.mxu0 %v12220_v41  ;;  %v11059_v10 = vpop.f32.mrf.mxu0 }
 0x27d   : > { %7978 = vmatprep.subr.mxu1 %v12220_v41  ;;  %7857 = vmatprep.mubr.msk.f32.mxu0 %vm8513_vm2, %v12220_v41  ;;  %v11061_v44 = vpop.f32.mrf.mxu1 }
 0x27e   : > { %7908 = vmatprep.mubr.msk.f32.mxu1 %vm8513_vm2, %v12220_v41  ;;  %7928 = vmatpush3.msra.mxu0 %v10552_v29  ;;  %v7433_v45 = vpop.f32.mrf.mxu0 }
 0x27f   : > { %7979 = vmatpush3.msra.mxu1 %v10559_v20  ;;  %7858 = vmatmul.mubr.msk.f32.gmra.mxu0 %vm2832_vm3, %v10336_v22  ;;  %v7484_v26 = vpop.f32.mrf.mxu1 }
 0x280   : > { %7909 = vmatmul.mubr.msk.f32.gmra.mxu1 %vm2832_vm3, %v10336_v22  ;;  %7929 = vmatprep.subr.mxu0 %v12220_v41 }
 0x281   : > { %7980 = vmatprep.subr.mxu1 %v12220_v41  ;;  %7930 = vmatpush3.msra.mxu0 %v10570_v39  ;;  %v4220_v39 = vld [vmem:[#allocation2 + $0x53] ss:$2 sm:$0xff] }
 0x282   : > { %7981 = vmatpush3.msra.mxu1 %v10577_v28  ;;  %7931 = vmatprep.subr.mxu0 %v12220_v41 }
 0x283   : > { %7982 = vmatprep.subr.mxu1 %v12220_v41  ;;  %7860 = vmatprep.mubr.msk.f32.mxu0 %vm8513_vm2, %v12220_v41  ;;  %v11076_v23 = vpop.f32.mrf.mxu0  ;;  %v11078_v4 = vpop.f32.mrf.mxu1 }
 0x284   : > { %7911 = vmatprep.mubr.msk.f32.mxu1 %vm8513_vm2, %v12220_v41  ;;  %7932 = vmatpush3.msra.mxu0 %v10586_v62 }
 0x285   : > { %7983 = vmatpush3.msra.mxu1 %v10593_v21  ;;  %7861 = vmatmul.mubr.msk.f32.gmra.mxu0 %vm2832_vm3, %v10366_v15  ;;  %v7436_v16 = vpop.f32.mrf.mxu0  ;;  %v7487_v11 = vpop.f32.mrf.mxu1 }
 0x286   : > { %7912 = vmatmul.mubr.msk.f32.gmra.mxu1 %vm2832_vm3, %v10366_v15  ;;  %7933 = vmatprep.subr.mxu0 %v12220_v41 }
 0x287   : > { %7984 = vmatprep.subr.mxu1 %v12220_v41  ;;  %7934 = vmatpush3.msra.mxu0 %v10604_v63  ;;  %v4222_v63 = vld [vmem:[#allocation2 + $0x63] ss:$2 sm:$0xff] }
 0x288   : > { %7985 = vmatpush3.msra.mxu1 %v10611_v35  ;;  %7935 = vmatprep.subr.mxu0 %v12220_v41  ;;  %v11090_v5 = vpop.f32.mrf.mxu0  ;;  %v11092_v51 = vpop.f32.mrf.mxu1 }
 0x289   : > { %7986 = vmatprep.subr.mxu1 %v12220_v41  ;;  %7863 = vmatprep.mubr.msk.f32.mxu0 %vm8513_vm2, %v12220_v41 }
 0x28a   : > { %7914 = vmatprep.mubr.msk.f32.mxu1 %vm8513_vm2, %v12220_v41  ;;  %7936 = vmatpush3.msra.mxu0 %v10620_v27  ;;  %v7439_v33 = vpop.f32.mrf.mxu0  ;;  %v7490_v59 = vpop.f32.mrf.mxu1 }
 0x28b   : > { %7987 = vmatpush3.msra.mxu1 %v12251_v49  ;;  %7864 = vmatmul.mubr.msk.f32.gmra.mxu0 %vm2832_vm3, %v12252_v24 }
 0x28c   : > { %7915 = vmatmul.mubr.msk.f32.gmra.mxu1 %vm2832_vm3, %v12252_v24  ;;  %7937 = vmatprep.subr.mxu0 %v12220_v41 }
 0x28d   : > { %7988 = vmatprep.subr.mxu1 %v12220_v41  ;;  %7938 = vmatpush3.msra.mxu0 %v12253_v54  ;;  %v11105_v9 = vpop.f32.mrf.mxu0  ;;  %v11107_v8 = vpop.f32.mrf.mxu1 }
 0x28e   : > { %7989 = vmatpush3.msra.mxu1 %v12254_v56  ;;  %7939 = vmatprep.subr.mxu0 %v12220_v41 }
 0x28f   : > { %7990 = vmatprep.subr.mxu1 %v12220_v41  ;;  %7940 = vmatpush3.msra.mxu0 %v12255_v6  ;;  %v7442_v22 = vpop.f32.mrf.mxu0  ;;  %v7493_v38 = vpop.f32.mrf.mxu1 }
 0x290   : > { %7941 = vmatprep.mubr.msk.f32.mxu0 %vm8513_vm2, %v12220_v41  ;;  %7991 = vmatpush3.msra.mxu1 %v12256_v47 }
 0x291   : > { %7992 = vmatprep.mubr.msk.f32.mxu1 %vm8513_vm2, %v12220_v41  ;;  %7942 = vmatmul.mubr.msk.f32.vlgmr.msra.gmra.mxu0 %vm2832_vm3, %v4210_v3  ;;  %v11119_v15 = vpop.f32.mrf.mxu0  ;;  %v11121_v32 = vpop.f32.mrf.mxu1 }
 0x292   : > { %7993 = vmatmul.mubr.msk.f32.vlgmr.msra.gmra.mxu1 %vm2832_vm3, %v4210_v3  ;;  %7944 = vmatprep.mubr.msk.f32.mxu0 %vm8513_vm2, %v12220_v41 }
 0x293   : > { %7995 = vmatprep.mubr.msk.f32.mxu1 %vm8513_vm2, %v12220_v41  ;;  %v7445_v43 = vpop.f32.mrf.mxu0  ;;  %v7496_v17 = vpop.f32.mrf.mxu1  ;;  %8019 = vmatprep.subr.mxu0 %v12220_v41 }
 0x294   : > { %8040 = vmatprep.subr.mxu1 %v12220_v41 }
 0x295   : > { %7945 = vmatmul.mubr.msk.f32.gmra.mxu0 %vm2832_vm3, %v4212_v57  ;;  %v11131_v40 = vpop.f32.mrf.mxu0  ;;  %v11133_v34 = vpop.f32.mrf.mxu1 }
 0x296   : > { %7996 = vmatmul.mubr.msk.f32.gmra.mxu1 %vm2832_vm3, %v4212_v57  ;;  %7947 = vmatprep.mubr.msk.f32.mxu0 %vm8513_vm2, %v12220_v41 }
 0x297   : > { %7998 = vmatprep.mubr.msk.f32.mxu1 %vm8513_vm2, %v12220_v41  ;;  %v7448_v25 = vpop.f32.mrf.mxu0  ;;  %v7499_v31 = vpop.f32.mrf.mxu1 }
 0x299   : > { %7948 = vmatmul.mubr.msk.f32.gmra.mxu0 %vm2832_vm3, %v4214_v14  ;;  %v11141_v18 = vpop.f32.mrf.mxu0  ;;  %v11143_v61 = vpop.f32.mrf.mxu1 }
 0x29a   : > { %7999 = vmatmul.mubr.msk.f32.gmra.mxu1 %vm2832_vm3, %v4214_v14  ;;  %7950 = vmatprep.mubr.msk.f32.mxu0 %vm8513_vm2, %v12220_v41 }
 0x29b   : > { %8001 = vmatprep.mubr.msk.f32.mxu1 %vm8513_vm2, %v12220_v41  ;;  %v7451_v52 = vpop.f32.mrf.mxu0  ;;  %v7502_v12 = vpop.f32.mrf.mxu1 }
 0x29d   : > { %7951 = vmatmul.mubr.msk.f32.gmra.mxu0 %vm2832_vm3, %v4216_v36  ;;  %v11151_v50 = vpop.f32.mrf.mxu0 }
 0x29e   : > { %8002 = vmatmul.mubr.msk.f32.gmra.mxu1 %vm2832_vm3, %v4216_v36  ;;  %7953 = vmatprep.mubr.msk.f32.mxu0 %vm8513_vm2, %v12220_v41  ;;  %v11156_v37 = vpop.f32.mrf.mxu1 }
 0x29f   : > { %8004 = vmatprep.mubr.msk.f32.mxu1 %vm8513_vm2, %v12220_v41  ;;  %v7454_v42 = vpop.f32.mrf.mxu0 }
 0x2a0   : > { %v7505_v29 = vpop.f32.mrf.mxu1 }
 0x2a1   : > { %7954 = vmatmul.mubr.msk.f32.gmra.mxu0 %vm2832_vm3, %v4218_v58 }
 0x2a2   : > { %8005 = vmatmul.mubr.msk.f32.gmra.mxu1 %vm2832_vm3, %v4218_v58  ;;  %7956 = vmatprep.mubr.msk.f32.mxu0 %vm8513_vm2, %v12220_v41 }
 0x2a3   : > { %8007 = vmatprep.mubr.msk.f32.mxu1 %vm8513_vm2, %v12220_v41  ;;  %v11166_v20 = vpop.f32.mrf.mxu0 }
 0x2a4   : > { %v11168_v28 = vpop.f32.mrf.mxu1 }
 0x2a5   : > { %7957 = vmatmul.mubr.msk.f32.gmra.mxu0 %vm2832_vm3, %v4220_v39  ;;  %v7457_v62 = vpop.f32.mrf.mxu0 }
 0x2a6   : > { %8008 = vmatmul.mubr.msk.f32.gmra.mxu1 %vm2832_vm3, %v4220_v39  ;;  %7959 = vmatprep.mubr.msk.f32.mxu0 %vm8513_vm2, %v12220_v41  ;;  %v7508_v21 = vpop.f32.mrf.mxu1 }
 0x2a7   : > { %8010 = vmatprep.mubr.msk.f32.mxu1 %vm8513_vm2, %v12220_v41 }
 0x2a9   : > { %7960 = vmatmul.mubr.msk.f32.gmra.mxu0 %vm2832_vm3, %v4222_v63  ;;  %v3288_v35 = vpop.f32.mrf.mxu0 }
 0x2aa   : > { %8011 = vmatmul.mubr.msk.f32.gmra.mxu1 %vm2832_vm3, %v4222_v63  ;;  %7962 = vmatprep.mubr.msk.f32.mxu0 %vm8513_vm2, %v12220_v41  ;;  %v11181_v27 = vadd.f32 %v3288_v35, %v11059_v10  ;;  %v3401_v46 = vpop.f32.mrf.mxu1 }
 0x2ab   : > { %8013 = vmatprep.mubr.msk.f32.mxu1 %vm8513_vm2, %v12220_v41  ;;  %v11186_v30 = vadd.f32 %v3401_v46, %v11061_v44  ;;  %v7535_v55 = vpop.f32.mrf.mxu0 }
 0x2ac   : > { %v7586_v48 = vpop.f32.mrf.mxu1 }
 0x2ad   : > { %7963 = vmatmul.mubr.msk.f32.gmra.mxu0 %vm2832_vm3, %v4224_v53  ;;  %v3293_v7 = vpop.f32.mrf.mxu0 }
 0x2ae   : > { %8014 = vmatmul.mubr.msk.f32.gmra.mxu1 %vm2832_vm3, %v4224_v53  ;;  %7965 = vmatprep.mubr.msk.f32.mxu0 %vm8513_vm2, %v12220_v41  ;;  %v3294_v1 = vadd.f32 %v3293_v7, %v11076_v23  ;;  %v3406_v13 = vpop.f32.mrf.mxu1 }
 0x2af   : > { %8016 = vmatprep.mubr.msk.f32.mxu1 %vm8513_vm2, %v12220_v41  ;;  %v3407_v0 = vadd.f32 %v3406_v13, %v11078_v4  ;;  %v7538_v60 = vpop.f32.mrf.mxu0 }
 0x2b0   : > { %v7589_v2 = vpop.f32.mrf.mxu1 }
 0x2b1   : > { %7966 = vmatmul.mubr.msk.f32.gmra.mxu0 %vm2832_vm3, %v4226_v19  ;;  %v3298_v10 = vpop.f32.mrf.mxu0 }
 0x2b2   : > { %8017 = vmatmul.mubr.msk.f32.gmra.mxu1 %vm2832_vm3, %v4226_v19  ;;  %v3299_v44 = vadd.f32 %v3298_v10, %v11090_v5  ;;  %v3411_v45 = vpop.f32.mrf.mxu1  ;;  %8037 = vmatprep.mubr.msk.f32.mxu0 %vm8513_vm2, %v12220_v41 }
 0x2b3   : > { %v3412_v26 = vadd.f32 %v3411_v45, %v11092_v51  ;;  %v7541_v23 = vpop.f32.mrf.mxu0  ;;  %8058 = vmatprep.mubr.msk.f32.mxu1 %vm8513_vm2, %v12220_v41 }
 0x2b4   : > { %v7592_v4 = vpop.f32.mrf.mxu1 }
 0x2b5   : > { %v3303_v16 = vpop.f32.mrf.mxu0 }
 0x2b6   : > { %v3304_v11 = vadd.f32 %v3303_v16, %v11105_v9  ;;  %v3416_v49 = vpop.f32.mrf.mxu1 }
 0x2b7   : > { %v3417_v24 = vadd.f32 %v3416_v49, %v11107_v8  ;;  %v7544_v33 = vpop.f32.mrf.mxu0 }
 0x2b8   : > { %v7595_v59 = vpop.f32.mrf.mxu1 }
 0x2b9   : > { %v3308_v5 = vpop.f32.mrf.mxu0 }
 0x2ba   : > { %v3309_v54 = vadd.f32 %v3308_v5, %v11119_v15  ;;  %v3421_v56 = vpop.f32.mrf.mxu1 }
 0x2bb   : > { %v3422_v6 = vadd.f32 %v3421_v56, %v11121_v32  ;;  %v7547_v51 = vpop.f32.mrf.mxu0 }
 0x2bc   : > { %v7598_v22 = vpop.f32.mrf.mxu1 }
 0x2bd   : > { %v3313_v38 = vpop.f32.mrf.mxu0 }
 0x2be   : > { %v3314_v47 = vadd.f32 %v3313_v38, %v11131_v40  ;;  %v3426_v3 = vpop.f32.mrf.mxu1 }
 0x2bf   : > { %v3427_v43 = vadd.f32 %v3426_v3, %v11133_v34  ;;  %v7550_v9 = vpop.f32.mrf.mxu0 }
 0x2c0   : > { %v7601_v17 = vpop.f32.mrf.mxu1 }
 0x2c1   : > { %v3318_v57 = vpop.f32.mrf.mxu0 }
 0x2c2   : > { %v3319_v8 = vadd.f32 %v3318_v57, %v11141_v18  ;;  %v3431_v25 = vpop.f32.mrf.mxu1 }
 0x2c3   : > { %v3432_v31 = vadd.f32 %v3431_v25, %v11143_v61  ;;  %v7553_v15 = vpop.f32.mrf.mxu0 }
 0x2c4   : > { %v7604_v14 = vpop.f32.mrf.mxu1 }
 0x2c7   : > { %v3323_v52 = vpop.f32.mrf.mxu0 }
 0x2c8   : > { %v3324_v32 = vadd.f32 %v3323_v52, %v11151_v50  ;;  %v3436_v12 = vpop.f32.mrf.mxu1 }
 0x2c9   : > { %v3437_v36 = vadd.f32 %v3436_v12, %v11156_v37  ;;  %v7556_v40 = vpop.f32.mrf.mxu0 }
 0x2ca   : > { %v7607_v42 = vpop.f32.mrf.mxu1 }
 0x2cd   : > { %v3328_v58 = vpop.f32.mrf.mxu0 }
 0x2ce   : > { %v3329_v34 = vadd.f32 %v3328_v58, %v11166_v20  ;;  %v3441_v29 = vpop.f32.mrf.mxu1 }
 0x2cf   : > { %v3442_v39 = vadd.f32 %v3441_v29, %v11168_v28  ;;  %v7559_v18 = vpop.f32.mrf.mxu0 }
 0x2d0   : > { %v7610_v62 = vpop.f32.mrf.mxu1 }
 0x2d3   : > { %v3572_v21 = vpop.f32.mrf.mxu0 }
 0x2d4   : > { %v11217_v61 = vadd.f32 %v3572_v21, %v11181_v27  ;;  %v3698_v63 = vpop.f32.mrf.mxu1 }
 0x2d5   : > { %v11220_v50 = vadd.f32 %v3698_v63, %v11186_v30  ;;  %v7637_v35 = vpop.f32.mrf.mxu0 }
 0x2d6   : > { %v7688_v37 = vpop.f32.mrf.mxu1 }
 0x2d7   : > { %v3760_v46 = vmax.f32 %v11217_v61, %v11220_v50  ;;  %v3577_v55 = vpop.f32.mrf.mxu0 }
 0x2d8   : > { %v11224_v20 = vadd.f32 %v3577_v55, %v3294_v1  ;;  %v3703_v53 = vpop.f32.mrf.mxu1 }
 0x2d9   : > { %v11226_v28 = vadd.f32 %v3703_v53, %v3407_v0  ;;  %v7640_v48 = vpop.f32.mrf.mxu0 }
 0x2da   : > { %v7691_v7 = vpop.f32.mrf.mxu1 }
 0x2db   : > { %v3761_v27 = vmax.f32 %v11224_v20, %v11226_v28  ;;  %v3582_v13 = vpop.f32.mrf.mxu0 }
 0x2dc   : > { %v11230_v60 = vadd.f32 %v3582_v13, %v3299_v44  ;;  %v3708_v30 = vpop.f32.mrf.mxu1 }
 0x2dd   : > { %v11232_v19 = vadd.f32 %v3708_v30, %v3412_v26  ;;  %v7643_v2 = vpop.f32.mrf.mxu0 }
 0x2de   : > { %v7694_v10 = vpop.f32.mrf.mxu1 }
 0x2df   : > { %v3587_v45 = vpop.f32.mrf.mxu0 }
 0x2e0   : > { %v11236_v23 = vadd.f32 %v3587_v45, %v3304_v11  ;;  %v3713_v0 = vpop.f32.mrf.mxu1 }
 0x2e1   : > { %v11238_v4 = vadd.f32 %v3713_v0, %v3417_v24  ;;  %v7646_v16 = vpop.f32.mrf.mxu0 }
 0x2e2   : > { %v7697_v49 = vpop.f32.mrf.mxu1 }
 0x2e3   : > { %v3592_v33 = vpop.f32.mrf.mxu0 }
 0x2e4   : > { %v11242_v59 = vadd.f32 %v3592_v33, %v3309_v54  ;;  %v3718_v26 = vpop.f32.mrf.mxu1 }
 0x2e5   : > { %v11244_v5 = vadd.f32 %v3718_v26, %v3422_v6  ;;  %v7649_v56 = vpop.f32.mrf.mxu0 }
 0x2e6   : > { %v7700_v51 = vpop.f32.mrf.mxu1 }
 0x2e7   : > { %v3597_v22 = vpop.f32.mrf.mxu0 }
 0x2e8   : > { %v11248_v38 = vadd.f32 %v3597_v22, %v3314_v47  ;;  %v3723_v24 = vpop.f32.mrf.mxu1 }
 0x2e9   : > { %v11250_v3 = vadd.f32 %v3723_v24, %v3427_v43  ;;  %v7652_v9 = vpop.f32.mrf.mxu0 }
 0x2ea   : > { %v7703_v17 = vpop.f32.mrf.mxu1 }
 0x2eb   : > { %v3602_v57 = vpop.f32.mrf.mxu0 }
 0x2ec   : > { %v11254_v25 = vadd.f32 %v3602_v57, %v3319_v8  ;;  %v3728_v6 = vpop.f32.mrf.mxu1 }
 0x2ed   : > { %v11256_v15 = vadd.f32 %v3728_v6, %v3432_v31  ;;  %v7655_v14 = vpop.f32.mrf.mxu0 }
 0x2ee   : > { %v7706_v52 = vpop.f32.mrf.mxu1 }
 0x2f1   : > { %v3607_v12 = vpop.f32.mrf.mxu0 }
 0x2f2   : > { %v11260_v40 = vadd.f32 %v3607_v12, %v3324_v32  ;;  %v3733_v43 = vpop.f32.mrf.mxu1 }
 0x2f3   : > { %v11262_v42 = vadd.f32 %v3733_v43, %v3437_v36  ;;  %v7658_v58 = vpop.f32.mrf.mxu0 }
 0x2f4   : > { %v7709_v29 = vpop.f32.mrf.mxu1 }
 0x2f7   : > { %v3612_v18 = vpop.f32.mrf.mxu0 }
 0x2f8   : > { %v11266_v62 = vadd.f32 %v3612_v18, %v3329_v34  ;;  %v3738_v31 = vpop.f32.mrf.mxu1 }
 0x2f9   : > { %v11268_v21 = vadd.f32 %v3738_v31, %v3442_v39  ;;  %v7661_v63 = vpop.f32.mrf.mxu0 }
 0x2fa   : > { %v7712_v35 = vpop.f32.mrf.mxu1 }
 0x2fd   : > { %v3835_v37 = vpop.f32.mrf.mxu0 }
 0x2fe   : > { %v3945_v55 = vpop.f32.mrf.mxu1 }
 0x2ff   : > { %v7739_v36 = vpop.f32.mrf.mxu0 }
 0x300   : > { %v7790_v53 = vpop.f32.mrf.mxu1 }
 0x301   : > { %v3840_v48 = vpop.f32.mrf.mxu0 }
 0x302   : > { %v3950_v7 = vpop.f32.mrf.mxu1 }
 0x303   : > { %v7742_v13 = vpop.f32.mrf.mxu0 }
 0x304   : > { %v7793_v30 = vpop.f32.mrf.mxu1 }
 0x305   : > { %v3845_v2 = vpop.f32.mrf.mxu0 }
 0x306   : > { %v3955_v10 = vpop.f32.mrf.mxu1 }
 0x307   : > { %v7745_v34 = vpop.f32.mrf.mxu0 }
 0x308   : > { %v7796_v45 = vpop.f32.mrf.mxu1 }
 0x309   : > { %v3850_v0 = vpop.f32.mrf.mxu0 }
 0x30a   : > { %v3960_v39 = vpop.f32.mrf.mxu1 }
 0x30b   : > { %v7748_v16 = vpop.f32.mrf.mxu0 }
 0x30c   : > { %v7799_v49 = vpop.f32.mrf.mxu1 }
 0x30d   : > { %v3855_v33 = vpop.f32.mrf.mxu0 }
 0x30e   : > { %v3965_v26 = vpop.f32.mrf.mxu1 }
 0x30f   : > { %v7751_v56 = vpop.f32.mrf.mxu0 }
 0x310   : > { %v7802_v51 = vpop.f32.mrf.mxu1 }
 0x311   : > { %v11272_v22 = vpop.f32.mrf.mxu0 }
 0x312   : > { %v11274_v24 = vpop.f32.mrf.mxu1 }
 0x313   : > { %v7754_v9 = vpop.f32.mrf.mxu0 }
 0x314   : > { %v7805_v17 = vpop.f32.mrf.mxu1 }
 0x315   : > { %v11276_v57 = vpop.f32.mrf.mxu0 }
 0x316   : > { %v11278_v6 = vpop.f32.mrf.mxu1 }
 0x317   : > { %v7757_v14 = vpop.f32.mrf.mxu0 }
 0x318   : > { %v7808_v52 = vpop.f32.mrf.mxu1 }
 0x31b   : > { %v11280_v12 = vpop.f32.mrf.mxu0 }
 0x31c   : > { %v11282_v43 = vpop.f32.mrf.mxu1 }
 0x31d   : > { %v7760_v58 = vpop.f32.mrf.mxu0 }
 0x31e   : > { %v7811_v29 = vpop.f32.mrf.mxu1 }
 0x321   : > { %v11284_v18 = vpop.f32.mrf.mxu0 }
 0x322   : > { %v11286_v31 = vpop.f32.mrf.mxu1 }
 0x323   : > { %v7763_v63 = vpop.f32.mrf.mxu0 }
 0x324   : > { %v7814_v35 = vpop.f32.mrf.mxu1 }
 0x327   : > { %v4055_v36 = vpop.f32.mrf.mxu0 }
 0x328   : > { %v4056_v53 = vadd.f32 %v4055_v36, %v3835_v37  ;;  %v4165_v13 = vpop.f32.mrf.mxu1 }
 0x329   : > { %v4166_v30 = vadd.f32 %v4165_v13, %v3945_v55  ;;  %v7841_v34 = vpop.f32.mrf.mxu0 }
 0x32a   : > { %v7892_v45 = vpop.f32.mrf.mxu1 }
 0x32b   : > { %v4060_v16 = vpop.f32.mrf.mxu0 }
 0x32c   : > { %v4061_v49 = vadd.f32 %v4060_v16, %v3840_v48  ;;  %v4170_v56 = vpop.f32.mrf.mxu1 }
 0x32d   : > { %v4171_v51 = vadd.f32 %v4170_v56, %v3950_v7  ;;  %v7844_v9 = vpop.f32.mrf.mxu0 }
 0x32e   : > { %v7895_v17 = vpop.f32.mrf.mxu1 }
 0x32f   : > { %v4065_v14 = vpop.f32.mrf.mxu0 }
 0x330   : > { %v4066_v52 = vadd.f32 %v4065_v14, %v3845_v2  ;;  %v4175_v58 = vpop.f32.mrf.mxu1 }
 0x331   : > { %v4176_v29 = vadd.f32 %v4175_v58, %v3955_v10  ;;  %v7847_v32 = vpop.f32.mrf.mxu0 }
 0x332   : > { %v7898_v8 = vpop.f32.mrf.mxu1 }
 0x333   : > { %v4070_v63 = vpop.f32.mrf.mxu0 }
 0x334   : > { %v4071_v35 = vadd.f32 %v4070_v63, %v3850_v0  ;;  %v4180_v47 = vpop.f32.mrf.mxu1 }
 0x335   : > { %v4181_v37 = vadd.f32 %v4180_v47, %v3960_v39  ;;  %v7850_v36 = vpop.f32.mrf.mxu0 }
 0x336   : > { %v7901_v55 = vpop.f32.mrf.mxu1 }
 0x337   : > { %v4075_v13 = vpop.f32.mrf.mxu0 }
 0x338   : > { %v4076_v34 = vadd.f32 %v4075_v13, %v3855_v33  ;;  %v4185_v45 = vpop.f32.mrf.mxu1 }
 0x339   : > { %v4186_v48 = vadd.f32 %v4185_v45, %v3965_v26  ;;  %v7853_v16 = vpop.f32.mrf.mxu0 }
 0x33a   : > { %v7904_v7 = vpop.f32.mrf.mxu1 }
 0x33b   : > { %v4080_v56 = vpop.f32.mrf.mxu0 }
 0x33c   : > { %v4190_v9 = vpop.f32.mrf.mxu1 }
 0x33d   : > { %v7856_v17 = vpop.f32.mrf.mxu0 }
 0x33e   : > { %v7907_v2 = vpop.f32.mrf.mxu1 }
 0x33f   : > { %v4085_v14 = vpop.f32.mrf.mxu0 }
 0x340   : > { %v4195_v10 = vpop.f32.mrf.mxu1 }
 0x341   : > { %v7859_v32 = vpop.f32.mrf.mxu0 }
 0x342   : > { %v7910_v8 = vpop.f32.mrf.mxu1 }
 0x345   : > { %v11288_v58 = vpop.f32.mrf.mxu0 }
 0x346   : > { %v11290_v0 = vpop.f32.mrf.mxu1 }
 0x347   : > { %v7862_v47 = vpop.f32.mrf.mxu0 }
 0x348   : > { %v7913_v39 = vpop.f32.mrf.mxu1 }
 0x34b   : > { %v11292_v63 = vpop.f32.mrf.mxu0 }
 0x34c   : > { %v11294_v33 = vpop.f32.mrf.mxu1 }
 0x34d   : > { %v7865_v26 = vpop.f32.mrf.mxu0 }
 0x34e   : > { %v7916_v36 = vpop.f32.mrf.mxu1 }
 0x351   : > { %v4320_v55 = vpop.f32.mrf.mxu0 }
 0x352   : > { %v4474_v13 = vadd.f32 %v4320_v55, %v4056_v53  ;;  %v4430_v45 = vpop.f32.mrf.mxu1 }
 0x353   : > { %v4483_v16 = vadd.f32 %v4430_v45, %v4166_v30  ;;  %v7943_v7 = vpop.f32.mrf.mxu0 }
 0x354   : > { %v7994_v17 = vpop.f32.mrf.mxu1 }
 0x355   : > { %v4492_v2 = vmax.f32 %v4474_v13, %v4483_v16  ;;  %v4325_v32 = vpop.f32.mrf.mxu0  ;;  %v4081_v17 = vadd.f32 %v4080_v56, %v11272_v22 }
 0x356   : > { %v4475_v8 = vadd.f32 %v4325_v32, %v4061_v49  ;;  %v4435_v54 = vpop.f32.mrf.mxu1 }
 0x357   : > { %v11299_v47 = vmax.f32 %v3760_v46, %v4492_v2  ;;  %v4484_v39 = vadd.f32 %v4435_v54, %v4171_v51  ;;  %v7946_v11 = vpop.f32.mrf.mxu0  ;;  %v12257_v46 = vmax.f32 %v11230_v60, %v11232_v19  ;;  %v4191_v60 = vadd.f32 %v4190_v9, %v11274_v24 }
 0x358   : > { %v7997_v44 = vpop.f32.mrf.mxu1  ;;  %v12260_v24 = vmax.f32 %v11248_v38, %v11250_v3  ;;  %v4096_v3 = vadd.f32 %v11292_v63, %v11284_v18 }
 0x359   : > { %v4493_v26 = vmax.f32 %v4475_v8, %v4484_v39  ;;  %v4330_v36 = vpop.f32.mrf.mxu0 }
 0x35a   : > { %v4476_v1 = vadd.f32 %v4330_v36, %v4066_v52  ;;  %v4440_v53 = vpop.f32.mrf.mxu1 }
 0x35b   : > { %v11304_v30 = vmax.f32 %v3761_v27, %v4493_v26  ;;  %v4485_v55 = vadd.f32 %v4440_v53, %v4176_v29  ;;  %v7949_v49 = vpop.f32.mrf.mxu0  ;;  %v12258_v27 = vmax.f32 %v11236_v23, %v11238_v4  ;;  %v4086_v23 = vadd.f32 %v4085_v14, %v11276_v57 }
 0x35c   : > { %v8000_v13 = vpop.f32.mrf.mxu1  ;;  %v4201_v57 = vadd.f32 %v11290_v0, %v11282_v43 }
 0x35d   : > { %v4494_v45 = vmax.f32 %v4476_v1, %v4485_v55  ;;  %v4335_v16 = vpop.f32.mrf.mxu0 }
 0x35e   : > { %v4477_v61 = vadd.f32 %v4335_v16, %v4071_v35  ;;  %v4445_v50 = vpop.f32.mrf.mxu1  ;;  %v12261_v16 = vmax.f32 %v11254_v25, %v11256_v15 }
 0x35f   : > { %v11309_v44 = vmax.f32 %v12257_v46, %v4494_v45  ;;  %v4486_v11 = vadd.f32 %v4445_v50, %v4181_v37  ;;  %v7952_v54 = vpop.f32.mrf.mxu0 }
 0x360   : > { %v8003_v51 = vpop.f32.mrf.mxu1  ;;  %v12262_v54 = vmax.f32 %v11260_v40, %v11262_v42 }
 0x361   : > { %v4495_v52 = vmax.f32 %v4477_v61, %v4486_v11  ;;  %v4340_v7 = vpop.f32.mrf.mxu0 }
 0x362   : > { %v4478_v20 = vadd.f32 %v4340_v7, %v4076_v34  ;;  %v4450_v28 = vpop.f32.mrf.mxu1  ;;  %v12259_v34 = vmax.f32 %v11242_v59, %v11244_v5  ;;  %v4091_v59 = vadd.f32 %v11288_v58, %v11280_v12  ;;  %v4206_v12 = vadd.f32 %v11294_v33, %v11286_v31  ;;  %v6268_v31 = vld [vmem:[%s12006_s4] ss:$0 sm:$0xff] }
 0x363   : > { %v11314_v29 = vmax.f32 %v12258_v27, %v4495_v52  ;;  %v4487_v1 = vadd.f32 %v4450_v28, %v4186_v48  ;;  %v7955_v35 = vpop.f32.mrf.mxu0  ;;  %v4196_v48 = vadd.f32 %v4195_v10, %v11278_v6 }
 0x364   : > { %v8006_v2 = vpop.f32.mrf.mxu1 }
 0x365   : > { %v4496_v19 = vmax.f32 %v4478_v20, %v4487_v1  ;;  %v4345_v37 = vpop.f32.mrf.mxu0  ;;  %v12263_v20 = vmax.f32 %v11266_v62, %v11268_v21  ;;  %v4520_v1 = vadd.f32 %v6268_v31, %v11314_v29  ;;  %v4518_v29 = vadd.f32 %v6268_v31, %v11304_v30 }
 0x366   : > { %v4479_v32 = vadd.f32 %v4345_v37, %v4081_v17  ;;  %v4455_v8 = vpop.f32.mrf.mxu1  ;;  %v4519_v17 = vadd.f32 %v6268_v31, %v11309_v44  ;;  %v4517_v44 = vadd.f32 %v6268_v31, %v11299_v47  ;;  %v6271_v37 = vld [vmem:[%s12007_s5 + $0x8] sm:$0xff] }
 0x367   : > { %v4505_v39 = vmax.f32 %v12259_v34, %v4496_v19  ;;  %v4488_v26 = vadd.f32 %v4455_v8, %v4191_v60  ;;  %v7958_v36 = vpop.f32.mrf.mxu0  ;;  %v11377_v60 = vmax.f32 %v4520_v1, 0.0  ;;  %v11390_v30 = vmax.f32 %v4518_v29, 0.0  ;;  %v4712_v8 = vld [vmem:[%s12008_s6 + $0xb8] sm:$0xff]  ;;  %v5422_v1 = vld [vmem:[%s12008_s6 + $0x200] sm:$0xff] }
 0x368   : > { %v8009_v4 = vpop.f32.mrf.mxu1  ;;  %v11384_v19 = vmax.f32 %v4519_v17, 0.0  ;;  %v11396_v47 = vmax.f32 %v4517_v44, 0.0  ;;  %v4625_v34 = vld [vmem:[%s12008_s6 + $0x58] sm:$0xff]  ;;  %v4710_v36 = vld [vmem:[%s12008_s6 + $0xa8] sm:$0xff]  ;;  %v5420_v17 = vld [vmem:[%s12008_s6 + $0x1f0] sm:$0xff] }
 0x369   : > { %v4497_v53 = vmax.f32 %v4479_v32, %v4488_v26  ;;  %v4350_v22 = vpop.f32.mrf.mxu0  ;;  %v4521_v62 = vadd.f32 %v6268_v31, %v4505_v39  ;;  %v4535_v32 = vld [vmem:[%s12007_s5] sm:$0xff]  ;;  %v4711_v39 = vld [vmem:[%s12008_s6 + $0xb0] sm:$0xff]  ;;  %v4708_v4 = vld [vmem:[%s12008_s6 + $0x98] sm:$0xff] }
 0x36a   : > { %v4480_v56 = vadd.f32 %v4350_v22, %v4086_v23  ;;  %v4460_v55 = vpop.f32.mrf.mxu1  ;;  %v4624_v26 = vld [vmem:[%s12008_s6 + $0x50] sm:$0xff]  ;;  %v4709_v23 = vld [vmem:[%s12008_s6 + $0xa0] sm:$0xff] }
 0x36b   : > { %v4506_v9 = vmax.f32 %v12260_v24, %v4497_v53  ;;  %v4489_v49 = vadd.f32 %v4460_v55, %v4196_v48  ;;  %v7961_v13 = vpop.f32.mrf.mxu0  ;;  %v11370_v2 = vmax.f32 %v4521_v62, 0.0  ;;  %v4707_v48 = vld [vmem:[%s12008_s6 + $0x90] sm:$0xff]  ;;  %v4706_v53 = vld [vmem:[%s12008_s6 + $0x88] sm:$0xff]  ;;  %v4705_v22 = vld [vmem:[%s12008_s6 + $0x80] sm:$0xff] }
 0x36c   : > { %v8012_v5 = vpop.f32.mrf.mxu1  ;;  %v4703_v55 = vld [vmem:[%s12008_s6 + $0x70] sm:$0xff]  ;;  %v4702_v24 = vld [vmem:[%s12008_s6 + $0x68] sm:$0xff]  ;;  %v4622_v13 = vld [vmem:[%s12008_s6 + $0x40] sm:$0xff] }
 0x36d   : > { %v4498_v14 = vmax.f32 %v4480_v56, %v4489_v49  ;;  %v4355_v45 = vpop.f32.mrf.mxu0  ;;  %v4522_v40 = vadd.f32 %v6268_v31, %v4506_v9  ;;  %v4704_v56 = vld [vmem:[%s12008_s6 + $0x78] sm:$0xff]  ;;  %v4701_v9 = vld [vmem:[%s12008_s6 + $0x60] sm:$0xff]  ;;  %v4623_v49 = vld [vmem:[%s12008_s6 + $0x48] sm:$0xff] }
 0x36e   : > { %v4481_v6 = vadd.f32 %v4355_v45, %v4091_v59  ;;  %v4465_v10 = vpop.f32.mrf.mxu1  ;;  %v4621_v59 = vld [vmem:[%s12008_s6 + $0x38] sm:$0xff]  ;;  %v4620_v5 = vld [vmem:[%s12008_s6 + $0x30] sm:$0xff]  ;;  %v5418_v29 = vld [vmem:[%s12008_s6 + $0x1e0] sm:$0xff] }
 0x36f   : > { %v4507_v61 = vmax.f32 %v12261_v16, %v4498_v14  ;;  %v4490_v50 = vadd.f32 %v4465_v10, %v4201_v57  ;;  %v7964_v38 = vpop.f32.mrf.mxu0  ;;  %v11363_v35 = vmax.f32 %v4522_v40, 0.0  ;;  %v4619_v57 = vld [vmem:[%s12008_s6 + $0x28] sm:$0xff]  ;;  %v4618_v14 = vld [vmem:[%s12008_s6 + $0x20] sm:$0xff]  ;;  %v4617_v45 = vld [vmem:[%s12008_s6 + $0x18] sm:$0xff] }
 0x370   : > { %v8015_v46 = vpop.f32.mrf.mxu1  ;;  %v4615_v10 = vld [vmem:[%s12008_s6 + $0x8] sm:$0xff]  ;;  %v4614_v16 = vld [vmem:[%s12008_s6] sm:$0xff]  ;;  %v4946_v38 = vld [vmem:[%s12008_s6 + $0x118] sm:$0xff] }
 0x371   : > { %v4499_v58 = vmax.f32 %v4481_v6, %v4490_v50  ;;  %v4360_v11 = vpop.f32.mrf.mxu0  ;;  %v4523_v28 = vadd.f32 %v6268_v31, %v4507_v61  ;;  %v4616_v6 = vld [vmem:[%s12008_s6 + $0x10] sm:$0xff]  ;;  %v5426_v40 = vld [vmem:[%s12008_s6 + $0x220] sm:$0xff] }
 0x372   : > { %v4482_v43 = vadd.f32 %v4360_v11, %v4096_v3  ;;  %v4470_v0 = vpop.f32.mrf.mxu1  ;;  %v4943_v11 = vld [vmem:[%s12008_s6 + $0x100] sm:$0xff]  ;;  %v5424_v62 = vld [vmem:[%s12008_s6 + $0x210] sm:$0xff] }
 0x373   : > { %v4508_v51 = vmax.f32 %v12262_v54, %v4499_v58  ;;  %v4491_v52 = vadd.f32 %v4470_v0, %v4206_v12  ;;  %v7967_v25 = vpop.f32.mrf.mxu0  ;;  %v11356_v21 = vmax.f32 %v4523_v28, 0.0  ;;  %v4945_v12 = vld [vmem:[%s12008_s6 + $0x110] sm:$0xff]  ;;  %v4944_v58 = vld [vmem:[%s12008_s6 + $0x108] sm:$0xff] }
 0x374   : > { %v8018_v15 = vpop.f32.mrf.mxu1  ;;  %v4941_v0 = vld [vmem:[%s12008_s6 + $0xf0] sm:$0xff]  ;;  %v4940_v54 = vld [vmem:[%s12008_s6 + $0xe8] sm:$0xff]  ;;  %v4938_v25 = vld [vmem:[%s12008_s6 + $0xd8] sm:$0xff] }
 0x375   : > { %v4500_v7 = vmax.f32 %v4482_v43, %v4491_v52  ;;  %v4524_v63 = vadd.f32 %v6268_v31, %v4508_v51  ;;  %v4942_v43 = vld [vmem:[%s12008_s6 + $0xf8] sm:$0xff]  ;;  %v4939_v51 = vld [vmem:[%s12008_s6 + $0xe0] sm:$0xff]  ;;  %v6276_v52 = vld [vmem:[%s12007_s5 + $0x10] sm:$0xff] }
 0x376   : > { %v4937_v15 = vld [vmem:[%s12008_s6 + $0xd0] sm:$0xff] }
 0x377   : > { %v4509_v18 = vmax.f32 %v12263_v20, %v4500_v7  ;;  %v11348_v42 = vmax.f32 %v4524_v63, 0.0  ;;  %v6280_v7 = vld [vmem:[%s12007_s5 + $0x18] sm:$0xff]  ;;  %v6284_v20 = vld [vmem:[%s12007_s5 + $0x20] sm:$0xff]  ;;  %v6288_v63 = vld [vmem:[%s12007_s5 + $0x28] sm:$0xff] }
 0x378   : > { %v5428_v28 = vld [vmem:[%s12008_s6 + $0x230] sm:$0xff] }
 0x379   : > { %v4525_v33 = vadd.f32 %v6268_v31, %v4509_v18  ;;  %v4936_v18 = vld [vmem:[%s12008_s6 + $0xc8] sm:$0xff]  ;;  %v4935_v31 = vld [vmem:[%s12008_s6 + $0xc0] sm:$0xff] }
 0x37b   : > { %v11346_v27 = vmax.f32 %v4525_v33, 0.0  ;;  %v5429_v33 = vld [vmem:[%s12008_s6 + $0x238] sm:$0xff] }
 0x37d   : > { %8020 = vmatpush3.msk.msra.mxu0 %vm4540_vm5, %v11346_v27  ;;  %8041 = vmatpush3.msk.msra.mxu1 %vm4540_vm5, %v11346_v27 }
 0x37e   : > { %8021 = vmatprep.subr.mxu0 %v12220_v41  ;;  %8042 = vmatprep.subr.mxu1 %v12220_v41 }
 0x37f   : > { %8022 = vmatpush3.msra.mxu0 %v11348_v42  ;;  %8043 = vmatpush3.msra.mxu1 %v11348_v42 }
 0x380   : > { %8023 = vmatprep.subr.mxu0 %v12220_v41  ;;  %8044 = vmatprep.subr.mxu1 %v12220_v41 }
 0x381   : > { %8024 = vmatpush3.msra.mxu0 %v11356_v21  ;;  %8045 = vmatpush3.msra.mxu1 %v11356_v21 }
 0x382   : > { %8025 = vmatprep.subr.mxu0 %v12220_v41  ;;  %8046 = vmatprep.subr.mxu1 %v12220_v41 }
 0x383   : > { %8026 = vmatpush3.msra.mxu0 %v11363_v35  ;;  %8047 = vmatpush3.msra.mxu1 %v11363_v35 }
 0x384   : > { %8027 = vmatprep.subr.mxu0 %v12220_v41  ;;  %8048 = vmatprep.subr.mxu1 %v12220_v41 }
 0x385   : > { %8028 = vmatpush3.msra.mxu0 %v11370_v2  ;;  %8049 = vmatpush3.msra.mxu1 %v11370_v2 }
 0x386   : > { %8029 = vmatprep.subr.mxu0 %v12220_v41  ;;  %8050 = vmatprep.subr.mxu1 %v12220_v41 }
 0x387   : > { %8030 = vmatpush3.msra.mxu0 %v11377_v60  ;;  %8051 = vmatpush3.msra.mxu1 %v11377_v60 }
 0x388   : > { %8031 = vmatprep.subr.mxu0 %v12220_v41  ;;  %8052 = vmatprep.subr.mxu1 %v12220_v41 }
 0x389   : > { %8032 = vmatpush3.msra.mxu0 %v11384_v19  ;;  %8053 = vmatpush3.msra.mxu1 %v11384_v19 }
 0x38a   : > { %8033 = vmatprep.subr.mxu0 %v12220_v41  ;;  %8054 = vmatprep.subr.mxu1 %v12220_v41 }
 0x38b   : > { %8034 = vmatpush3.msra.mxu0 %v11390_v30  ;;  %8055 = vmatpush3.msra.mxu1 %v11390_v30 }
 0x38c   : > { %8035 = vmatprep.subr.mxu0 %v12220_v41  ;;  %8056 = vmatprep.subr.mxu1 %v12220_v41 }
 0x38d   : > { %8036 = vmatpush3.msra.mxu0 %v11396_v47  ;;  %8057 = vmatpush3.msra.mxu1 %v11396_v47 }
 0x38e   : > { %8059 = vmatmul.mubr.msk.f32.vlgmr.msra.gmra.mxu1 %vm4536_vm6, %v6271_v37  ;;  %8038 = vmatmul.mubr.msk.f32.vlgmr.msra.gmra.mxu0 %vm4536_vm6, %v4535_v32  ;;  %v5107_v37 = vld [vmem:[%s12008_s6 + $0x178] sm:$0xff] }
 0x38f   : > { %8061 = vmatprep.subr.mxu0 %v12220_v41  ;;  %8088 = vmatprep.subr.mxu1 %v12220_v41 }
 0x390   : > { %8062 = vmatpush3.msra.mxu0 %v4712_v8  ;;  %8089 = vmatpush3.msra.mxu1 %v4625_v34  ;;  %v5106_v8 = vld [vmem:[%s12008_s6 + $0x170] sm:$0xff] }
 0x391   : > { %8063 = vmatprep.subr.mxu0 %v12220_v41  ;;  %8090 = vmatprep.subr.mxu1 %v12220_v41 }
 0x392   : > { %8064 = vmatpush3.msra.mxu0 %v4711_v39  ;;  %8091 = vmatpush3.msra.mxu1 %v4624_v26  ;;  %v5105_v39 = vld [vmem:[%s12008_s6 + $0x168] sm:$0xff]  ;;  %v5104_v26 = vld [vmem:[%s12008_s6 + $0x160] sm:$0xff] }
 0x393   : > { %8065 = vmatprep.subr.mxu0 %v12220_v41  ;;  %8085 = vmatprep.mubr.msk.f32.mxu0 %vm8513_vm2, %v12220_v41 }
 0x394   : > { %8066 = vmatpush3.msra.mxu0 %v4710_v36  ;;  %8092 = vmatprep.subr.mxu1 %v12220_v41  ;;  %v5103_v36 = vld [vmem:[%s12008_s6 + $0x158] sm:$0xff] }
 0x395   : > { %8067 = vmatprep.subr.mxu0 %v12220_v41  ;;  %8112 = vmatprep.mubr.msk.f32.mxu1 %vm8513_vm2, %v12220_v41 }
 0x396   : > { %8068 = vmatpush3.msra.mxu0 %v4709_v23  ;;  %8093 = vmatpush3.msra.mxu1 %v4623_v49  ;;  %v5102_v23 = vld [vmem:[%s12008_s6 + $0x150] sm:$0xff]  ;;  %v5268_v49 = vld [vmem:[%s12008_s6 + $0x1d8] sm:$0xff] }
 0x397   : > { %8069 = vmatprep.subr.mxu0 %v12220_v41  ;;  %8094 = vmatprep.subr.mxu1 %v12220_v41 }
 0x398   : > { %8070 = vmatpush3.msra.mxu0 %v4708_v4  ;;  %8095 = vmatpush3.msra.mxu1 %v4622_v13  ;;  %v5101_v4 = vld [vmem:[%s12008_s6 + $0x148] sm:$0xff]  ;;  %v5267_v13 = vld [vmem:[%s12008_s6 + $0x1d0] sm:$0xff] }
 0x399   : > { %8071 = vmatprep.subr.mxu0 %v12220_v41  ;;  %8096 = vmatprep.subr.mxu1 %v12220_v41 }
 0x39a   : > { %8072 = vmatpush3.msra.mxu0 %v4707_v48  ;;  %8097 = vmatpush3.msra.mxu1 %v4621_v59  ;;  %v5100_v48 = vld [vmem:[%s12008_s6 + $0x140] sm:$0xff]  ;;  %v5266_v59 = vld [vmem:[%s12008_s6 + $0x1c8] sm:$0xff] }
 0x39b   : > { %8073 = vmatprep.subr.mxu0 %v12220_v41  ;;  %8098 = vmatprep.subr.mxu1 %v12220_v41 }
 0x39c   : > { %8074 = vmatpush3.msra.mxu0 %v4706_v53  ;;  %8099 = vmatpush3.msra.mxu1 %v4620_v5  ;;  %v5099_v53 = vld [vmem:[%s12008_s6 + $0x138] sm:$0xff]  ;;  %v5265_v5 = vld [vmem:[%s12008_s6 + $0x1c0] sm:$0xff] }
 0x39d   : > { %8075 = vmatprep.subr.mxu0 %v12220_v41  ;;  %8100 = vmatprep.subr.mxu1 %v12220_v41 }
 0x39e   : > { %8076 = vmatpush3.msra.mxu0 %v4705_v22  ;;  %8101 = vmatpush3.msra.mxu1 %v4619_v57  ;;  %v5098_v22 = vld [vmem:[%s12008_s6 + $0x130] sm:$0xff]  ;;  %v5264_v57 = vld [vmem:[%s12008_s6 + $0x1b8] sm:$0xff] }
 0x39f   : > { %8077 = vmatprep.subr.mxu0 %v12220_v41  ;;  %8102 = vmatprep.subr.mxu1 %v12220_v41 }
 0x3a0   : > { %8078 = vmatpush3.msra.mxu0 %v4704_v56  ;;  %8103 = vmatpush3.msra.mxu1 %v4618_v14  ;;  %v5263_v14 = vld [vmem:[%s12008_s6 + $0x1b0] sm:$0xff] }
 0x3a1   : > { %8079 = vmatprep.subr.mxu0 %v12220_v41  ;;  %8104 = vmatprep.subr.mxu1 %v12220_v41 }
 0x3a2   : > { %8080 = vmatpush3.msra.mxu0 %v4703_v55  ;;  %8105 = vmatpush3.msra.mxu1 %v4617_v45  ;;  %v5097_v55 = vld [vmem:[%s12008_s6 + $0x128] sm:$0xff] }
 0x3a3   : > { %8081 = vmatprep.subr.mxu0 %v12220_v41  ;;  %8106 = vmatprep.subr.mxu1 %v12220_v41  ;;  %v5262_v45 = vld [vmem:[%s12008_s6 + $0x1a8] sm:$0xff] }
 0x3a4   : > { %8082 = vmatpush3.msra.mxu0 %v4702_v24  ;;  %8107 = vmatpush3.msra.mxu1 %v4616_v6 }
 0x3a5   : > { %8083 = vmatprep.subr.mxu0 %v12220_v41  ;;  %8108 = vmatprep.subr.mxu1 %v12220_v41 }
 0x3a6   : > { %8084 = vmatpush3.msra.mxu0 %v4701_v9  ;;  %8109 = vmatpush3.msra.mxu1 %v4615_v10  ;;  %v5096_v9 = vld [vmem:[%s12008_s6 + $0x120] sm:$0xff] }
 0x3a7   : > { %8115 = vmatprep.subr.mxu0 %v12220_v41  ;;  %8110 = vmatprep.subr.mxu1 %v12220_v41  ;;  %v5261_v10 = vld [vmem:[%s12008_s6 + $0x1a0] sm:$0xff] }
 0x3a8   : > { %8111 = vmatpush3.msra.mxu1 %v4614_v16 }
 0x3a9   : > { %8136 = vmatprep.subr.mxu1 %v12220_v41 }
 0x44e   : > { %v4697_v61 = vpop.f32.mrf.mxu1  ;;  %v4610_v50 = vpop.f32.mrf.mxu0 }
 0x44f   : > { %8086 = vmatmul.mubr.msk.f32.vlgmr.msra.gmra.mxu0 %vm4713_vm7, %v4697_v61  ;;  %8113 = vmatmul.mubr.msk.f32.vlgmr.msra.gmra.mxu1 %vm4713_vm7, %v4610_v50  ;;  %v5260_v61 = vld [vmem:[%s12008_s6 + $0x198] sm:$0xff]  ;;  %v5259_v50 = vld [vmem:[%s12008_s6 + $0x190] sm:$0xff] }
 0x450   : > { %8116 = vmatpush3.msk.msra.mxu0 %vm4540_vm5, %v11346_v27  ;;  %8133 = vmatprep.mubr.msk.f32.mxu0 %vm8513_vm2, %v12220_v41  ;;  %v8060_v3 = vpop.f32.mrf.mxu1  ;;  %v8039_v46 = vpop.f32.mrf.mxu0 }
 0x451   : > { %8117 = vmatprep.subr.mxu0 %v12220_v41  ;;  %8137 = vmatpush3.msra.mxu1 %v4946_v38  ;;  %v5258_v38 = vld [vmem:[%s12008_s6 + $0x188] sm:$0xff]  ;;  %v5257_v3 = vld [vmem:[%s12008_s6 + $0x180] sm:$0xff] }
 0x452   : > { %8118 = vmatpush3.msra.mxu0 %v11348_v42  ;;  %8138 = vmatprep.subr.mxu1 %v12220_v41 }
 0x453   : > { %8119 = vmatprep.subr.mxu0 %v12220_v41  ;;  %8139 = vmatpush3.msra.mxu1 %v4945_v12 }
 0x454   : > { %8120 = vmatpush3.msra.mxu0 %v11356_v21  ;;  %8140 = vmatprep.subr.mxu1 %v12220_v41 }
 0x455   : > { %8121 = vmatprep.subr.mxu0 %v12220_v41  ;;  %8141 = vmatpush3.msra.mxu1 %v4944_v58  ;;  %v5528_v58 = vld [vmem:[%s12010_s8 + $0x78] sm:$0xff] }
 0x456   : > { %8122 = vmatpush3.msra.mxu0 %v11363_v35  ;;  %8142 = vmatprep.subr.mxu1 %v12220_v41 }
 0x457   : > { %8123 = vmatprep.subr.mxu0 %v12220_v41  ;;  %8143 = vmatpush3.msra.mxu1 %v4943_v11  ;;  %v5527_v11 = vld [vmem:[%s12010_s8 + $0x70] sm:$0xff] }
 0x458   : > { %8124 = vmatpush3.msra.mxu0 %v11370_v2  ;;  %8144 = vmatprep.subr.mxu1 %v12220_v41 }
 0x459   : > { %8125 = vmatprep.subr.mxu0 %v12220_v41  ;;  %8145 = vmatpush3.msra.mxu1 %v4942_v43  ;;  %v5526_v43 = vld [vmem:[%s12010_s8 + $0x68] sm:$0xff] }
 0x45a   : > { %8126 = vmatpush3.msra.mxu0 %v11377_v60  ;;  %8146 = vmatprep.subr.mxu1 %v12220_v41 }
 0x45b   : > { %8127 = vmatprep.subr.mxu0 %v12220_v41  ;;  %8147 = vmatpush3.msra.mxu1 %v4941_v0  ;;  %v5525_v0 = vld [vmem:[%s12010_s8 + $0x60] sm:$0xff] }
 0x45c   : > { %8128 = vmatpush3.msra.mxu0 %v11384_v19  ;;  %8148 = vmatprep.subr.mxu1 %v12220_v41 }
 0x45d   : > { %8129 = vmatprep.subr.mxu0 %v12220_v41  ;;  %8149 = vmatpush3.msra.mxu1 %v4940_v54  ;;  %v5524_v54 = vld [vmem:[%s12010_s8 + $0x58] sm:$0xff] }
 0x45e   : > { %8130 = vmatpush3.msra.mxu0 %v11390_v30  ;;  %8150 = vmatprep.subr.mxu1 %v12220_v41 }
 0x45f   : > { %8131 = vmatprep.subr.mxu0 %v12220_v41  ;;  %8151 = vmatpush3.msra.mxu1 %v4939_v51  ;;  %v5523_v51 = vld [vmem:[%s12010_s8 + $0x50] sm:$0xff] }
 0x460   : > { %8132 = vmatpush3.msra.mxu0 %v11396_v47  ;;  %8152 = vmatprep.subr.mxu1 %v12220_v41 }
 0x461   : > { %8134 = vmatmul.mubr.msk.f32.vlgmr.msra.gmra.mxu0 %vm4536_vm6, %v6276_v52  ;;  %8163 = vmatprep.subr.mxu0 %v12220_v41  ;;  %v5522_v52 = vld [vmem:[%s12010_s8 + $0x48] sm:$0xff] }
 0x462   : > { %8164 = vmatpush3.msk.msra.mxu0 %vm4540_vm5, %v11346_v27  ;;  %8181 = vmatprep.mubr.msk.f32.mxu0 %vm8513_vm2, %v12220_v41 }
 0x463   : > { %8165 = vmatprep.subr.mxu0 %v12220_v41  ;;  %8153 = vmatpush3.msra.mxu1 %v4938_v25  ;;  %v5521_v25 = vld [vmem:[%s12010_s8 + $0x40] sm:$0xff] }
 0x464   : > { %8166 = vmatpush3.msra.mxu0 %v11348_v42  ;;  %8154 = vmatprep.subr.mxu1 %v12220_v41 }
 0x465   : > { %8167 = vmatprep.subr.mxu0 %v12220_v41  ;;  %8155 = vmatpush3.msra.mxu1 %v4937_v15  ;;  %v5520_v15 = vld [vmem:[%s12010_s8 + $0x38] sm:$0xff] }
 0x466   : > { %8168 = vmatpush3.msra.mxu0 %v11356_v21  ;;  %8156 = vmatprep.subr.mxu1 %v12220_v41 }
 0x467   : > { %8169 = vmatprep.subr.mxu0 %v12220_v41  ;;  %8160 = vmatprep.mubr.msk.f32.mxu1 %vm8513_vm2, %v12220_v41 }
 0x468   : > { %8170 = vmatpush3.msra.mxu0 %v11363_v35  ;;  %8157 = vmatpush3.msra.mxu1 %v4936_v18  ;;  %v5517_v18 = vld [vmem:[%s12010_s8 + $0x20] sm:$0xff] }
 0x469   : > { %8171 = vmatprep.subr.mxu0 %v12220_v41  ;;  %8158 = vmatprep.subr.mxu1 %v12220_v41 }
 0x46a   : > { %8172 = vmatpush3.msra.mxu0 %v11370_v2  ;;  %8159 = vmatpush3.msra.mxu1 %v4935_v31  ;;  %v5516_v31 = vld [vmem:[%s12010_s8 + $0x18] sm:$0xff] }
 0x46b   : > { %8173 = vmatprep.subr.mxu0 %v12220_v41  ;;  %8184 = vmatprep.subr.mxu1 %v12220_v41 }
 0x46c   : > { %8174 = vmatpush3.msra.mxu0 %v11377_v60 }
 0x46d   : > { %8175 = vmatprep.subr.mxu0 %v12220_v41 }
 0x46e   : > { %8176 = vmatpush3.msra.mxu0 %v11384_v19 }
 0x46f   : > { %8177 = vmatprep.subr.mxu0 %v12220_v41 }
 0x470   : > { %8178 = vmatpush3.msra.mxu0 %v11390_v30 }
 0x471   : > { %8179 = vmatprep.subr.mxu0 %v12220_v41 }
 0x472   : > { %8180 = vmatpush3.msra.mxu0 %v11396_v47 }
 0x473   : > { %8211 = vmatprep.subr.mxu0 %v12220_v41  ;;  %8182 = vmatmul.mubr.msk.f32.vlgmr.msra.gmra.mxu0 %vm4536_vm6, %v6280_v7  ;;  %v5519_v7 = vld [vmem:[%s12010_s8 + $0x30] sm:$0xff] }
 0x474   : > { %8212 = vmatpush3.msk.msra.mxu0 %vm4540_vm5, %v11346_v27  ;;  %8229 = vmatprep.mubr.msk.f32.mxu0 %vm8513_vm2, %v12220_v41 }
 0x475   : > { %8213 = vmatprep.subr.mxu0 %v12220_v41 }
 0x476   : > { %8214 = vmatpush3.msra.mxu0 %v11348_v42 }
 0x477   : > { %8215 = vmatprep.subr.mxu0 %v12220_v41 }
 0x478   : > { %8216 = vmatpush3.msra.mxu0 %v11356_v21 }
 0x479   : > { %8217 = vmatprep.subr.mxu0 %v12220_v41 }
 0x47a   : > { %8218 = vmatpush3.msra.mxu0 %v11363_v35 }
 0x47b   : > { %8219 = vmatprep.subr.mxu0 %v12220_v41 }
 0x47c   : > { %8220 = vmatpush3.msra.mxu0 %v11370_v2 }
 0x47d   : > { %8221 = vmatprep.subr.mxu0 %v12220_v41 }
 0x47e   : > { %8222 = vmatpush3.msra.mxu0 %v11377_v60 }
 0x47f   : > { %8223 = vmatprep.subr.mxu0 %v12220_v41 }
 0x480   : > { %8224 = vmatpush3.msra.mxu0 %v11384_v19 }
 0x481   : > { %8225 = vmatprep.subr.mxu0 %v12220_v41 }
 0x482   : > { %8226 = vmatpush3.msra.mxu0 %v11390_v30 }
 0x483   : > { %8227 = vmatprep.subr.mxu0 %v12220_v41 }
 0x484   : > { %8228 = vmatpush3.msra.mxu0 %v11396_v47 }
 0x485   : > { %8259 = vmatprep.subr.mxu0 %v12220_v41  ;;  %8230 = vmatmul.mubr.msk.f32.vlgmr.msra.gmra.mxu0 %vm4536_vm6, %v6284_v20  ;;  %v5518_v20 = vld [vmem:[%s12010_s8 + $0x28] sm:$0xff] }
 0x486   : > { %8260 = vmatpush3.msk.msra.mxu0 %vm4540_vm5, %v11346_v27  ;;  %8277 = vmatprep.mubr.msk.f32.mxu0 %vm8513_vm2, %v12220_v41  ;;  %v5427_v27 = vld [vmem:[%s12008_s6 + $0x228] sm:$0xff] }
 0x487   : > { %8261 = vmatprep.subr.mxu0 %v12220_v41 }
 0x488   : > { %8262 = vmatpush3.msra.mxu0 %v11348_v42  ;;  %v5425_v42 = vld [vmem:[%s12008_s6 + $0x218] sm:$0xff] }
 0x489   : > { %8263 = vmatprep.subr.mxu0 %v12220_v41 }
 0x48a   : > { %8264 = vmatpush3.msra.mxu0 %v11356_v21  ;;  %v5423_v21 = vld [vmem:[%s12008_s6 + $0x208] sm:$0xff] }
 0x48b   : > { %8265 = vmatprep.subr.mxu0 %v12220_v41 }
 0x48c   : > { %8266 = vmatpush3.msra.mxu0 %v11363_v35  ;;  %v5421_v35 = vld [vmem:[%s12008_s6 + $0x1f8] sm:$0xff] }
 0x48d   : > { %8267 = vmatprep.subr.mxu0 %v12220_v41 }
 0x48e   : > { %8268 = vmatpush3.msra.mxu0 %v11370_v2  ;;  %v5419_v2 = vld [vmem:[%s12008_s6 + $0x1e8] sm:$0xff] }
 0x48f   : > { %8269 = vmatprep.subr.mxu0 %v12220_v41 }
 0x490   : > { %8270 = vmatpush3.msra.mxu0 %v11377_v60 }
 0x491   : > { %8271 = vmatprep.subr.mxu0 %v12220_v41 }
 0x492   : > { %8272 = vmatpush3.msra.mxu0 %v11384_v19 }
 0x493   : > { %8273 = vmatprep.subr.mxu0 %v12220_v41 }
 0x494   : > { %8274 = vmatpush3.msra.mxu0 %v11390_v30 }
 0x495   : > { %8275 = vmatprep.subr.mxu0 %v12220_v41 }
 0x496   : > { %8276 = vmatpush3.msra.mxu0 %v11396_v47 }
 0x497   : > { %8278 = vmatmul.mubr.msk.f32.vlgmr.msra.gmra.mxu0 %vm4536_vm6, %v6288_v63  ;;  %8280 = vmatprep.subr.mxu0 %v12220_v41  ;;  %v5515_v63 = vld [vmem:[%s12010_s8 + $0x10] sm:$0xff] }
 0x498   : > { %8304 = vmatprep.mubr.msk.f32.mxu0 %vm8513_vm2, %v12220_v41  ;;  %8281 = vmatpush3.msra.mxu0 %v5429_v33  ;;  %v5514_v33 = vld [vmem:[%s12010_s8 + $0x8] sm:$0xff] }
 0x499   : > { %8282 = vmatprep.subr.mxu0 %v12220_v41 }
 0x49a   : > { %8283 = vmatpush3.msra.mxu0 %v5428_v28  ;;  %v5513_v28 = vld [vmem:[%s12010_s8] sm:$0xff] }
 0x49b   : > { %8284 = vmatprep.subr.mxu0 %v12220_v41 }
 0x49c   : > { %8285 = vmatpush3.msra.mxu0 %v5427_v27  ;;  %v5622_v27 = vld [vmem:[%s12012_s10 + $0x78] sm:$0xff] }
 0x49d   : > { %8286 = vmatprep.subr.mxu0 %v12220_v41 }
 0x49e   : > { %8287 = vmatpush3.msra.mxu0 %v5426_v40  ;;  %v5621_v40 = vld [vmem:[%s12012_s10 + $0x70] sm:$0xff] }
 0x49f   : > { %8288 = vmatprep.subr.mxu0 %v12220_v41 }
 0x4a0   : > { %8289 = vmatpush3.msra.mxu0 %v5425_v42  ;;  %v5620_v42 = vld [vmem:[%s12012_s10 + $0x68] sm:$0xff] }
 0x4a1   : > { %8290 = vmatprep.subr.mxu0 %v12220_v41 }
 0x4a2   : > { %8291 = vmatpush3.msra.mxu0 %v5424_v62  ;;  %v5619_v62 = vld [vmem:[%s12012_s10 + $0x60] sm:$0xff] }
 0x4a3   : > { %8292 = vmatprep.subr.mxu0 %v12220_v41 }
 0x4a4   : > { %8293 = vmatpush3.msra.mxu0 %v5423_v21  ;;  %v5618_v21 = vld [vmem:[%s12012_s10 + $0x58] sm:$0xff] }
 0x4a5   : > { %8294 = vmatprep.subr.mxu0 %v12220_v41 }
 0x4a6   : > { %8295 = vmatpush3.msra.mxu0 %v5422_v1  ;;  %v5617_v1 = vld [vmem:[%s12012_s10 + $0x50] sm:$0xff] }
 0x4a7   : > { %8296 = vmatprep.subr.mxu0 %v12220_v41 }
 0x4a8   : > { %8297 = vmatpush3.msra.mxu0 %v5421_v35  ;;  %v5616_v35 = vld [vmem:[%s12012_s10 + $0x48] sm:$0xff] }
 0x4a9   : > { %8298 = vmatprep.subr.mxu0 %v12220_v41 }
 0x4aa   : > { %8299 = vmatpush3.msra.mxu0 %v5420_v17  ;;  %v5615_v17 = vld [vmem:[%s12012_s10 + $0x40] sm:$0xff] }
 0x4ab   : > { %8300 = vmatprep.subr.mxu0 %v12220_v41 }
 0x4ac   : > { %8301 = vmatpush3.msra.mxu0 %v5419_v2  ;;  %v5614_v2 = vld [vmem:[%s12012_s10 + $0x38] sm:$0xff] }
 0x4ad   : > { %8302 = vmatprep.subr.mxu0 %v12220_v41 }
 0x4ae   : > { %8303 = vmatpush3.msra.mxu0 %v5418_v29  ;;  %v5613_v29 = vld [vmem:[%s12012_s10 + $0x30] sm:$0xff] }
 0x4af   : > { %8342 = vmatprep.subr.mxu0 %v12220_v41 }
 0x50f   : > { %v4783_v60 = vpop.f32.mrf.mxu0  ;;  %v4856_v44 = vpop.f32.mrf.mxu1 }
 0x510   : > { %v11716_v19 = vadd.f32 %v4856_v44, %v4783_v60  ;;  %v5612_v60 = vld [vmem:[%s12012_s10 + $0x28] sm:$0xff]  ;;  %v5611_v44 = vld [vmem:[%s12012_s10 + $0x20] sm:$0xff] }
 0x511   : > { %v8087_v30 = vpop.f32.mrf.mxu0  ;;  %v8114_v47 = vpop.f32.mrf.mxu1 }
 0x512   : > { %v5610_v30 = vld [vmem:[%s12012_s10 + $0x18] sm:$0xff] }
 0x521   : > { %v4931_v32 = vpop.f32.mrf.mxu0 }
 0x522   : > { %8161 = vmatmul.mubr.msk.f32.vlgmr.msra.gmra.mxu1 %vm4713_vm7, %v4931_v32 }
 0x523   : > { %8185 = vmatpush3.msra.mxu1 %v5107_v37  ;;  %v8135_v34 = vpop.f32.mrf.mxu0  ;;  %8208 = vmatprep.mubr.msk.f32.mxu1 %vm8513_vm2, %v12220_v41 }
 0x524   : > { %8186 = vmatprep.subr.mxu1 %v12220_v41 }
 0x525   : > { %8187 = vmatpush3.msra.mxu1 %v5106_v8 }
 0x526   : > { %8188 = vmatprep.subr.mxu1 %v12220_v41 }
 0x527   : > { %8189 = vmatpush3.msra.mxu1 %v5105_v39 }
 0x528   : > { %8190 = vmatprep.subr.mxu1 %v12220_v41 }
 0x529   : > { %8191 = vmatpush3.msra.mxu1 %v5104_v26 }
 0x52a   : > { %8192 = vmatprep.subr.mxu1 %v12220_v41 }
 0x52b   : > { %8193 = vmatpush3.msra.mxu1 %v5103_v36 }
 0x52c   : > { %8194 = vmatprep.subr.mxu1 %v12220_v41 }
 0x52d   : > { %8195 = vmatpush3.msra.mxu1 %v5102_v23 }
 0x52e   : > { %8196 = vmatprep.subr.mxu1 %v12220_v41 }
 0x52f   : > { %8197 = vmatpush3.msra.mxu1 %v5101_v4 }
 0x530   : > { %8198 = vmatprep.subr.mxu1 %v12220_v41 }
 0x531   : > { %8199 = vmatpush3.msra.mxu1 %v5100_v48  ;;  %v6292_v48 = vld [vmem:[%s12009_s7] ss:$0 sm:$0xff] }
 0x532   : > { %8200 = vmatprep.subr.mxu1 %v12220_v41 }
 0x533   : > { %8201 = vmatpush3.msra.mxu1 %v5099_v53  ;;  %v5092_v56 = vpop.f32.mrf.mxu0 }
 0x534   : > { %8202 = vmatprep.subr.mxu1 %v12220_v41 }
 0x535   : > { %8203 = vmatpush3.msra.mxu1 %v5098_v22  ;;  %v8183_v24 = vpop.f32.mrf.mxu0 }
 0x536   : > { %8204 = vmatprep.subr.mxu1 %v12220_v41  ;;  %v5609_v24 = vld [vmem:[%s12012_s10 + $0x10] sm:$0xff] }
 0x537   : > { %8205 = vmatpush3.msra.mxu1 %v5097_v55 }
 0x538   : > { %8206 = vmatprep.subr.mxu1 %v12220_v41 }
 0x539   : > { %8207 = vmatpush3.msra.mxu1 %v5096_v9  ;;  %v5607_v9 = vld [vmem:[%s12012_s10] sm:$0xff] }
 0x53a   : > { %8209 = vmatmul.mubr.msk.f32.vlgmr.msra.gmra.mxu1 %vm4713_vm7, %v5092_v56  ;;  %8232 = vmatprep.subr.mxu1 %v12220_v41 }
 0x53b   : > { %8233 = vmatpush3.msra.mxu1 %v5268_v49  ;;  %8256 = vmatprep.mubr.msk.f32.mxu1 %vm8513_vm2, %v12220_v41  ;;  %v6293_v49 = vld [vmem:[%s12011_s9] ss:$0 sm:$0xff] }
 0x53c   : > { %8234 = vmatprep.subr.mxu1 %v12220_v41 }
 0x53d   : > { %8235 = vmatpush3.msra.mxu1 %v5267_v13 }
 0x53e   : > { %8236 = vmatprep.subr.mxu1 %v12220_v41 }
 0x53f   : > { %8237 = vmatpush3.msra.mxu1 %v5266_v59 }
 0x540   : > { %8238 = vmatprep.subr.mxu1 %v12220_v41 }
 0x541   : > { %8239 = vmatpush3.msra.mxu1 %v5265_v5 }
 0x542   : > { %8240 = vmatprep.subr.mxu1 %v12220_v41 }
 0x543   : > { %8241 = vmatpush3.msra.mxu1 %v5264_v57 }
 0x544   : > { %8242 = vmatprep.subr.mxu1 %v12220_v41 }
 0x545   : > { %8243 = vmatpush3.msra.mxu1 %v5263_v14  ;;  %v5253_v6 = vpop.f32.mrf.mxu0  ;;  %v6294_v14 = vld [vmem:[%s12013_s11] ss:$0 sm:$0xff] }
 0x546   : > { %8244 = vmatprep.subr.mxu1 %v12220_v41 }
 0x547   : > { %8245 = vmatpush3.msra.mxu1 %v5262_v45  ;;  %v8231_v16 = vpop.f32.mrf.mxu0 }
 0x548   : > { %8246 = vmatprep.subr.mxu1 %v12220_v41 }
 0x549   : > { %8247 = vmatpush3.msra.mxu1 %v5261_v10 }
 0x54a   : > { %8248 = vmatprep.subr.mxu1 %v12220_v41 }
 0x54b   : > { %8249 = vmatpush3.msra.mxu1 %v5260_v61 }
 0x54c   : > { %8250 = vmatprep.subr.mxu1 %v12220_v41 }
 0x54d   : > { %8251 = vmatpush3.msra.mxu1 %v5259_v50 }
 0x54e   : > { %8252 = vmatprep.subr.mxu1 %v12220_v41 }
 0x54f   : > { %8253 = vmatpush3.msra.mxu1 %v5258_v38 }
 0x550   : > { %8254 = vmatprep.subr.mxu1 %v12220_v41 }
 0x551   : > { %8255 = vmatpush3.msra.mxu1 %v5257_v3 }
 0x552   : > { %8257 = vmatmul.mubr.msk.f32.vlgmr.msra.gmra.mxu1 %vm4713_vm7, %v5253_v6  ;;  %8307 = vmatprep.subr.mxu1 %v12220_v41 }
 0x553   : > { %8339 = vmatprep.mubr.msk.f32.mxu1 %vm8513_vm2, %v12220_v41  ;;  %8308 = vmatpush3.msra.mxu1 %v5528_v58 }
 0x554   : > { %8309 = vmatprep.subr.mxu1 %v12220_v41 }
 0x555   : > { %8310 = vmatpush3.msra.mxu1 %v5527_v11 }
 0x556   : > { %8311 = vmatprep.subr.mxu1 %v12220_v41 }
 0x557   : > { %v5414_v46 = vpop.f32.mrf.mxu0  ;;  %8312 = vmatpush3.msra.mxu1 %v5526_v43 }
 0x558   : > { %8305 = vmatmul.mubr.msk.f32.vlgmr.msra.gmra.mxu0 %vm4713_vm7, %v5414_v46  ;;  %8313 = vmatprep.subr.mxu1 %v12220_v41 }
 0x559   : > { %v8279_v12 = vpop.f32.mrf.mxu0  ;;  %8374 = vmatprep.mubr.msk.f32.mxu0 %vm8513_vm2, %v12220_v41  ;;  %8314 = vmatpush3.msra.mxu1 %v5525_v0 }
 0x55a   : > { %8315 = vmatprep.subr.mxu1 %v12220_v41  ;;  %8343 = vmatpush3.msra.mxu0 %v5622_v27 }
 0x55b   : > { %8316 = vmatpush3.msra.mxu1 %v5524_v54  ;;  %8344 = vmatprep.subr.mxu0 %v12220_v41 }
 0x55c   : > { %8317 = vmatprep.subr.mxu1 %v12220_v41  ;;  %8345 = vmatpush3.msra.mxu0 %v5621_v40 }
 0x55d   : > { %8318 = vmatpush3.msra.mxu1 %v5523_v51  ;;  %8346 = vmatprep.subr.mxu0 %v12220_v41 }
 0x55e   : > { %8319 = vmatprep.subr.mxu1 %v12220_v41  ;;  %8347 = vmatpush3.msra.mxu0 %v5620_v42 }
 0x55f   : > { %8320 = vmatpush3.msra.mxu1 %v5522_v52  ;;  %8348 = vmatprep.subr.mxu0 %v12220_v41 }
 0x560   : > { %8321 = vmatprep.subr.mxu1 %v12220_v41  ;;  %8349 = vmatpush3.msra.mxu0 %v5619_v62 }
 0x561   : > { %8322 = vmatpush3.msra.mxu1 %v5521_v25  ;;  %8350 = vmatprep.subr.mxu0 %v12220_v41 }
 0x562   : > { %8323 = vmatprep.subr.mxu1 %v12220_v41  ;;  %8351 = vmatpush3.msra.mxu0 %v5618_v21 }
 0x563   : > { %8324 = vmatpush3.msra.mxu1 %v5520_v15  ;;  %8352 = vmatprep.subr.mxu0 %v12220_v41 }
 0x564   : > { %8325 = vmatprep.subr.mxu1 %v12220_v41  ;;  %8353 = vmatpush3.msra.mxu0 %v5617_v1 }
 0x565   : > { %8326 = vmatpush3.msra.mxu1 %v5519_v7  ;;  %8354 = vmatprep.subr.mxu0 %v12220_v41 }
 0x566   : > { %8327 = vmatprep.subr.mxu1 %v12220_v41  ;;  %8355 = vmatpush3.msra.mxu0 %v5616_v35 }
 0x567   : > { %8328 = vmatpush3.msra.mxu1 %v5518_v20  ;;  %8356 = vmatprep.subr.mxu0 %v12220_v41 }
 0x568   : > { %8329 = vmatprep.subr.mxu1 %v12220_v41  ;;  %8357 = vmatpush3.msra.mxu0 %v5615_v17 }
 0x569   : > { %8330 = vmatpush3.msra.mxu1 %v5517_v18  ;;  %8358 = vmatprep.subr.mxu0 %v12220_v41 }
 0x56a   : > { %8331 = vmatprep.subr.mxu1 %v12220_v41  ;;  %8359 = vmatpush3.msra.mxu0 %v5614_v2 }
 0x56b   : > { %8332 = vmatpush3.msra.mxu1 %v5516_v31  ;;  %8360 = vmatprep.subr.mxu0 %v12220_v41 }
 0x56c   : > { %8333 = vmatprep.subr.mxu1 %v12220_v41  ;;  %8361 = vmatpush3.msra.mxu0 %v5613_v29 }
 0x56d   : > { %8334 = vmatpush3.msra.mxu1 %v5515_v63  ;;  %8362 = vmatprep.subr.mxu0 %v12220_v41 }
 0x56e   : > { %8335 = vmatprep.subr.mxu1 %v12220_v41  ;;  %8363 = vmatpush3.msra.mxu0 %v5612_v60 }
 0x56f   : > { %8336 = vmatpush3.msra.mxu1 %v5514_v33  ;;  %8364 = vmatprep.subr.mxu0 %v12220_v41 }
 0x570   : > { %8337 = vmatprep.subr.mxu1 %v12220_v41  ;;  %8365 = vmatpush3.msra.mxu0 %v5611_v44 }
 0x571   : > { %8338 = vmatpush3.msra.mxu1 %v5513_v28  ;;  %8366 = vmatprep.subr.mxu0 %v12220_v41 }
 0x572   : > { %8367 = vmatpush3.msra.mxu0 %v5610_v30 }
 0x573   : > { %8368 = vmatprep.subr.mxu0 %v12220_v41 }
 0x574   : > { %8369 = vmatpush3.msra.mxu0 %v5609_v24 }
 0x575   : > { %8370 = vmatprep.subr.mxu0 %v12220_v41 }
 0x5e2   : > { %v5016_v47 = vpop.f32.mrf.mxu1 }
 0x5e3   : > { %v5020_v39 = vadd.f32 %v5016_v47, %v11716_v19  ;;  %v5608_v19 = vld [vmem:[%s12012_s10 + $0x8] sm:$0xff] }
 0x5e4   : > { %v8162_v37 = vpop.f32.mrf.mxu1  ;;  %8371 = vmatpush3.msra.mxu0 %v5608_v19 }
 0x5e5   : > { %8372 = vmatprep.subr.mxu0 %v12220_v41 }
 0x5e6   : > { %8373 = vmatpush3.msra.mxu0 %v5607_v9 }
 0x5fa   : > { %v5177_v32 = vpop.f32.mrf.mxu1 }
 0x5fb   : > { %v5181_v36 = vadd.f32 %v5177_v32, %v5020_v39 }
 0x5fc   : > { %v8210_v8 = vpop.f32.mrf.mxu1 }
 0x612   : > { %v5338_v34 = vpop.f32.mrf.mxu1 }
 0x613   : > { %v5342_v23 = vadd.f32 %v5338_v34, %v5181_v36 }
 0x614   : > { %v8258_v26 = vpop.f32.mrf.mxu1 }
 0x618   : > { %v5499_v4 = vpop.f32.mrf.mxu0 }
 0x619   : > { %v5503_v53 = vadd.f32 %v5499_v4, %v5342_v23 }
 0x61a   : > { %v8306_v22 = vpop.f32.mrf.mxu0 }
 0x61b   : > { %v5511_v56 = vadd.f32 %v6292_v48, %v5503_v53 }
 0x61d   : > { %v5512_v55 = vmax.f32 %v5511_v56, 0.0 }
 0x61f   : > { %8340 = vmatmul.mubr.f32.vlgmr.msra.gmra.mxu1 %v5512_v55 }
 0x6df   : > { %v5602_v13 = vpop.f32.mrf.mxu1 }
 0x6e0   : > { %v5603_v59 = vadd.f32 %v6293_v49, %v5602_v13 }
 0x6e1   : > { %v8341_v5 = vpop.f32.mrf.mxu1 }
 0x6e2   : > { %v5606_v57 = vmax.f32 %v5603_v59, 0.0 }
 0x6e4   : > { %8375 = vmatmul.mubr.f32.vlgmr.msra.gmra.mxu0 %v5606_v57 }
 0x7a4   : > { %v5696_v41 = vpop.f32.mrf.mxu0 }
 0x7a5   : > { %v5697_v45 = vadd.f32 %v6294_v14, %v5696_v41 }
 0x7a6   : > { %v8376_v6 = vpop.f32.mrf.mxu0 }
 0x7a7   : > { %5700 = vst [vmem:[%s407_s26] sm:$0xff] %v5697_v45 }
 0x7a8   : > { %8463 = shalt.err (!%p8460_p3)
}
 0x7a9   : > { %s8464_s0 = scalar_lea.hbm %s11967_s29, 128  ;;  %s8468_s20 = scalar_lea.hbm %s12014_s12, 256 }
 0x7aa   : > { %p8465_p4 = scmp.ne.s32.totalorder %s11967_s29, %s8464_s0  ;;  %p8469_p9 = scmp.lt.s32.totalorder %s11967_s29, %s12014_s12 }
 0x7ab   : > { %p8470_p10 = scmp.lt.s32.totalorder %s8468_s20, %s8464_s0 }
 0x7ac   : > { %p8466_p7 = pnand %p8465_p4, %p8618_p5 }
 0x7ad   : > { %p8471_p11 = por %p8470_p10, %p8469_p9 }
 0x7ae   : > { %p8467_p8 = pneg %p8466_p7 }
 0x7b0   : > { %p8472_p12 = pnand %p8471_p11, %p8467_p8 }
 0x7b2   : > { %8475 = shalt.err (!%p8472_p12)
}
 0x7b3   : > { %8385 = dma.vmem_to_hbm [thread:$0]  (%p8618_p5), %s5716_s19, 128, %s11967_s29, %s5702_s1  }
 0x7b4 PF: > { %p8391_p13 = scmp.ge.s32.totalorder %s8510_s24, 2  ;;  %s5727_s2 = sand.u32 1, %s8498_s21  }
 0x7b5   : > { %s5728_s17 = scalar_lea.sflag [#allocation4], %s5727_s2 }
 0x7b6   : > { %p8388_p0 = pnand %p8391_p13, %p8622_p6 }
 0x7b8   : > { %p8389_p1 = pneg %p8388_p0 }
 0x7ba   : > { %8493 = dma.done.wait (%p8389_p1), %s5728_s17, 128  }
 0x7bb   : > { %8495 = vsyncadd (%p8389_p1), %s5728_s17, 4294967168  ;;  %p22_p2 = scmp.ge.s32.totalorder %s8605_s27, 4   ;;  %s12264_s21 = smov %s8502_s22 }
 0x7bc   : > { %s12265_s22 = smov %s8506_s23  ;;  %s12266_s23 = smov %s8616_s30 }
 0x7bd   : > { %s12267_s24 = smov %s8605_s27  ;;  %24 = sbr.rel (!%p22_p2) target bundleno = 7 (0x7), region = 224 }
 0x7c2   :  { %5733 = vsyncpa [#allocation4], 1 }
 0x7c3   :  { %5735 = vsyncpa [#allocation4 + $0x1], 1 }

</bundles_post_ra>
